<compile_context>
chip_gen: v5e
topology: v5e:2x2
jax: 0.10.0
libtpu: 0.0.40
codegen_flags: <defaults>
</compile_context>

<pallas_src>
import math

import numpy as np
import jax
import jax.numpy as jnp
from jax import lax
from jax.experimental import pallas as pl
from jax.experimental.pallas import tpu as pltpu

# ---------------- config (AAEC, small synthetic sizes) ----------------
EMB_DIM = 32        # PLM hidden size / GRU input
TRANS_DIM = 32      # bi-GRU output / context dim
ATT_DIM = 16
NREL = 3
NCLAUSE1 = 2
NCLAUSE2 = 2
NCLAUSE = 4         # nclause * att_dim / 2 must be an integer
KTOP = 2
NQ_AC = 3           # Premise / Claim / MajorClaim
NQ_AR = 3           # Support / Attack / no relation
NQ = NQ_AC + NQ_AR
EPS = 1e-6
OUT_PAD = 128       # lane-dense output width


# ---------------- bi-GRU kernel (batched over examples, one launch) ----------------
def _make_bigru_kernel(nmax, batch, hdim):
    """xf/xb: (nmax*batch, E) time-major; output (nmax*batch, 2*hdim) time-major."""
    def kernel(xf_ref, xb_ref, wih_f_ref, whh_f_ref, bih_f_ref, bhh_f_ref,
               wih_b_ref, whh_b_ref, bih_b_ref, bhh_b_ref, o_ref):
        H = hdim
        # Hoisted input projections for ALL timesteps (one dot per direction).
        gi_f_all = jnp.dot(xf_ref[...], wih_f_ref[...],
                           preferred_element_type=jnp.float32) + bih_f_ref[...]
        gi_b_all = jnp.dot(xb_ref[...], wih_b_ref[...],
                           preferred_element_type=jnp.float32) + bih_b_ref[...]
        whh_f = whh_f_ref[...]
        bhh_f = bhh_f_ref[...]
        whh_b = whh_b_ref[...]
        bhh_b = bhh_b_ref[...]

        def cell(gi, h, whh, bhh):
            gh = jnp.dot(h, whh, preferred_element_type=jnp.float32) + bhh
            r = jax.nn.sigmoid(gi[:, 0:H] + gh[:, 0:H])
            z = jax.nn.sigmoid(gi[:, H:2 * H] + gh[:, H:2 * H])
            n = jnp.tanh(gi[:, 2 * H:3 * H] + r * gh[:, 2 * H:3 * H])
            return (1.0 - z) * n + z * h

        h_f = jnp.zeros((batch, H), jnp.float32)
        h_b = jnp.zeros((batch, H), jnp.float32)
        outs = []
        for t in range(nmax):                      # static unroll; fwd & bwd interleaved
            gi_f = gi_f_all[t * batch:(t + 1) * batch, :]
            gi_b = gi_b_all[t * batch:(t + 1) * batch, :]
            h_f = cell(gi_f, h_f, whh_f, bhh_f)
            h_b = cell(gi_b, h_b, whh_b, bhh_b)
            outs.append(jnp.concatenate([h_f, h_b], axis=1))
        o_ref[...] = jnp.concatenate(outs, axis=0)     # single full-block store
    return kernel


# ---------------- fused scoring kernel (grid over examples) ----------------
def _make_scoring_kernel(nmax, mmax):
    nk = nmax + 1

    def softmax_rel(e1, e2, wrel, brel):
        # score_new: softmax(Wrel(tanh([e1, e2])))  -- single merged matmul
        logits = jnp.dot(jnp.tanh(jnp.concatenate([e1, e2], axis=1)), wrel,
                         preferred_element_type=jnp.float32) + brel
        return jax.nn.softmax(logits, axis=-1)

    def clause(rel, wc_t):
        return jnp.exp(jnp.dot(jnp.log(rel + EPS), wc_t,
                               preferred_element_type=jnp.float32))

    def hop1_k(src, tgt, mid, ms, wrel, brel, wcl_t, wcr_t):
        rel1 = softmax_rel(src, mid, wrel, brel)
        rel2 = softmax_rel(mid, tgt, wrel, brel)
        c = jnp.minimum(jnp.sqrt(clause(rel1, wcl_t) * clause(rel2, wcr_t)), 1.0)
        return c * ms                               # ms: (rows, 1)

    def ilp_all(score, wq_t2):
        # columns of wq_t2 are ordered clause-major: col = c * NQ + q
        S = jnp.exp(jnp.dot(jnp.log(score + EPS), wq_t2,
                            preferred_element_type=jnp.float32))
        fin = S[:, 0:NQ]
        for c in range(1, NCLAUSE):                 # vectorized NQ-wide maxima
            fin = jnp.maximum(fin, S[:, c * NQ:(c + 1) * NQ])
        return fin

    def loss_sum(pred, onehot):
        row_mask = jnp.sum(onehot, axis=1, keepdims=True)   # 1 valid row, 0 padded
        sel = jnp.where(onehot > 0.5, pred, 1.0 - pred)
        lf = -jnp.log(sel)
        lf = jnp.where(jnp.isnan(lf), 0.0, lf)               # matches torch NaN->0
        lf = jnp.where(row_mask > 0.5, lf, 0.0)              # drop padded rows
        s = jnp.sum(lf, axis=1, keepdims=True)
        return jnp.sum(s, axis=0, keepdims=True)             # (1, 1)

    def kernel(ac_ref, ctxm_ref, keymask_ref, oh_ac_ref, oh_ar_ref,
               w_ctx_ref, b_ctx_ref, wrel_ref, brel_ref, wf1_ref, wf2_ref,
               wc0_ref, wcl_ref, wcr_ref, wq_ref, selA_ref, selB_ref,
               oac_ref, oar_ref, oloss_ref):
        ac = ac_ref[...]                                      # (nmax, T)
        ctx = jnp.dot(ctxm_ref[...], w_ctx_ref[...],
                      preferred_element_type=jnp.float32) + b_ctx_ref[...]   # (1, T)
        wrel = wrel_ref[...]
        brel = brel_ref[...]
        wc0_t = wc0_ref[...]
        wcl_t = wcl_ref[...]
        wcr_t = wcr_ref[...]
        wq_t2 = wq_ref[...]
        selA = selA_ref[...]
        selB = selB_ref[...]

        # ---------- Find: findm scores + top-2 via one-hot selection ----------
        all_rep = jnp.concatenate([ac, ctx], axis=0)          # (nk, T)  keys
        a_col = jnp.dot(ac, wf1_ref[...], preferred_element_type=jnp.float32)       # (nmax, 1)
        b_col = jnp.dot(all_rep, wf2_ref[...], preferred_element_type=jnp.float32)  # (nk, 1)
        A2 = jnp.concatenate([a_col, jnp.ones((nmax, 1), jnp.float32)], axis=1)
        B2 = jnp.concatenate([jnp.ones((nk, 1), jnp.float32), b_col], axis=1)
        logits = lax.dot_general(A2, B2, (((1,), (1,)), ((), ())),
                                 preferred_element_type=jnp.float32)         # (nmax, nk)
        s = jax.nn.sigmoid(logits)
        s = jnp.where(keymask_ref[...] > 0.5, s, -1.0)        # mask padded keys

        col = lax.broadcasted_iota(jnp.int32, (nmax, nk), 1).astype(jnp.float32)
        big = float(nk)
        m1 = jnp.max(s, axis=1, keepdims=True)
        i1 = jnp.min(jnp.where(s >= m1, col, big), axis=1, keepdims=True)
        oh1 = (col == i1).astype(jnp.float32)
        s2 = jnp.where(oh1 > 0.5, -2.0, s)
        m2 = jnp.max(s2, axis=1, keepdims=True)
        i2 = jnp.min(jnp.where(s2 >= m2, col, big), axis=1, keepdims=True)
        oh2 = (col == i2).astype(jnp.float32)
        v1a = jnp.dot(oh1, all_rep, preferred_element_type=jnp.float32)      # (nmax, T)
        v1b = jnp.dot(oh2, all_rep, preferred_element_type=jnp.float32)

        # ---------- AC scoring ----------
        ctx_b = jnp.broadcast_to(ctx, (nmax, ctx.shape[1]))
        score0_ac = clause(softmax_rel(ac, ctx_b, wrel, brel), wc0_t)        # (nmax, nc1)
        score1_ac = jnp.maximum(
            hop1_k(ac, ctx_b, v1a, m1, wrel, brel, wcl_t, wcr_t),
            hop1_k(ac, ctx_b, v1b, m2, wrel, brel, wcl_t, wcr_t))            # (nmax, nc2)
        fin_ac = ilp_all(jnp.concatenate([score0_ac, score1_ac], axis=1), wq_t2)

        # ---------- AR scoring (static pair selection matrices) ----------
        src = jnp.dot(selB, ac, preferred_element_type=jnp.float32)          # (mmax, T)
        tgt = jnp.dot(selA, ac, preferred_element_type=jnp.float32)
        mid_a = jnp.dot(selB, v1a, preferred_element_type=jnp.float32)
        mid_b = jnp.dot(selB, v1b, preferred_element_type=jnp.float32)
        ms_a = jnp.dot(selB, m1, preferred_element_type=jnp.float32)
        ms_b = jnp.dot(selB, m2, preferred_element_type=jnp.float32)
        score0_ar = clause(softmax_rel(src, tgt, wrel, brel), wc0_t)
        score1_ar = jnp.maximum(
            hop1_k(src, tgt, mid_a, ms_a, wrel, brel, wcl_t, wcr_t),
            hop1_k(src, tgt, mid_b, ms_b, wrel, brel, wcl_t, wcr_t))
        fin_ar = ilp_all(jnp.concatenate([score0_ar, score1_ar], axis=1), wq_t2)

        # ---------- masked per-example loss partial sums ----------
        l_ac = loss_sum(fin_ac, oh_ac_ref[...])               # (1, 1)
        l_ar = loss_sum(fin_ar, oh_ar_ref[...])

        # ---------- lane-dense packed stores ----------
        oac_ref[...] = jnp.concatenate(
            [fin_ac, jnp.zeros((nmax, OUT_PAD - NQ), jnp.float32)], axis=1)
        oar_ref[...] = jnp.concatenate(
            [fin_ar, jnp.zeros((mmax, OUT_PAD - NQ), jnp.float32)], axis=1)
        oloss_ref[...] = jnp.concatenate(
            [l_ac, l_ar, jnp.zeros((1, OUT_PAD - 2), jnp.float32)], axis=1)

    return kernel


# ---------------- parameter-side glue (plain JAX, runs inside jit) ----------------
def sparsemax(z):
    K = z.shape[-1]
    zs = jnp.flip(jnp.sort(z, axis=-1), axis=-1)
    zc = jnp.cumsum(zs, axis=-1)
    k = jnp.arange(1, K + 1, dtype=z.dtype)
    support = (1.0 + k * zs) > zc
    ks = jnp.sum(support.astype(z.dtype), axis=-1, keepdims=True)
    idx = ks.astype(jnp.int32) - 1
    tau = (jnp.take_along_axis(zc, idx, axis=-1) - 1.0) / ks
    return jnp.maximum(z - tau, 0.0)


def xavier(key, shape):
    lim = math.sqrt(6.0 / (shape[0] + shape[1]))
    return jax.random.uniform(key, shape, jnp.float32, -lim, lim)


def init_params(key):
    keys = iter(jax.random.split(key, 40))
    H = TRANS_DIM // 2
    p = {}
    p['gru'] = {
        'wih_f': xavier(next(keys), (EMB_DIM, 3 * H)),
        'whh_f': xavier(next(keys), (H, 3 * H)),
        'bih_f': jnp.zeros((1, 3 * H), jnp.float32),
        'bhh_f': jnp.zeros((1, 3 * H), jnp.float32),
        'wih_b': xavier(next(keys), (EMB_DIM, 3 * H)),
        'whh_b': xavier(next(keys), (H, 3 * H)),
        'bih_b': jnp.zeros((1, 3 * H), jnp.float32),
        'bhh_b': jnp.zeros((1, 3 * H), jnp.float32),
    }
    p['w_ctx'] = xavier(next(keys), (EMB_DIM, TRANS_DIM))
    p['b_ctx'] = jnp.zeros((1, TRANS_DIM), jnp.float32)
    p['w_findm'] = xavier(next(keys), (2 * TRANS_DIM, 1))
    p['query_emb'] = xavier(next(keys), (NQ, ATT_DIM))
    p['key_emb'] = xavier(next(keys), (NREL, ATT_DIM))
    p['pred0_emb'] = xavier(next(keys), (NCLAUSE1, ATT_DIM))
    p['pred1_emb'] = xavier(next(keys), (NCLAUSE2, ATT_DIM))
    p['Wkey'] = xavier(next(keys), (ATT_DIM, NCLAUSE * ATT_DIM // 2))
    p['Wquery'] = xavier(next(keys), (ATT_DIM, NCLAUSE * ATT_DIM // 2))
    p['Wkey_0'] = xavier(next(keys), (ATT_DIM, ATT_DIM))
    p['Wpred_0'] = xavier(next(keys), (ATT_DIM, ATT_DIM))
    p['Wkey_l1'] = xavier(next(keys), (ATT_DIM, ATT_DIM))
    p['Wkey_r1'] = xavier(next(keys), (ATT_DIM, ATT_DIM))
    p['Wpred_l1'] = xavier(next(keys), (ATT_DIM, ATT_DIM))
    p['Wpred_r1'] = xavier(next(keys), (ATT_DIM, ATT_DIM))
    p['Wvalue_1'] = xavier(next(keys), (ATT_DIM, ATT_DIM))
    p['Wrel'] = xavier(next(keys), (2 * TRANS_DIM, NREL))
    p['brel'] = jnp.zeros((1, NREL), jnp.float32)
    return p


def precompute_clause_weights(p):
    # data-independent clause weight matrices (sparsemax over tiny tensors)
    wc0 = sparsemax((p['pred0_emb'] @ p['Wpred_0']) @ (p['key_emb'] @ p['Wkey_0']).T)
    wcl = sparsemax((p['pred1_emb'] @ p['Wpred_l1']) @ (p['key_emb'] @ p['Wkey_l1']).T)
    new_q = p['pred1_emb'] + wcl @ (p['key_emb'] @ p['Wvalue_1'])
    wcr = sparsemax((new_q @ p['Wpred_r1']) @ (p['key_emb'] @ p['Wkey_r1']).T)

    pred_emb = jnp.concatenate([p['pred0_emb'], p['pred1_emb']], axis=0)      # (P, A)
    P = pred_emb.shape[0]
    pe = (pred_emb @ p['Wkey']).reshape(P, NCLAUSE, -1).transpose(1, 2, 0)    # (ncl, A/2, P)
    qe = (p['query_emb'] @ p['Wquery']).reshape(NQ, NCLAUSE, -1)              # (NQ, ncl, A/2)
    wq = sparsemax(jnp.einsum('qnj,njp->qnp', qe, pe))                        # (NQ, ncl, P)
    # clause-major column ordering (col = c*NQ + q) for contiguous-slice maxima
    wq_t2 = wq.transpose(1, 0, 2).reshape(NCLAUSE * NQ, P).T                  # (P, ncl*NQ)
    return wc0.T, wcl.T, wcr.T, wq_t2


# ---------------- full forward ----------------
def model_forward(params, data):
    reps = data['plm_hidden']                  # (B, S-1, E)  == last_hidden_state[:, 1:, :]
    enc_attn = np.asarray(data['enc_attn'])    # (B, S)
    indices_ac = data['indices_ac']
    lbl_ac = data['lbl_idxs_ac']
    lbl_ar = data['lbl_idxs_ar']
    B = reps.shape[0]
    T = TRANS_DIM
    Hh = T // 2

    n_list = [len(s) for s in indices_ac]
    NMAX = max(2, max(n_list))
    NK = NMAX + 1
    pairs = [(a, b) for a in range(NMAX - 1) for b in range(a + 1, NMAX)]
    MMAX = len(pairs)

    # ---------- host-side padding / masks / one-hots / selection matrices ----------
    selA = np.zeros((MMAX, NMAX), np.float32)
    selB = np.zeros((MMAX, NMAX), np.float32)
    for m, (a, b) in enumerate(pairs):
        selA[m, a] = 1.0
        selB[m, b] = 1.0

    rev_idx = np.zeros((B, NMAX), np.int32)
    keymask = np.zeros((B, 1, NK), np.float32)
    onehot_ac = np.zeros((B, NMAX, NQ), np.float32)
    onehot_ar = np.zeros((B, MMAX, NQ), np.float32)
    valid_pair_slots = []
    for i in range(B):
        n = n_list[i]
        for t in range(NMAX):
            rev_idx[i, t] = max(n - 1 - t, 0)
        keymask[i, 0, :n] = 1.0
        keymask[i, 0, NMAX] = 1.0              # context key always valid
        for q in range(n):
            onehot_ac[i, q, int(lbl_ac[i][q])] = 1.0
        slots = []
        cnt = 0
        for m, (a, b) in enumerate(pairs):
            if b < n:
                # TODO(synk): random.sample-based removal of 'no relation' rows is skipped;
                # the synthetic AR labels contain no class-2 rows so the removal count is 0.
                onehot_ar[i, m, int(lbl_ar[i][cnt]) + NQ_AC] = 1.0
                slots.append(m)
                cnt += 1
        valid_pair_slots.append(slots)
    has_ar = any(len(s) > 0 for s in valid_pair_slots)

    ctx_idx = []
    for i in range(B):
        nz = np.nonzero(enc_attn[i, 1:])[0]
        ctx_idx.append(np.asarray(nz[:-1], np.int32))

    spans_static = tuple(tuple((int(s0), int(s1)) for (s0, s1) in indices_ac[i])
                         for i in range(B))

    aux = {
        'rev_idx': jnp.asarray(rev_idx),
        'keymask': jnp.asarray(keymask),
        'onehot_ac': jnp.asarray(onehot_ac),
        'onehot_ar': jnp.asarray(onehot_ar),
        'selA': jnp.asarray(selA),
        'selB': jnp.asarray(selB),
    }

    # ---------- pallas_call builders ----------
    gru_call = pl.pallas_call(
        _make_bigru_kernel(NMAX, B, Hh),
        out_shape=jax.ShapeDtypeStruct((NMAX * B, T), jnp.float32),
        in_specs=[pl.BlockSpec(memory_space=pltpu.MemorySpace.VMEM)] * 10,
        out_specs=pl.BlockSpec(memory_space=pltpu.MemorySpace.VMEM),
    )

    scoring_call = pl.pallas_call(
        _make_scoring_kernel(NMAX, MMAX),
        out_shape=(
            jax.ShapeDtypeStruct((B, NMAX, OUT_PAD), jnp.float32),
            jax.ShapeDtypeStruct((B, MMAX, OUT_PAD), jnp.float32),
            jax.ShapeDtypeStruct((B, 1, OUT_PAD), jnp.float32),
        ),
        grid=(B,),
        in_specs=[
            pl.BlockSpec((None, NMAX, T), lambda i: (i, 0, 0)),          # rep_ac
            pl.BlockSpec((None, 1, EMB_DIM), lambda i: (i, 0, 0)),       # ctx mean
            pl.BlockSpec((None, 1, NK), lambda i: (i, 0, 0)),            # key mask
            pl.BlockSpec((None, NMAX, NQ), lambda i: (i, 0, 0)),         # onehot AC
            pl.BlockSpec((None, MMAX, NQ), lambda i: (i, 0, 0)),         # onehot AR
            pl.BlockSpec((EMB_DIM, T), lambda i: (0, 0)),                # w_ctx
            pl.BlockSpec((1, T), lambda i: (0, 0)),                      # b_ctx
            pl.BlockSpec((2 * T, NREL), lambda i: (0, 0)),               # Wrel
            pl.BlockSpec((1, NREL), lambda i: (0, 0)),                   # brel
            pl.BlockSpec((T, 1), lambda i: (0, 0)),                      # w_findm[:T]
            pl.BlockSpec((T, 1), lambda i: (0, 0)),                      # w_findm[T:]
            pl.BlockSpec((NREL, NCLAUSE1), lambda i: (0, 0)),            # wc0_t
            pl.BlockSpec((NREL, NCLAUSE2), lambda i: (0, 0)),            # wcl_t
            pl.BlockSpec((NREL, NCLAUSE2), lambda i: (0, 0)),            # wcr_t
            pl.BlockSpec((NCLAUSE1 + NCLAUSE2, NCLAUSE * NQ), lambda i: (0, 0)),  # wq_t2
            pl.BlockSpec((MMAX, NMAX), lambda i: (0, 0)),                # selA
            pl.BlockSpec((MMAX, NMAX), lambda i: (0, 0)),                # selB
        ],
        out_specs=(
            pl.BlockSpec((None, NMAX, OUT_PAD), lambda i: (i, 0, 0)),
            pl.BlockSpec((None, MMAX, OUT_PAD), lambda i: (i, 0, 0)),
            pl.BlockSpec((None, 1, OUT_PAD), lambda i: (i, 0, 0)),
        ),
        compiler_params=pltpu.CompilerParams(dimension_semantics=("parallel",)),
    )

    # ---------- jitted device portion ----------
    def device_forward(p, reps_, aux_):
        # span means (static spans) and context means
        ac_rows = []
        for i in range(B):
            rows = [jnp.mean(reps_[i, s0:s1 + 1, :], axis=0)
                    for (s0, s1) in spans_static[i]]
            rows += [jnp.zeros((EMB_DIM,), jnp.float32)] * (NMAX - len(rows))
            ac_rows.append(jnp.stack(rows, axis=0))
        ac_means = jnp.stack(ac_rows, axis=0)                         # (B, NMAX, E)

        ctx_rows = [jnp.mean(reps_[i][jnp.asarray(ctx_idx[i])], axis=0) for i in range(B)]
        ctx_mean = jnp.stack(ctx_rows, axis=0)[:, None, :]            # (B, 1, E)

        # bi-GRU over AC means (one batched launch; bwd dir via pre-reversed input)
        x_rev = jnp.take_along_axis(ac_means, aux_['rev_idx'][:, :, None], axis=1)
        xf_tm = jnp.transpose(ac_means, (1, 0, 2)).reshape(NMAX * B, EMB_DIM)
        xb_tm = jnp.transpose(x_rev, (1, 0, 2)).reshape(NMAX * B, EMB_DIM)
        g = p['gru']
        gru_tm = gru_call(xf_tm, xb_tm, g['wih_f'], g['whh_f'], g['bih_f'], g['bhh_f'],
                          g['wih_b'], g['whh_b'], g['bih_b'], g['bhh_b'])
        gru_out = jnp.transpose(gru_tm.reshape(NMAX, B, T), (1, 0, 2))  # (B, NMAX, 2H)
        h_fwd = gru_out[:, :, :Hh]
        h_bwd = jnp.take_along_axis(gru_out[:, :, Hh:],
                                    aux_['rev_idx'][:, :, None], axis=1)
        rep_ac = jnp.concatenate([h_fwd, h_bwd], axis=-1)              # (B, NMAX, T)

        # data-independent clause weights
        wc0_t, wcl_t, wcr_t, wq_t2 = precompute_clause_weights(p)

        out_ac, out_ar, out_loss = scoring_call(
            rep_ac, ctx_mean, aux_['keymask'], aux_['onehot_ac'], aux_['onehot_ar'],
            p['w_ctx'], p['b_ctx'], p['Wrel'], p['brel'],
            p['w_findm'][:T, :], p['w_findm'][T:, :],
            wc0_t, wcl_t, wcr_t, wq_t2, aux_['selA'], aux_['selB'])

        loss = jnp.sum(out_loss[:, 0, 0]) / NQ
        if has_ar:
            loss = loss + jnp.sum(out_loss[:, 0, 1]) / NQ
        return loss, out_ac[:, :, :NQ], out_ar[:, :, :NQ]

    loss, out_ac, out_ar = jax.jit(device_forward)(params, reps, aux)

    final_AC = [out_ac[i, :n_list[i], :] for i in range(B) if n_list[i] > 0]
    final_AR = [out_ar[i, np.asarray(valid_pair_slots[i], np.int32), :]
                for i in range(B) if len(valid_pair_slots[i]) > 0]
    return loss, final_AC, final_AR


# ---------------- main ----------------
if __name__ == "__main__":
    key = jax.random.PRNGKey(0)
    pkey, dkey = jax.random.split(key)
    params = init_params(pkey)

    B, S = 2, 16
    plm_hidden = jax.random.normal(dkey, (B, S - 1, EMB_DIM), jnp.float32)
    data = {
        'plm_hidden': plm_hidden,                  # stands in for PLM last_hidden_state[:, 1:, :]
        'enc_attn': jnp.ones((B, S), jnp.int32),
        'indices_ac': [[(0, 2), (3, 5), (6, 8), (9, 11)],
                       [(1, 3), (4, 7), (8, 10)]],
        'lbl_idxs_ac': [[0, 1, 2, 0], [1, 0, 2]],
        'lbl_idxs_ar': [[0, 1, 0, 1, 0, 1], [1, 0, 0]],
    }

    loss, final_AC, final_AR = model_forward(params, data)
    jax.block_until_ready(loss)
    jax.block_until_ready(final_AC)
    jax.block_until_ready(final_AR)
    print("KERNEL_OK")
</pallas_src>

<mosaic_0001>
module attributes {stable_mosaic.version = 11 : i64} {
  func.func @kernel(%arg0: memref<8x32xf32, #tpu.memory_space<vmem>>, %arg1: memref<8x32xf32, #tpu.memory_space<vmem>>, %arg2: memref<32x48xf32, #tpu.memory_space<vmem>>, %arg3: memref<16x48xf32, #tpu.memory_space<vmem>>, %arg4: memref<1x48xf32, #tpu.memory_space<vmem>>, %arg5: memref<1x48xf32, #tpu.memory_space<vmem>>, %arg6: memref<32x48xf32, #tpu.memory_space<vmem>>, %arg7: memref<16x48xf32, #tpu.memory_space<vmem>>, %arg8: memref<1x48xf32, #tpu.memory_space<vmem>>, %arg9: memref<1x48xf32, #tpu.memory_space<vmem>>, %arg10: memref<8x32xf32, #tpu.memory_space<vmem>>) attributes {dimension_semantics = [], scalar_prefetch = 0 : i64, scratch_operands = 0 : i64, tpu.core_type = #tpu.core_type<tc>} {
    %c0 = arith.constant 0 : index
    %c0_0 = arith.constant 0 : index
    %0 = vector.load %arg0[%c0, %c0_0] : memref<8x32xf32, #tpu.memory_space<vmem>>, vector<8x32xf32>
    %c0_1 = arith.constant 0 : index
    %c0_2 = arith.constant 0 : index
    %1 = vector.load %arg2[%c0_1, %c0_2] : memref<32x48xf32, #tpu.memory_space<vmem>>, vector<32x48xf32>
    %cst = arith.constant dense<0.000000e+00> : vector<8x48xf32>
    %2 = tpu.matmul %0, %1, %cst {dimension_numbers = #tpu.dot_dimension_numbers<[1], [0], [0], [1], [0, 0, 1, 1], [], []>} : vector<8x32xf32>, vector<32x48xf32>, vector<8x48xf32> -> vector<8x48xf32>
    %c0_3 = arith.constant 0 : index
    %c0_4 = arith.constant 0 : index
    %3 = vector.load %arg4[%c0_3, %c0_4] : memref<1x48xf32, #tpu.memory_space<vmem>>, vector<1x48xf32>
    %4 = vector.broadcast %3 : vector<1x48xf32> to vector<8x48xf32>
    %5 = arith.addf %2, %4 : vector<8x48xf32>
    %c0_5 = arith.constant 0 : index
    %c0_6 = arith.constant 0 : index
    %6 = vector.load %arg1[%c0_5, %c0_6] : memref<8x32xf32, #tpu.memory_space<vmem>>, vector<8x32xf32>
    %c0_7 = arith.constant 0 : index
    %c0_8 = arith.constant 0 : index
    %7 = vector.load %arg6[%c0_7, %c0_8] : memref<32x48xf32, #tpu.memory_space<vmem>>, vector<32x48xf32>
    %cst_9 = arith.constant dense<0.000000e+00> : vector<8x48xf32>
    %8 = tpu.matmul %6, %7, %cst_9 {dimension_numbers = #tpu.dot_dimension_numbers<[1], [0], [0], [1], [0, 0, 1, 1], [], []>} : vector<8x32xf32>, vector<32x48xf32>, vector<8x48xf32> -> vector<8x48xf32>
    %c0_10 = arith.constant 0 : index
    %c0_11 = arith.constant 0 : index
    %9 = vector.load %arg8[%c0_10, %c0_11] : memref<1x48xf32, #tpu.memory_space<vmem>>, vector<1x48xf32>
    %10 = vector.broadcast %9 : vector<1x48xf32> to vector<8x48xf32>
    %11 = arith.addf %8, %10 : vector<8x48xf32>
    %c0_12 = arith.constant 0 : index
    %c0_13 = arith.constant 0 : index
    %12 = vector.load %arg3[%c0_12, %c0_13] : memref<16x48xf32, #tpu.memory_space<vmem>>, vector<16x48xf32>
    %c0_14 = arith.constant 0 : index
    %c0_15 = arith.constant 0 : index
    %13 = vector.load %arg5[%c0_14, %c0_15] : memref<1x48xf32, #tpu.memory_space<vmem>>, vector<1x48xf32>
    %c0_16 = arith.constant 0 : index
    %c0_17 = arith.constant 0 : index
    %14 = vector.load %arg7[%c0_16, %c0_17] : memref<16x48xf32, #tpu.memory_space<vmem>>, vector<16x48xf32>
    %c0_18 = arith.constant 0 : index
    %c0_19 = arith.constant 0 : index
    %15 = vector.load %arg9[%c0_18, %c0_19] : memref<1x48xf32, #tpu.memory_space<vmem>>, vector<1x48xf32>
    %cst_20 = arith.constant 0.000000e+00 : f32
    %16 = vector.broadcast %cst_20 : f32 to vector<2x16xf32>
    %cst_21 = arith.constant 0.000000e+00 : f32
    %17 = vector.broadcast %cst_21 : f32 to vector<2x16xf32>
    %18 = vector.extract_strided_slice %5 {offsets = [0, 0], sizes = [2, 48], strides = [1, 1]} : vector<8x48xf32> to vector<2x48xf32>
    %19 = vector.extract_strided_slice %11 {offsets = [0, 0], sizes = [2, 48], strides = [1, 1]} : vector<8x48xf32> to vector<2x48xf32>
    %cst_22 = arith.constant dense<0.000000e+00> : vector<2x48xf32>
    %20 = tpu.matmul %16, %12, %cst_22 {dimension_numbers = #tpu.dot_dimension_numbers<[1], [0], [0], [1], [0, 0, 1, 1], [], []>} : vector<2x16xf32>, vector<16x48xf32>, vector<2x48xf32> -> vector<2x48xf32>
    %21 = vector.broadcast %13 : vector<1x48xf32> to vector<2x48xf32>
    %22 = arith.addf %20, %21 : vector<2x48xf32>
    %23 = vector.extract_strided_slice %18 {offsets = [0, 0], sizes = [2, 16], strides = [1, 1]} : vector<2x48xf32> to vector<2x16xf32>
    %24 = vector.extract_strided_slice %22 {offsets = [0, 0], sizes = [2, 16], strides = [1, 1]} : vector<2x48xf32> to vector<2x16xf32>
    %25 = arith.addf %23, %24 : vector<2x16xf32>
    %26 = arith.negf %25 : vector<2x16xf32>
    %27 = math.exp %26 : vector<2x16xf32>
    %cst_23 = arith.constant 1.000000e+00 : f32
    %28 = vector.broadcast %cst_23 : f32 to vector<2x16xf32>
    %29 = arith.addf %28, %27 : vector<2x16xf32>
    %30 = arith.divf %28, %29 : vector<2x16xf32>
    %31 = vector.extract_strided_slice %18 {offsets = [0, 16], sizes = [2, 16], strides = [1, 1]} : vector<2x48xf32> to vector<2x16xf32>
    %32 = vector.extract_strided_slice %22 {offsets = [0, 16], sizes = [2, 16], strides = [1, 1]} : vector<2x48xf32> to vector<2x16xf32>
    %33 = arith.addf %31, %32 : vector<2x16xf32>
    %34 = arith.negf %33 : vector<2x16xf32>
    %35 = math.exp %34 : vector<2x16xf32>
    %cst_24 = arith.constant 1.000000e+00 : f32
    %36 = vector.broadcast %cst_24 : f32 to vector<2x16xf32>
    %37 = arith.addf %36, %35 : vector<2x16xf32>
    %38 = arith.divf %36, %37 : vector<2x16xf32>
    %39 = vector.extract_strided_slice %18 {offsets = [0, 32], sizes = [2, 16], strides = [1, 1]} : vector<2x48xf32> to vector<2x16xf32>
    %40 = vector.extract_strided_slice %22 {offsets = [0, 32], sizes = [2, 16], strides = [1, 1]} : vector<2x48xf32> to vector<2x16xf32>
    %41 = arith.mulf %30, %40 : vector<2x16xf32>
    %42 = arith.addf %39, %41 : vector<2x16xf32>
    %43 = math.tanh %42 : vector<2x16xf32>
    %cst_25 = arith.constant 1.000000e+00 : f32
    %44 = vector.broadcast %cst_25 : f32 to vector<2x16xf32>
    %45 = arith.subf %44, %38 : vector<2x16xf32>
    %46 = arith.mulf %45, %43 : vector<2x16xf32>
    %47 = arith.mulf %38, %16 : vector<2x16xf32>
    %48 = arith.addf %46, %47 : vector<2x16xf32>
    %cst_26 = arith.constant dense<0.000000e+00> : vector<2x48xf32>
    %49 = tpu.matmul %17, %14, %cst_26 {dimension_numbers = #tpu.dot_dimension_numbers<[1], [0], [0], [1], [0, 0, 1, 1], [], []>} : vector<2x16xf32>, vector<16x48xf32>, vector<2x48xf32> -> vector<2x48xf32>
    %50 = vector.broadcast %15 : vector<1x48xf32> to vector<2x48xf32>
    %51 = arith.addf %49, %50 : vector<2x48xf32>
    %52 = vector.extract_strided_slice %19 {offsets = [0, 0], sizes = [2, 16], strides = [1, 1]} : vector<2x48xf32> to vector<2x16xf32>
    %53 = vector.extract_strided_slice %51 {offsets = [0, 0], sizes = [2, 16], strides = [1, 1]} : vector<2x48xf32> to vector<2x16xf32>
    %54 = arith.addf %52, %53 : vector<2x16xf32>
    %55 = arith.negf %54 : vector<2x16xf32>
    %56 = math.exp %55 : vector<2x16xf32>
    %cst_27 = arith.constant 1.000000e+00 : f32
    %57 = vector.broadcast %cst_27 : f32 to vector<2x16xf32>
    %58 = arith.addf %57, %56 : vector<2x16xf32>
    %59 = arith.divf %57, %58 : vector<2x16xf32>
    %60 = vector.extract_strided_slice %19 {offsets = [0, 16], sizes = [2, 16], strides = [1, 1]} : vector<2x48xf32> to vector<2x16xf32>
    %61 = vector.extract_strided_slice %51 {offsets = [0, 16], sizes = [2, 16], strides = [1, 1]} : vector<2x48xf32> to vector<2x16xf32>
    %62 = arith.addf %60, %61 : vector<2x16xf32>
    %63 = arith.negf %62 : vector<2x16xf32>
    %64 = math.exp %63 : vector<2x16xf32>
    %cst_28 = arith.constant 1.000000e+00 : f32
    %65 = vector.broadcast %cst_28 : f32 to vector<2x16xf32>
    %66 = arith.addf %65, %64 : vector<2x16xf32>
    %67 = arith.divf %65, %66 : vector<2x16xf32>
    %68 = vector.extract_strided_slice %19 {offsets = [0, 32], sizes = [2, 16], strides = [1, 1]} : vector<2x48xf32> to vector<2x16xf32>
    %69 = vector.extract_strided_slice %51 {offsets = [0, 32], sizes = [2, 16], strides = [1, 1]} : vector<2x48xf32> to vector<2x16xf32>
    %70 = arith.mulf %59, %69 : vector<2x16xf32>
    %71 = arith.addf %68, %70 : vector<2x16xf32>
    %72 = math.tanh %71 : vector<2x16xf32>
    %cst_29 = arith.constant 1.000000e+00 : f32
    %73 = vector.broadcast %cst_29 : f32 to vector<2x16xf32>
    %74 = arith.subf %73, %67 : vector<2x16xf32>
    %75 = arith.mulf %74, %72 : vector<2x16xf32>
    %76 = arith.mulf %67, %17 : vector<2x16xf32>
    %77 = arith.addf %75, %76 : vector<2x16xf32>
    %78 = tpu.concatenate %48, %77 in 1 : vector<2x16xf32>, vector<2x16xf32> -> vector<2x32xf32>
    %79 = vector.extract_strided_slice %5 {offsets = [2, 0], sizes = [2, 48], strides = [1, 1]} : vector<8x48xf32> to vector<2x48xf32>
    %80 = vector.extract_strided_slice %11 {offsets = [2, 0], sizes = [2, 48], strides = [1, 1]} : vector<8x48xf32> to vector<2x48xf32>
    %cst_30 = arith.constant dense<0.000000e+00> : vector<2x48xf32>
    %81 = tpu.matmul %48, %12, %cst_30 {dimension_numbers = #tpu.dot_dimension_numbers<[1], [0], [0], [1], [0, 0, 1, 1], [], []>} : vector<2x16xf32>, vector<16x48xf32>, vector<2x48xf32> -> vector<2x48xf32>
    %82 = vector.broadcast %13 : vector<1x48xf32> to vector<2x48xf32>
    %83 = arith.addf %81, %82 : vector<2x48xf32>
    %84 = vector.extract_strided_slice %79 {offsets = [0, 0], sizes = [2, 16], strides = [1, 1]} : vector<2x48xf32> to vector<2x16xf32>
    %85 = vector.extract_strided_slice %83 {offsets = [0, 0], sizes = [2, 16], strides = [1, 1]} : vector<2x48xf32> to vector<2x16xf32>
    %86 = arith.addf %84, %85 : vector<2x16xf32>
    %87 = arith.negf %86 : vector<2x16xf32>
    %88 = math.exp %87 : vector<2x16xf32>
    %cst_31 = arith.constant 1.000000e+00 : f32
    %89 = vector.broadcast %cst_31 : f32 to vector<2x16xf32>
    %90 = arith.addf %89, %88 : vector<2x16xf32>
    %91 = arith.divf %89, %90 : vector<2x16xf32>
    %92 = vector.extract_strided_slice %79 {offsets = [0, 16], sizes = [2, 16], strides = [1, 1]} : vector<2x48xf32> to vector<2x16xf32>
    %93 = vector.extract_strided_slice %83 {offsets = [0, 16], sizes = [2, 16], strides = [1, 1]} : vector<2x48xf32> to vector<2x16xf32>
    %94 = arith.addf %92, %93 : vector<2x16xf32>
    %95 = arith.negf %94 : vector<2x16xf32>
    %96 = math.exp %95 : vector<2x16xf32>
    %cst_32 = arith.constant 1.000000e+00 : f32
    %97 = vector.broadcast %cst_32 : f32 to vector<2x16xf32>
    %98 = arith.addf %97, %96 : vector<2x16xf32>
    %99 = arith.divf %97, %98 : vector<2x16xf32>
    %100 = vector.extract_strided_slice %79 {offsets = [0, 32], sizes = [2, 16], strides = [1, 1]} : vector<2x48xf32> to vector<2x16xf32>
    %101 = vector.extract_strided_slice %83 {offsets = [0, 32], sizes = [2, 16], strides = [1, 1]} : vector<2x48xf32> to vector<2x16xf32>
    %102 = arith.mulf %91, %101 : vector<2x16xf32>
    %103 = arith.addf %100, %102 : vector<2x16xf32>
    %104 = math.tanh %103 : vector<2x16xf32>
    %cst_33 = arith.constant 1.000000e+00 : f32
    %105 = vector.broadcast %cst_33 : f32 to vector<2x16xf32>
    %106 = arith.subf %105, %99 : vector<2x16xf32>
    %107 = arith.mulf %106, %104 : vector<2x16xf32>
    %108 = arith.mulf %99, %48 : vector<2x16xf32>
    %109 = arith.addf %107, %108 : vector<2x16xf32>
    %cst_34 = arith.constant dense<0.000000e+00> : vector<2x48xf32>
    %110 = tpu.matmul %77, %14, %cst_34 {dimension_numbers = #tpu.dot_dimension_numbers<[1], [0], [0], [1], [0, 0, 1, 1], [], []>} : vector<2x16xf32>, vector<16x48xf32>, vector<2x48xf32> -> vector<2x48xf32>
    %111 = vector.broadcast %15 : vector<1x48xf32> to vector<2x48xf32>
    %112 = arith.addf %110, %111 : vector<2x48xf32>
    %113 = vector.extract_strided_slice %80 {offsets = [0, 0], sizes = [2, 16], strides = [1, 1]} : vector<2x48xf32> to vector<2x16xf32>
    %114 = vector.extract_strided_slice %112 {offsets = [0, 0], sizes = [2, 16], strides = [1, 1]} : vector<2x48xf32> to vector<2x16xf32>
    %115 = arith.addf %113, %114 : vector<2x16xf32>
    %116 = arith.negf %115 : vector<2x16xf32>
    %117 = math.exp %116 : vector<2x16xf32>
    %cst_35 = arith.constant 1.000000e+00 : f32
    %118 = vector.broadcast %cst_35 : f32 to vector<2x16xf32>
    %119 = arith.addf %118, %117 : vector<2x16xf32>
    %120 = arith.divf %118, %119 : vector<2x16xf32>
    %121 = vector.extract_strided_slice %80 {offsets = [0, 16], sizes = [2, 16], strides = [1, 1]} : vector<2x48xf32> to vector<2x16xf32>
    %122 = vector.extract_strided_slice %112 {offsets = [0, 16], sizes = [2, 16], strides = [1, 1]} : vector<2x48xf32> to vector<2x16xf32>
    %123 = arith.addf %121, %122 : vector<2x16xf32>
    %124 = arith.negf %123 : vector<2x16xf32>
    %125 = math.exp %124 : vector<2x16xf32>
    %cst_36 = arith.constant 1.000000e+00 : f32
    %126 = vector.broadcast %cst_36 : f32 to vector<2x16xf32>
    %127 = arith.addf %126, %125 : vector<2x16xf32>
    %128 = arith.divf %126, %127 : vector<2x16xf32>
    %129 = vector.extract_strided_slice %80 {offsets = [0, 32], sizes = [2, 16], strides = [1, 1]} : vector<2x48xf32> to vector<2x16xf32>
    %130 = vector.extract_strided_slice %112 {offsets = [0, 32], sizes = [2, 16], strides = [1, 1]} : vector<2x48xf32> to vector<2x16xf32>
    %131 = arith.mulf %120, %130 : vector<2x16xf32>
    %132 = arith.addf %129, %131 : vector<2x16xf32>
    %133 = math.tanh %132 : vector<2x16xf32>
    %cst_37 = arith.constant 1.000000e+00 : f32
    %134 = vector.broadcast %cst_37 : f32 to vector<2x16xf32>
    %135 = arith.subf %134, %128 : vector<2x16xf32>
    %136 = arith.mulf %135, %133 : vector<2x16xf32>
    %137 = arith.mulf %128, %77 : vector<2x16xf32>
    %138 = arith.addf %136, %137 : vector<2x16xf32>
    %139 = tpu.concatenate %109, %138 in 1 : vector<2x16xf32>, vector<2x16xf32> -> vector<2x32xf32>
    %140 = vector.extract_strided_slice %5 {offsets = [4, 0], sizes = [2, 48], strides = [1, 1]} : vector<8x48xf32> to vector<2x48xf32>
    %141 = vector.extract_strided_slice %11 {offsets = [4, 0], sizes = [2, 48], strides = [1, 1]} : vector<8x48xf32> to vector<2x48xf32>
    %cst_38 = arith.constant dense<0.000000e+00> : vector<2x48xf32>
    %142 = tpu.matmul %109, %12, %cst_38 {dimension_numbers = #tpu.dot_dimension_numbers<[1], [0], [0], [1], [0, 0, 1, 1], [], []>} : vector<2x16xf32>, vector<16x48xf32>, vector<2x48xf32> -> vector<2x48xf32>
    %143 = vector.broadcast %13 : vector<1x48xf32> to vector<2x48xf32>
    %144 = arith.addf %142, %143 : vector<2x48xf32>
    %145 = vector.extract_strided_slice %140 {offsets = [0, 0], sizes = [2, 16], strides = [1, 1]} : vector<2x48xf32> to vector<2x16xf32>
    %146 = vector.extract_strided_slice %144 {offsets = [0, 0], sizes = [2, 16], strides = [1, 1]} : vector<2x48xf32> to vector<2x16xf32>
    %147 = arith.addf %145, %146 : vector<2x16xf32>
    %148 = arith.negf %147 : vector<2x16xf32>
    %149 = math.exp %148 : vector<2x16xf32>
    %cst_39 = arith.constant 1.000000e+00 : f32
    %150 = vector.broadcast %cst_39 : f32 to vector<2x16xf32>
    %151 = arith.addf %150, %149 : vector<2x16xf32>
    %152 = arith.divf %150, %151 : vector<2x16xf32>
    %153 = vector.extract_strided_slice %140 {offsets = [0, 16], sizes = [2, 16], strides = [1, 1]} : vector<2x48xf32> to vector<2x16xf32>
    %154 = vector.extract_strided_slice %144 {offsets = [0, 16], sizes = [2, 16], strides = [1, 1]} : vector<2x48xf32> to vector<2x16xf32>
    %155 = arith.addf %153, %154 : vector<2x16xf32>
    %156 = arith.negf %155 : vector<2x16xf32>
    %157 = math.exp %156 : vector<2x16xf32>
    %cst_40 = arith.constant 1.000000e+00 : f32
    %158 = vector.broadcast %cst_40 : f32 to vector<2x16xf32>
    %159 = arith.addf %158, %157 : vector<2x16xf32>
    %160 = arith.divf %158, %159 : vector<2x16xf32>
    %161 = vector.extract_strided_slice %140 {offsets = [0, 32], sizes = [2, 16], strides = [1, 1]} : vector<2x48xf32> to vector<2x16xf32>
    %162 = vector.extract_strided_slice %144 {offsets = [0, 32], sizes = [2, 16], strides = [1, 1]} : vector<2x48xf32> to vector<2x16xf32>
    %163 = arith.mulf %152, %162 : vector<2x16xf32>
    %164 = arith.addf %161, %163 : vector<2x16xf32>
    %165 = math.tanh %164 : vector<2x16xf32>
    %cst_41 = arith.constant 1.000000e+00 : f32
    %166 = vector.broadcast %cst_41 : f32 to vector<2x16xf32>
    %167 = arith.subf %166, %160 : vector<2x16xf32>
    %168 = arith.mulf %167, %165 : vector<2x16xf32>
    %169 = arith.mulf %160, %109 : vector<2x16xf32>
    %170 = arith.addf %168, %169 : vector<2x16xf32>
    %cst_42 = arith.constant dense<0.000000e+00> : vector<2x48xf32>
    %171 = tpu.matmul %138, %14, %cst_42 {dimension_numbers = #tpu.dot_dimension_numbers<[1], [0], [0], [1], [0, 0, 1, 1], [], []>} : vector<2x16xf32>, vector<16x48xf32>, vector<2x48xf32> -> vector<2x48xf32>
    %172 = vector.broadcast %15 : vector<1x48xf32> to vector<2x48xf32>
    %173 = arith.addf %171, %172 : vector<2x48xf32>
    %174 = vector.extract_strided_slice %141 {offsets = [0, 0], sizes = [2, 16], strides = [1, 1]} : vector<2x48xf32> to vector<2x16xf32>
    %175 = vector.extract_strided_slice %173 {offsets = [0, 0], sizes = [2, 16], strides = [1, 1]} : vector<2x48xf32> to vector<2x16xf32>
    %176 = arith.addf %174, %175 : vector<2x16xf32>
    %177 = arith.negf %176 : vector<2x16xf32>
    %178 = math.exp %177 : vector<2x16xf32>
    %cst_43 = arith.constant 1.000000e+00 : f32
    %179 = vector.broadcast %cst_43 : f32 to vector<2x16xf32>
    %180 = arith.addf %179, %178 : vector<2x16xf32>
    %181 = arith.divf %179, %180 : vector<2x16xf32>
    %182 = vector.extract_strided_slice %141 {offsets = [0, 16], sizes = [2, 16], strides = [1, 1]} : vector<2x48xf32> to vector<2x16xf32>
    %183 = vector.extract_strided_slice %173 {offsets = [0, 16], sizes = [2, 16], strides = [1, 1]} : vector<2x48xf32> to vector<2x16xf32>
    %184 = arith.addf %182, %183 : vector<2x16xf32>
    %185 = arith.negf %184 : vector<2x16xf32>
    %186 = math.exp %185 : vector<2x16xf32>
    %cst_44 = arith.constant 1.000000e+00 : f32
    %187 = vector.broadcast %cst_44 : f32 to vector<2x16xf32>
    %188 = arith.addf %187, %186 : vector<2x16xf32>
    %189 = arith.divf %187, %188 : vector<2x16xf32>
    %190 = vector.extract_strided_slice %141 {offsets = [0, 32], sizes = [2, 16], strides = [1, 1]} : vector<2x48xf32> to vector<2x16xf32>
    %191 = vector.extract_strided_slice %173 {offsets = [0, 32], sizes = [2, 16], strides = [1, 1]} : vector<2x48xf32> to vector<2x16xf32>
    %192 = arith.mulf %181, %191 : vector<2x16xf32>
    %193 = arith.addf %190, %192 : vector<2x16xf32>
    %194 = math.tanh %193 : vector<2x16xf32>
    %cst_45 = arith.constant 1.000000e+00 : f32
    %195 = vector.broadcast %cst_45 : f32 to vector<2x16xf32>
    %196 = arith.subf %195, %189 : vector<2x16xf32>
    %197 = arith.mulf %196, %194 : vector<2x16xf32>
    %198 = arith.mulf %189, %138 : vector<2x16xf32>
    %199 = arith.addf %197, %198 : vector<2x16xf32>
    %200 = tpu.concatenate %170, %199 in 1 : vector<2x16xf32>, vector<2x16xf32> -> vector<2x32xf32>
    %201 = vector.extract_strided_slice %5 {offsets = [6, 0], sizes = [2, 48], strides = [1, 1]} : vector<8x48xf32> to vector<2x48xf32>
    %202 = vector.extract_strided_slice %11 {offsets = [6, 0], sizes = [2, 48], strides = [1, 1]} : vector<8x48xf32> to vector<2x48xf32>
    %cst_46 = arith.constant dense<0.000000e+00> : vector<2x48xf32>
    %203 = tpu.matmul %170, %12, %cst_46 {dimension_numbers = #tpu.dot_dimension_numbers<[1], [0], [0], [1], [0, 0, 1, 1], [], []>} : vector<2x16xf32>, vector<16x48xf32>, vector<2x48xf32> -> vector<2x48xf32>
    %204 = vector.broadcast %13 : vector<1x48xf32> to vector<2x48xf32>
    %205 = arith.addf %203, %204 : vector<2x48xf32>
    %206 = vector.extract_strided_slice %201 {offsets = [0, 0], sizes = [2, 16], strides = [1, 1]} : vector<2x48xf32> to vector<2x16xf32>
    %207 = vector.extract_strided_slice %205 {offsets = [0, 0], sizes = [2, 16], strides = [1, 1]} : vector<2x48xf32> to vector<2x16xf32>
    %208 = arith.addf %206, %207 : vector<2x16xf32>
    %209 = arith.negf %208 : vector<2x16xf32>
    %210 = math.exp %209 : vector<2x16xf32>
    %cst_47 = arith.constant 1.000000e+00 : f32
    %211 = vector.broadcast %cst_47 : f32 to vector<2x16xf32>
    %212 = arith.addf %211, %210 : vector<2x16xf32>
    %213 = arith.divf %211, %212 : vector<2x16xf32>
    %214 = vector.extract_strided_slice %201 {offsets = [0, 16], sizes = [2, 16], strides = [1, 1]} : vector<2x48xf32> to vector<2x16xf32>
    %215 = vector.extract_strided_slice %205 {offsets = [0, 16], sizes = [2, 16], strides = [1, 1]} : vector<2x48xf32> to vector<2x16xf32>
    %216 = arith.addf %214, %215 : vector<2x16xf32>
    %217 = arith.negf %216 : vector<2x16xf32>
    %218 = math.exp %217 : vector<2x16xf32>
    %cst_48 = arith.constant 1.000000e+00 : f32
    %219 = vector.broadcast %cst_48 : f32 to vector<2x16xf32>
    %220 = arith.addf %219, %218 : vector<2x16xf32>
    %221 = arith.divf %219, %220 : vector<2x16xf32>
    %222 = vector.extract_strided_slice %201 {offsets = [0, 32], sizes = [2, 16], strides = [1, 1]} : vector<2x48xf32> to vector<2x16xf32>
    %223 = vector.extract_strided_slice %205 {offsets = [0, 32], sizes = [2, 16], strides = [1, 1]} : vector<2x48xf32> to vector<2x16xf32>
    %224 = arith.mulf %213, %223 : vector<2x16xf32>
    %225 = arith.addf %222, %224 : vector<2x16xf32>
    %226 = math.tanh %225 : vector<2x16xf32>
    %cst_49 = arith.constant 1.000000e+00 : f32
    %227 = vector.broadcast %cst_49 : f32 to vector<2x16xf32>
    %228 = arith.subf %227, %221 : vector<2x16xf32>
    %229 = arith.mulf %228, %226 : vector<2x16xf32>
    %230 = arith.mulf %221, %170 : vector<2x16xf32>
    %231 = arith.addf %229, %230 : vector<2x16xf32>
    %cst_50 = arith.constant dense<0.000000e+00> : vector<2x48xf32>
    %232 = tpu.matmul %199, %14, %cst_50 {dimension_numbers = #tpu.dot_dimension_numbers<[1], [0], [0], [1], [0, 0, 1, 1], [], []>} : vector<2x16xf32>, vector<16x48xf32>, vector<2x48xf32> -> vector<2x48xf32>
    %233 = vector.broadcast %15 : vector<1x48xf32> to vector<2x48xf32>
    %234 = arith.addf %232, %233 : vector<2x48xf32>
    %235 = vector.extract_strided_slice %202 {offsets = [0, 0], sizes = [2, 16], strides = [1, 1]} : vector<2x48xf32> to vector<2x16xf32>
    %236 = vector.extract_strided_slice %234 {offsets = [0, 0], sizes = [2, 16], strides = [1, 1]} : vector<2x48xf32> to vector<2x16xf32>
    %237 = arith.addf %235, %236 : vector<2x16xf32>
    %238 = arith.negf %237 : vector<2x16xf32>
    %239 = math.exp %238 : vector<2x16xf32>
    %cst_51 = arith.constant 1.000000e+00 : f32
    %240 = vector.broadcast %cst_51 : f32 to vector<2x16xf32>
    %241 = arith.addf %240, %239 : vector<2x16xf32>
    %242 = arith.divf %240, %241 : vector<2x16xf32>
    %243 = vector.extract_strided_slice %202 {offsets = [0, 16], sizes = [2, 16], strides = [1, 1]} : vector<2x48xf32> to vector<2x16xf32>
    %244 = vector.extract_strided_slice %234 {offsets = [0, 16], sizes = [2, 16], strides = [1, 1]} : vector<2x48xf32> to vector<2x16xf32>
    %245 = arith.addf %243, %244 : vector<2x16xf32>
    %246 = arith.negf %245 : vector<2x16xf32>
    %247 = math.exp %246 : vector<2x16xf32>
    %cst_52 = arith.constant 1.000000e+00 : f32
    %248 = vector.broadcast %cst_52 : f32 to vector<2x16xf32>
    %249 = arith.addf %248, %247 : vector<2x16xf32>
    %250 = arith.divf %248, %249 : vector<2x16xf32>
    %251 = vector.extract_strided_slice %202 {offsets = [0, 32], sizes = [2, 16], strides = [1, 1]} : vector<2x48xf32> to vector<2x16xf32>
    %252 = vector.extract_strided_slice %234 {offsets = [0, 32], sizes = [2, 16], strides = [1, 1]} : vector<2x48xf32> to vector<2x16xf32>
    %253 = arith.mulf %242, %252 : vector<2x16xf32>
    %254 = arith.addf %251, %253 : vector<2x16xf32>
    %255 = math.tanh %254 : vector<2x16xf32>
    %cst_53 = arith.constant 1.000000e+00 : f32
    %256 = vector.broadcast %cst_53 : f32 to vector<2x16xf32>
    %257 = arith.subf %256, %250 : vector<2x16xf32>
    %258 = arith.mulf %257, %255 : vector<2x16xf32>
    %259 = arith.mulf %250, %199 : vector<2x16xf32>
    %260 = arith.addf %258, %259 : vector<2x16xf32>
    %261 = tpu.concatenate %231, %260 in 1 : vector<2x16xf32>, vector<2x16xf32> -> vector<2x32xf32>
    %262 = tpu.concatenate %78, %139, %200, %261 in 0 : vector<2x32xf32>, vector<2x32xf32>, vector<2x32xf32>, vector<2x32xf32> -> vector<8x32xf32>
    %c0_54 = arith.constant 0 : index
    %c0_55 = arith.constant 0 : index
    %263 = vector.load %arg10[%c0_54, %c0_55] : memref<8x32xf32, #tpu.memory_space<vmem>>, vector<8x32xf32>
    tpu.vector_store %arg10[%c0_54, %c0_55], %262 {strides = array<i32>} : memref<8x32xf32, #tpu.memory_space<vmem>>, vector<8x32xf32>,
    return
  }
}

module attributes {stable_mosaic.version = 11 : i64} {
  func.func @kernel(%arg0: i32, %arg1: memref<1x4x32xf32, #tpu.memory_space<vmem>>, %arg2: memref<1x1x32xf32, #tpu.memory_space<vmem>>, %arg3: memref<1x1x5xf32, #tpu.memory_space<vmem>>, %arg4: memref<1x4x6xf32, #tpu.memory_space<vmem>>, %arg5: memref<1x6x6xf32, #tpu.memory_space<vmem>>, %arg6: memref<32x32xf32, #tpu.memory_space<vmem>>, %arg7: memref<1x32xf32, #tpu.memory_space<vmem>>, %arg8: memref<64x3xf32, #tpu.memory_space<vmem>>, %arg9: memref<1x3xf32, #tpu.memory_space<vmem>>, %arg10: memref<32x1xf32, #tpu.memory_space<vmem>>, %arg11: memref<32x1xf32, #tpu.memory_space<vmem>>, %arg12: memref<3x2xf32, #tpu.memory_space<vmem>>, %arg13: memref<3x2xf32, #tpu.memory_space<vmem>>, %arg14: memref<3x2xf32, #tpu.memory_space<vmem>>, %arg15: memref<4x24xf32, #tpu.memory_space<vmem>>, %arg16: memref<6x4xf32, #tpu.memory_space<vmem>>, %arg17: memref<6x4xf32, #tpu.memory_space<vmem>>, %arg18: memref<1x4x128xf32, #tpu.memory_space<vmem>>, %arg19: memref<1x6x128xf32, #tpu.memory_space<vmem>>, %arg20: memref<1x1x128xf32, #tpu.memory_space<vmem>>) attributes {dimension_semantics = [#tpu.dimension_semantics<parallel>], iteration_bounds = array<i64: 2>, scalar_prefetch = 0 : i64, scratch_operands = 0 : i64, tpu.core_type = #tpu.core_type<tc>, window_params = [{transform_indices = @transform_0, window_bounds = array<i64: 1, 4, 32>}, {transform_indices = @transform_1, window_bounds = array<i64: 1, 1, 32>}, {transform_indices = @transform_2, window_bounds = array<i64: 1, 1, 5>}, {transform_indices = @transform_3, window_bounds = array<i64: 1, 4, 6>}, {transform_indices = @transform_4, window_bounds = array<i64: 1, 6, 6>}, {pipeline_mode = #tpu.pipeline_mode<synchronous>, transform_indices = @transform_5, window_bounds = array<i64: 32, 32>}, {pipeline_mode = #tpu.pipeline_mode<synchronous>, transform_indices = @transform_6, window_bounds = array<i64: 1, 32>}, {pipeline_mode = #tpu.pipeline_mode<synchronous>, transform_indices = @transform_7, window_bounds = array<i64: 64, 3>}, {pipeline_mode = #tpu.pipeline_mode<synchronous>, transform_indices = @transform_8, window_bounds = array<i64: 1, 3>}, {pipeline_mode = #tpu.pipeline_mode<synchronous>, transform_indices = @transform_9, window_bounds = array<i64: 32, 1>}, {pipeline_mode = #tpu.pipeline_mode<synchronous>, transform_indices = @transform_10, window_bounds = array<i64: 32, 1>}, {pipeline_mode = #tpu.pipeline_mode<synchronous>, transform_indices = @transform_11, window_bounds = array<i64: 3, 2>}, {pipeline_mode = #tpu.pipeline_mode<synchronous>, transform_indices = @transform_12, window_bounds = array<i64: 3, 2>}, {pipeline_mode = #tpu.pipeline_mode<synchronous>, transform_indices = @transform_13, window_bounds = array<i64: 3, 2>}, {pipeline_mode = #tpu.pipeline_mode<synchronous>, transform_indices = @transform_14, window_bounds = array<i64: 4, 24>}, {pipeline_mode = #tpu.pipeline_mode<synchronous>, transform_indices = @transform_15, window_bounds = array<i64: 6, 4>}, {pipeline_mode = #tpu.pipeline_mode<synchronous>, transform_indices = @transform_16, window_bounds = array<i64: 6, 4>}, {transform_indices = @transform_17, window_bounds = array<i64: 1, 4, 128>}, {transform_indices = @transform_18, window_bounds = array<i64: 1, 6, 128>}, {transform_indices = @transform_19, window_bounds = array<i64: 1, 1, 128>}]} {
    %c0 = arith.constant 0 : index
    %c0_0 = arith.constant 0 : index
    %c0_1 = arith.constant 0 : index
    %0 = vector.load %arg1[%c0, %c0_0, %c0_1] : memref<1x4x32xf32, #tpu.memory_space<vmem>>, vector<1x4x32xf32>
    %1 = vector.shape_cast %0 : vector<1x4x32xf32> to vector<4x32xf32>
    %c0_2 = arith.constant 0 : index
    %c0_3 = arith.constant 0 : index
    %c0_4 = arith.constant 0 : index
    %2 = vector.load %arg2[%c0_2, %c0_3, %c0_4] : memref<1x1x32xf32, #tpu.memory_space<vmem>>, vector<1x1x32xf32>
    %3 = vector.shape_cast %2 : vector<1x1x32xf32> to vector<1x32xf32>
    %c0_5 = arith.constant 0 : index
    %c0_6 = arith.constant 0 : index
    %4 = vector.load %arg6[%c0_5, %c0_6] : memref<32x32xf32, #tpu.memory_space<vmem>>, vector<32x32xf32>
    %cst = arith.constant dense<0.000000e+00> : vector<1x32xf32>
    %5 = tpu.matmul %3, %4, %cst {dimension_numbers = #tpu.dot_dimension_numbers<[1], [0], [0], [1], [0, 0, 1, 1], [], []>} : vector<1x32xf32>, vector<32x32xf32>, vector<1x32xf32> -> vector<1x32xf32>
    %c0_7 = arith.constant 0 : index
    %c0_8 = arith.constant 0 : index
    %6 = vector.load %arg7[%c0_7, %c0_8] : memref<1x32xf32, #tpu.memory_space<vmem>>, vector<1x32xf32>
    %7 = arith.addf %5, %6 : vector<1x32xf32>
    %c0_9 = arith.constant 0 : index
    %c0_10 = arith.constant 0 : index
    %8 = vector.load %arg8[%c0_9, %c0_10] : memref<64x3xf32, #tpu.memory_space<vmem>>, vector<64x3xf32>
    %c0_11 = arith.constant 0 : index
    %c0_12 = arith.constant 0 : index
    %9 = vector.load %arg9[%c0_11, %c0_12] : memref<1x3xf32, #tpu.memory_space<vmem>>, vector<1x3xf32>
    %c0_13 = arith.constant 0 : index
    %c0_14 = arith.constant 0 : index
    %10 = vector.load %arg12[%c0_13, %c0_14] : memref<3x2xf32, #tpu.memory_space<vmem>>, vector<3x2xf32>
    %c0_15 = arith.constant 0 : index
    %c0_16 = arith.constant 0 : index
    %11 = vector.load %arg13[%c0_15, %c0_16] : memref<3x2xf32, #tpu.memory_space<vmem>>, vector<3x2xf32>
    %c0_17 = arith.constant 0 : index
    %c0_18 = arith.constant 0 : index
    %12 = vector.load %arg14[%c0_17, %c0_18] : memref<3x2xf32, #tpu.memory_space<vmem>>, vector<3x2xf32>
    %c0_19 = arith.constant 0 : index
    %c0_20 = arith.constant 0 : index
    %13 = vector.load %arg15[%c0_19, %c0_20] : memref<4x24xf32, #tpu.memory_space<vmem>>, vector<4x24xf32>
    %c0_21 = arith.constant 0 : index
    %c0_22 = arith.constant 0 : index
    %14 = vector.load %arg16[%c0_21, %c0_22] : memref<6x4xf32, #tpu.memory_space<vmem>>, vector<6x4xf32>
    %c0_23 = arith.constant 0 : index
    %c0_24 = arith.constant 0 : index
    %15 = vector.load %arg17[%c0_23, %c0_24] : memref<6x4xf32, #tpu.memory_space<vmem>>, vector<6x4xf32>
    %16 = tpu.concatenate %1, %7 in 0 : vector<4x32xf32>, vector<1x32xf32> -> vector<5x32xf32>
    %c0_25 = arith.constant 0 : index
    %c0_26 = arith.constant 0 : index
    %17 = vector.load %arg10[%c0_25, %c0_26] : memref<32x1xf32, #tpu.memory_space<vmem>>, vector<32x1xf32>
    %cst_27 = arith.constant dense<0.000000e+00> : vector<4x1xf32>
    %18 = tpu.matmul %1, %17, %cst_27 {dimension_numbers = #tpu.dot_dimension_numbers<[1], [0], [0], [1], [0, 0, 1, 1], [], []>} : vector<4x32xf32>, vector<32x1xf32>, vector<4x1xf32> -> vector<4x1xf32>
    %c0_28 = arith.constant 0 : index
    %c0_29 = arith.constant 0 : index
    %19 = vector.load %arg11[%c0_28, %c0_29] : memref<32x1xf32, #tpu.memory_space<vmem>>, vector<32x1xf32>
    %cst_30 = arith.constant dense<0.000000e+00> : vector<5x1xf32>
    %20 = tpu.matmul %16, %19, %cst_30 {dimension_numbers = #tpu.dot_dimension_numbers<[1], [0], [0], [1], [0, 0, 1, 1], [], []>} : vector<5x32xf32>, vector<32x1xf32>, vector<5x1xf32> -> vector<5x1xf32>
    %cst_31 = arith.constant 1.000000e+00 : f32
    %21 = vector.broadcast %cst_31 : f32 to vector<4x1xf32>
    %22 = tpu.concatenate %18, %21 in 1 : vector<4x1xf32>, vector<4x1xf32> -> vector<4x2xf32>
    %cst_32 = arith.constant 1.000000e+00 : f32
    %23 = vector.broadcast %cst_32 : f32 to vector<5x1xf32>
    %24 = tpu.concatenate %23, %20 in 1 : vector<5x1xf32>, vector<5x1xf32> -> vector<5x2xf32>
    %cst_33 = arith.constant dense<0.000000e+00> : vector<4x5xf32>
    %25 = tpu.matmul %22, %24, %cst_33 {dimension_numbers = #tpu.dot_dimension_numbers<[1], [1], [0], [0], [0, 0, 1, 0], [], []>} : vector<4x2xf32>, vector<5x2xf32>, vector<4x5xf32> -> vector<4x5xf32>
    %26 = arith.negf %25 : vector<4x5xf32>
    %27 = math.exp %26 : vector<4x5xf32>
    %cst_34 = arith.constant 1.000000e+00 : f32
    %28 = vector.broadcast %cst_34 : f32 to vector<4x5xf32>
    %29 = arith.addf %28, %27 : vector<4x5xf32>
    %30 = arith.divf %28, %29 : vector<4x5xf32>
    %c0_35 = arith.constant 0 : index
    %c0_36 = arith.constant 0 : index
    %c0_37 = arith.constant 0 : index
    %31 = vector.load %arg3[%c0_35, %c0_36, %c0_37] : memref<1x1x5xf32, #tpu.memory_space<vmem>>, vector<1x1x5xf32>
    %32 = vector.shape_cast %31 : vector<1x1x5xf32> to vector<1x5xf32>
    %cst_38 = arith.constant 5.000000e-01 : f32
    %33 = vector.broadcast %cst_38 : f32 to vector<1x5xf32>
    %34 = arith.cmpf ogt, %32, %33 : vector<1x5xf32>
    %cst_39 = arith.constant -1.000000e+00 : f32
    %35 = vector.shape_cast %34 : vector<1x5xi1> to vector<1x5xi1>
    %36 = vector.broadcast %35 : vector<1x5xi1> to vector<4x5xi1>
    %37 = vector.broadcast %cst_39 : f32 to vector<4x5xf32>
    %38 = arith.select %36, %30, %37 : vector<4x5xi1>, vector<4x5xf32>
    %39 = tpu.iota {dimensions = array<i32: 1>} : vector<4x5xi32>
    %40 = arith.sitofp %39 : vector<4x5xi32> to vector<4x5xf32>
    %cst_40 = arith.constant dense<0xFF800000> : vector<4xf32>
    %41 = vector.multi_reduction <maximumf>, %38, %cst_40 [1] : vector<4x5xf32> to vector<4xf32>
    %42 = vector.shape_cast %41 : vector<4xf32> to vector<4x1xf32>
    %43 = vector.broadcast %42 : vector<4x1xf32> to vector<4x5xf32>
    %44 = arith.cmpf oge, %38, %43 : vector<4x5xf32>
    %cst_41 = arith.constant 5.000000e+00 : f32
    %45 = vector.broadcast %cst_41 : f32 to vector<4x5xf32>
    %46 = arith.select %44, %40, %45 : vector<4x5xi1>, vector<4x5xf32>
    %cst_42 = arith.constant dense<0x7F800000> : vector<4xf32>
    %47 = vector.multi_reduction <minimumf>, %46, %cst_42 [1] : vector<4x5xf32> to vector<4xf32>
    %48 = vector.shape_cast %47 : vector<4xf32> to vector<4x1xf32>
    %49 = vector.broadcast %48 : vector<4x1xf32> to vector<4x5xf32>
    %50 = arith.cmpf oeq, %40, %49 : vector<4x5xf32>
    %51 = arith.extui %50 : vector<4x5xi1> to vector<4x5xi32>
    %52 = arith.sitofp %51 : vector<4x5xi32> to vector<4x5xf32>
    %cst_43 = arith.constant 5.000000e-01 : f32
    %53 = vector.broadcast %cst_43 : f32 to vector<4x5xf32>
    %54 = arith.cmpf ogt, %52, %53 : vector<4x5xf32>
    %cst_44 = arith.constant -2.000000e+00 : f32
    %55 = vector.broadcast %cst_44 : f32 to vector<4x5xf32>
    %56 = arith.select %54, %55, %38 : vector<4x5xi1>, vector<4x5xf32>
    %cst_45 = arith.constant dense<0xFF800000> : vector<4xf32>
    %57 = vector.multi_reduction <maximumf>, %56, %cst_45 [1] : vector<4x5xf32> to vector<4xf32>
    %58 = vector.shape_cast %57 : vector<4xf32> to vector<4x1xf32>
    %59 = vector.broadcast %58 : vector<4x1xf32> to vector<4x5xf32>
    %60 = arith.cmpf oge, %56, %59 : vector<4x5xf32>
    %cst_46 = arith.constant 5.000000e+00 : f32
    %61 = vector.broadcast %cst_46 : f32 to vector<4x5xf32>
    %62 = arith.select %60, %40, %61 : vector<4x5xi1>, vector<4x5xf32>
    %cst_47 = arith.constant dense<0x7F800000> : vector<4xf32>
    %63 = vector.multi_reduction <minimumf>, %62, %cst_47 [1] : vector<4x5xf32> to vector<4xf32>
    %64 = vector.shape_cast %63 : vector<4xf32> to vector<4x1xf32>
    %65 = vector.broadcast %64 : vector<4x1xf32> to vector<4x5xf32>
    %66 = arith.cmpf oeq, %40, %65 : vector<4x5xf32>
    %67 = arith.extui %66 : vector<4x5xi1> to vector<4x5xi32>
    %68 = arith.sitofp %67 : vector<4x5xi32> to vector<4x5xf32>
    %cst_48 = arith.constant dense<0.000000e+00> : vector<4x32xf32>
    %69 = tpu.matmul %52, %16, %cst_48 {dimension_numbers = #tpu.dot_dimension_numbers<[1], [0], [0], [1], [0, 0, 1, 1], [], []>} : vector<4x5xf32>, vector<5x32xf32>, vector<4x32xf32> -> vector<4x32xf32>
    %cst_49 = arith.constant dense<0.000000e+00> : vector<4x32xf32>
    %70 = tpu.matmul %68, %16, %cst_49 {dimension_numbers = #tpu.dot_dimension_numbers<[1], [0], [0], [1], [0, 0, 1, 1], [], []>} : vector<4x5xf32>, vector<5x32xf32>, vector<4x32xf32> -> vector<4x32xf32>
    %71 = vector.shape_cast %7 : vector<1x32xf32> to vector<1x32xf32>
    %72 = vector.broadcast %71 : vector<1x32xf32> to vector<4x32xf32>
    %73 = tpu.concatenate %1, %72 in 1 : vector<4x32xf32>, vector<4x32xf32> -> vector<4x64xf32>
    %74 = math.tanh %73 : vector<4x64xf32>
    %cst_50 = arith.constant dense<0.000000e+00> : vector<4x3xf32>
    %75 = tpu.matmul %74, %8, %cst_50 {dimension_numbers = #tpu.dot_dimension_numbers<[1], [0], [0], [1], [0, 0, 1, 1], [], []>} : vector<4x64xf32>, vector<64x3xf32>, vector<4x3xf32> -> vector<4x3xf32>
    %76 = vector.broadcast %9 : vector<1x3xf32> to vector<4x3xf32>
    %77 = arith.addf %75, %76 : vector<4x3xf32>
    %cst_51 = arith.constant dense<0xFF800000> : vector<4xf32>
    %78 = vector.multi_reduction <maximumf>, %77, %cst_51 [1] : vector<4x3xf32> to vector<4xf32>
    %cst_52 = arith.constant 0xFF800000 : f32
    %79 = vector.broadcast %cst_52 : f32 to vector<4xf32>
    %80 = arith.maximumf %79, %78 : vector<4xf32>
    %81 = vector.shape_cast %80 : vector<4xf32> to vector<4x1xf32>
    %82 = vector.broadcast %81 : vector<4x1xf32> to vector<4x3xf32>
    %83 = arith.subf %77, %82 : vector<4x3xf32>
    %84 = math.exp %83 : vector<4x3xf32>
    %cst_53 = arith.constant dense<0.000000e+00> : vector<4xf32>
    %85 = vector.multi_reduction <add>, %84, %cst_53 [1] : vector<4x3xf32> to vector<4xf32>
    %86 = vector.shape_cast %85 : vector<4xf32> to vector<4x1xf32>
    %87 = vector.broadcast %86 : vector<4x1xf32> to vector<4x3xf32>
    %88 = arith.divf %84, %87 : vector<4x3xf32>
    %cst_54 = arith.constant 9.99999997E-7 : f32
    %89 = vector.broadcast %cst_54 : f32 to vector<4x3xf32>
    %90 = arith.addf %88, %89 : vector<4x3xf32>
    %91 = math.log %90 : vector<4x3xf32>
    %cst_55 = arith.constant dense<0.000000e+00> : vector<4x2xf32>
    %92 = tpu.matmul %91, %10, %cst_55 {dimension_numbers = #tpu.dot_dimension_numbers<[1], [0], [0], [1], [0, 0, 1, 1], [], []>} : vector<4x3xf32>, vector<3x2xf32>, vector<4x2xf32> -> vector<4x2xf32>
    %93 = math.exp %92 : vector<4x2xf32>
    %94 = tpu.concatenate %1, %69 in 1 : vector<4x32xf32>, vector<4x32xf32> -> vector<4x64xf32>
    %95 = math.tanh %94 : vector<4x64xf32>
    %cst_56 = arith.constant dense<0.000000e+00> : vector<4x3xf32>
    %96 = tpu.matmul %95, %8, %cst_56 {dimension_numbers = #tpu.dot_dimension_numbers<[1], [0], [0], [1], [0, 0, 1, 1], [], []>} : vector<4x64xf32>, vector<64x3xf32>, vector<4x3xf32> -> vector<4x3xf32>
    %97 = vector.broadcast %9 : vector<1x3xf32> to vector<4x3xf32>
    %98 = arith.addf %96, %97 : vector<4x3xf32>
    %cst_57 = arith.constant dense<0xFF800000> : vector<4xf32>
    %99 = vector.multi_reduction <maximumf>, %98, %cst_57 [1] : vector<4x3xf32> to vector<4xf32>
    %cst_58 = arith.constant 0xFF800000 : f32
    %100 = vector.broadcast %cst_58 : f32 to vector<4xf32>
    %101 = arith.maximumf %100, %99 : vector<4xf32>
    %102 = vector.shape_cast %101 : vector<4xf32> to vector<4x1xf32>
    %103 = vector.broadcast %102 : vector<4x1xf32> to vector<4x3xf32>
    %104 = arith.subf %98, %103 : vector<4x3xf32>
    %105 = math.exp %104 : vector<4x3xf32>
    %cst_59 = arith.constant dense<0.000000e+00> : vector<4xf32>
    %106 = vector.multi_reduction <add>, %105, %cst_59 [1] : vector<4x3xf32> to vector<4xf32>
    %107 = vector.shape_cast %106 : vector<4xf32> to vector<4x1xf32>
    %108 = vector.broadcast %107 : vector<4x1xf32> to vector<4x3xf32>
    %109 = arith.divf %105, %108 : vector<4x3xf32>
    %110 = tpu.concatenate %69, %72 in 1 : vector<4x32xf32>, vector<4x32xf32> -> vector<4x64xf32>
    %111 = math.tanh %110 : vector<4x64xf32>
    %cst_60 = arith.constant dense<0.000000e+00> : vector<4x3xf32>
    %112 = tpu.matmul %111, %8, %cst_60 {dimension_numbers = #tpu.dot_dimension_numbers<[1], [0], [0], [1], [0, 0, 1, 1], [], []>} : vector<4x64xf32>, vector<64x3xf32>, vector<4x3xf32> -> vector<4x3xf32>
    %113 = vector.broadcast %9 : vector<1x3xf32> to vector<4x3xf32>
    %114 = arith.addf %112, %113 : vector<4x3xf32>
    %cst_61 = arith.constant dense<0xFF800000> : vector<4xf32>
    %115 = vector.multi_reduction <maximumf>, %114, %cst_61 [1] : vector<4x3xf32> to vector<4xf32>
    %cst_62 = arith.constant 0xFF800000 : f32
    %116 = vector.broadcast %cst_62 : f32 to vector<4xf32>
    %117 = arith.maximumf %116, %115 : vector<4xf32>
    %118 = vector.shape_cast %117 : vector<4xf32> to vector<4x1xf32>
    %119 = vector.broadcast %118 : vector<4x1xf32> to vector<4x3xf32>
    %120 = arith.subf %114, %119 : vector<4x3xf32>
    %121 = math.exp %120 : vector<4x3xf32>
    %cst_63 = arith.constant dense<0.000000e+00> : vector<4xf32>
    %122 = vector.multi_reduction <add>, %121, %cst_63 [1] : vector<4x3xf32> to vector<4xf32>
    %123 = vector.shape_cast %122 : vector<4xf32> to vector<4x1xf32>
    %124 = vector.broadcast %123 : vector<4x1xf32> to vector<4x3xf32>
    %125 = arith.divf %121, %124 : vector<4x3xf32>
    %cst_64 = arith.constant 9.99999997E-7 : f32
    %126 = vector.broadcast %cst_64 : f32 to vector<4x3xf32>
    %127 = arith.addf %109, %126 : vector<4x3xf32>
    %128 = math.log %127 : vector<4x3xf32>
    %cst_65 = arith.constant dense<0.000000e+00> : vector<4x2xf32>
    %129 = tpu.matmul %128, %11, %cst_65 {dimension_numbers = #tpu.dot_dimension_numbers<[1], [0], [0], [1], [0, 0, 1, 1], [], []>} : vector<4x3xf32>, vector<3x2xf32>, vector<4x2xf32> -> vector<4x2xf32>
    %130 = math.exp %129 : vector<4x2xf32>
    %cst_66 = arith.constant 9.99999997E-7 : f32
    %131 = vector.broadcast %cst_66 : f32 to vector<4x3xf32>
    %132 = arith.addf %125, %131 : vector<4x3xf32>
    %133 = math.log %132 : vector<4x3xf32>
    %cst_67 = arith.constant dense<0.000000e+00> : vector<4x2xf32>
    %134 = tpu.matmul %133, %12, %cst_67 {dimension_numbers = #tpu.dot_dimension_numbers<[1], [0], [0], [1], [0, 0, 1, 1], [], []>} : vector<4x3xf32>, vector<3x2xf32>, vector<4x2xf32> -> vector<4x2xf32>
    %135 = math.exp %134 : vector<4x2xf32>
    %136 = arith.mulf %130, %135 : vector<4x2xf32>
    %137 = math.sqrt %136 : vector<4x2xf32>
    %cst_68 = arith.constant 1.000000e+00 : f32
    %138 = vector.broadcast %cst_68 : f32 to vector<4x2xf32>
    %139 = arith.minimumf %137, %138 : vector<4x2xf32>
    %140 = vector.broadcast %42 : vector<4x1xf32> to vector<4x2xf32>
    %141 = arith.mulf %139, %140 : vector<4x2xf32>
    %142 = tpu.concatenate %1, %70 in 1 : vector<4x32xf32>, vector<4x32xf32> -> vector<4x64xf32>
    %143 = math.tanh %142 : vector<4x64xf32>
    %cst_69 = arith.constant dense<0.000000e+00> : vector<4x3xf32>
    %144 = tpu.matmul %143, %8, %cst_69 {dimension_numbers = #tpu.dot_dimension_numbers<[1], [0], [0], [1], [0, 0, 1, 1], [], []>} : vector<4x64xf32>, vector<64x3xf32>, vector<4x3xf32> -> vector<4x3xf32>
    %145 = vector.broadcast %9 : vector<1x3xf32> to vector<4x3xf32>
    %146 = arith.addf %144, %145 : vector<4x3xf32>
    %cst_70 = arith.constant dense<0xFF800000> : vector<4xf32>
    %147 = vector.multi_reduction <maximumf>, %146, %cst_70 [1] : vector<4x3xf32> to vector<4xf32>
    %cst_71 = arith.constant 0xFF800000 : f32
    %148 = vector.broadcast %cst_71 : f32 to vector<4xf32>
    %149 = arith.maximumf %148, %147 : vector<4xf32>
    %150 = vector.shape_cast %149 : vector<4xf32> to vector<4x1xf32>
    %151 = vector.broadcast %150 : vector<4x1xf32> to vector<4x3xf32>
    %152 = arith.subf %146, %151 : vector<4x3xf32>
    %153 = math.exp %152 : vector<4x3xf32>
    %cst_72 = arith.constant dense<0.000000e+00> : vector<4xf32>
    %154 = vector.multi_reduction <add>, %153, %cst_72 [1] : vector<4x3xf32> to vector<4xf32>
    %155 = vector.shape_cast %154 : vector<4xf32> to vector<4x1xf32>
    %156 = vector.broadcast %155 : vector<4x1xf32> to vector<4x3xf32>
    %157 = arith.divf %153, %156 : vector<4x3xf32>
    %158 = tpu.concatenate %70, %72 in 1 : vector<4x32xf32>, vector<4x32xf32> -> vector<4x64xf32>
    %159 = math.tanh %158 : vector<4x64xf32>
    %cst_73 = arith.constant dense<0.000000e+00> : vector<4x3xf32>
    %160 = tpu.matmul %159, %8, %cst_73 {dimension_numbers = #tpu.dot_dimension_numbers<[1], [0], [0], [1], [0, 0, 1, 1], [], []>} : vector<4x64xf32>, vector<64x3xf32>, vector<4x3xf32> -> vector<4x3xf32>
    %161 = vector.broadcast %9 : vector<1x3xf32> to vector<4x3xf32>
    %162 = arith.addf %160, %161 : vector<4x3xf32>
    %cst_74 = arith.constant dense<0xFF800000> : vector<4xf32>
    %163 = vector.multi_reduction <maximumf>, %162, %cst_74 [1] : vector<4x3xf32> to vector<4xf32>
    %cst_75 = arith.constant 0xFF800000 : f32
    %164 = vector.broadcast %cst_75 : f32 to vector<4xf32>
    %165 = arith.maximumf %164, %163 : vector<4xf32>
    %166 = vector.shape_cast %165 : vector<4xf32> to vector<4x1xf32>
    %167 = vector.broadcast %166 : vector<4x1xf32> to vector<4x3xf32>
    %168 = arith.subf %162, %167 : vector<4x3xf32>
    %169 = math.exp %168 : vector<4x3xf32>
    %cst_76 = arith.constant dense<0.000000e+00> : vector<4xf32>
    %170 = vector.multi_reduction <add>, %169, %cst_76 [1] : vector<4x3xf32> to vector<4xf32>
    %171 = vector.shape_cast %170 : vector<4xf32> to vector<4x1xf32>
    %172 = vector.broadcast %171 : vector<4x1xf32> to vector<4x3xf32>
    %173 = arith.divf %169, %172 : vector<4x3xf32>
    %cst_77 = arith.constant 9.99999997E-7 : f32
    %174 = vector.broadcast %cst_77 : f32 to vector<4x3xf32>
    %175 = arith.addf %157, %174 : vector<4x3xf32>
    %176 = math.log %175 : vector<4x3xf32>
    %cst_78 = arith.constant dense<0.000000e+00> : vector<4x2xf32>
    %177 = tpu.matmul %176, %11, %cst_78 {dimension_numbers = #tpu.dot_dimension_numbers<[1], [0], [0], [1], [0, 0, 1, 1], [], []>} : vector<4x3xf32>, vector<3x2xf32>, vector<4x2xf32> -> vector<4x2xf32>
    %178 = math.exp %177 : vector<4x2xf32>
    %cst_79 = arith.constant 9.99999997E-7 : f32
    %179 = vector.broadcast %cst_79 : f32 to vector<4x3xf32>
    %180 = arith.addf %173, %179 : vector<4x3xf32>
    %181 = math.log %180 : vector<4x3xf32>
    %cst_80 = arith.constant dense<0.000000e+00> : vector<4x2xf32>
    %182 = tpu.matmul %181, %12, %cst_80 {dimension_numbers = #tpu.dot_dimension_numbers<[1], [0], [0], [1], [0, 0, 1, 1], [], []>} : vector<4x3xf32>, vector<3x2xf32>, vector<4x2xf32> -> vector<4x2xf32>
    %183 = math.exp %182 : vector<4x2xf32>
    %184 = arith.mulf %178, %183 : vector<4x2xf32>
    %185 = math.sqrt %184 : vector<4x2xf32>
    %cst_81 = arith.constant 1.000000e+00 : f32
    %186 = vector.broadcast %cst_81 : f32 to vector<4x2xf32>
    %187 = arith.minimumf %185, %186 : vector<4x2xf32>
    %188 = vector.broadcast %58 : vector<4x1xf32> to vector<4x2xf32>
    %189 = arith.mulf %187, %188 : vector<4x2xf32>
    %190 = arith.maximumf %141, %189 : vector<4x2xf32>
    %191 = tpu.concatenate %93, %190 in 1 : vector<4x2xf32>, vector<4x2xf32> -> vector<4x4xf32>
    %cst_82 = arith.constant 9.99999997E-7 : f32
    %192 = vector.broadcast %cst_82 : f32 to vector<4x4xf32>
    %193 = arith.addf %191, %192 : vector<4x4xf32>
    %194 = math.log %193 : vector<4x4xf32>
    %cst_83 = arith.constant dense<0.000000e+00> : vector<4x24xf32>
    %195 = tpu.matmul %194, %13, %cst_83 {dimension_numbers = #tpu.dot_dimension_numbers<[1], [0], [0], [1], [0, 0, 1, 1], [], []>} : vector<4x4xf32>, vector<4x24xf32>, vector<4x24xf32> -> vector<4x24xf32>
    %196 = math.exp %195 : vector<4x24xf32>
    %197 = vector.extract_strided_slice %196 {offsets = [0, 0], sizes = [4, 6], strides = [1, 1]} : vector<4x24xf32> to vector<4x6xf32>
    %198 = vector.extract_strided_slice %196 {offsets = [0, 6], sizes = [4, 6], strides = [1, 1]} : vector<4x24xf32> to vector<4x6xf32>
    %199 = arith.maximumf %197, %198 : vector<4x6xf32>
    %200 = vector.extract_strided_slice %196 {offsets = [0, 12], sizes = [4, 6], strides = [1, 1]} : vector<4x24xf32> to vector<4x6xf32>
    %201 = arith.maximumf %199, %200 : vector<4x6xf32>
    %202 = vector.extract_strided_slice %196 {offsets = [0, 18], sizes = [4, 6], strides = [1, 1]} : vector<4x24xf32> to vector<4x6xf32>
    %203 = arith.maximumf %201, %202 : vector<4x6xf32>
    %cst_84 = arith.constant dense<0.000000e+00> : vector<6x32xf32>
    %204 = tpu.matmul %15, %1, %cst_84 {dimension_numbers = #tpu.dot_dimension_numbers<[1], [0], [0], [1], [0, 0, 1, 1], [], []>} : vector<6x4xf32>, vector<4x32xf32>, vector<6x32xf32> -> vector<6x32xf32>
    %cst_85 = arith.constant dense<0.000000e+00> : vector<6x32xf32>
    %205 = tpu.matmul %14, %1, %cst_85 {dimension_numbers = #tpu.dot_dimension_numbers<[1], [0], [0], [1], [0, 0, 1, 1], [], []>} : vector<6x4xf32>, vector<4x32xf32>, vector<6x32xf32> -> vector<6x32xf32>
    %cst_86 = arith.constant dense<0.000000e+00> : vector<6x32xf32>
    %206 = tpu.matmul %15, %69, %cst_86 {dimension_numbers = #tpu.dot_dimension_numbers<[1], [0], [0], [1], [0, 0, 1, 1], [], []>} : vector<6x4xf32>, vector<4x32xf32>, vector<6x32xf32> -> vector<6x32xf32>
    %cst_87 = arith.constant dense<0.000000e+00> : vector<6x32xf32>
    %207 = tpu.matmul %15, %70, %cst_87 {dimension_numbers = #tpu.dot_dimension_numbers<[1], [0], [0], [1], [0, 0, 1, 1], [], []>} : vector<6x4xf32>, vector<4x32xf32>, vector<6x32xf32> -> vector<6x32xf32>
    %cst_88 = arith.constant dense<0.000000e+00> : vector<6x1xf32>
    %208 = tpu.matmul %15, %42, %cst_88 {dimension_numbers = #tpu.dot_dimension_numbers<[1], [0], [0], [1], [0, 0, 1, 1], [], []>} : vector<6x4xf32>, vector<4x1xf32>, vector<6x1xf32> -> vector<6x1xf32>
    %cst_89 = arith.constant dense<0.000000e+00> : vector<6x1xf32>
    %209 = tpu.matmul %15, %58, %cst_89 {dimension_numbers = #tpu.dot_dimension_numbers<[1], [0], [0], [1], [0, 0, 1, 1], [], []>} : vector<6x4xf32>, vector<4x1xf32>, vector<6x1xf32> -> vector<6x1xf32>
    %210 = tpu.concatenate %204, %205 in 1 : vector<6x32xf32>, vector<6x32xf32> -> vector<6x64xf32>
    %211 = math.tanh %210 : vector<6x64xf32>
    %cst_90 = arith.constant dense<0.000000e+00> : vector<6x3xf32>
    %212 = tpu.matmul %211, %8, %cst_90 {dimension_numbers = #tpu.dot_dimension_numbers<[1], [0], [0], [1], [0, 0, 1, 1], [], []>} : vector<6x64xf32>, vector<64x3xf32>, vector<6x3xf32> -> vector<6x3xf32>
    %213 = vector.broadcast %9 : vector<1x3xf32> to vector<6x3xf32>
    %214 = arith.addf %212, %213 : vector<6x3xf32>
    %cst_91 = arith.constant dense<0xFF800000> : vector<6xf32>
    %215 = vector.multi_reduction <maximumf>, %214, %cst_91 [1] : vector<6x3xf32> to vector<6xf32>
    %cst_92 = arith.constant 0xFF800000 : f32
    %216 = vector.broadcast %cst_92 : f32 to vector<6xf32>
    %217 = arith.maximumf %216, %215 : vector<6xf32>
    %218 = vector.shape_cast %217 : vector<6xf32> to vector<6x1xf32>
    %219 = vector.broadcast %218 : vector<6x1xf32> to vector<6x3xf32>
    %220 = arith.subf %214, %219 : vector<6x3xf32>
    %221 = math.exp %220 : vector<6x3xf32>
    %cst_93 = arith.constant dense<0.000000e+00> : vector<6xf32>
    %222 = vector.multi_reduction <add>, %221, %cst_93 [1] : vector<6x3xf32> to vector<6xf32>
    %223 = vector.shape_cast %222 : vector<6xf32> to vector<6x1xf32>
    %224 = vector.broadcast %223 : vector<6x1xf32> to vector<6x3xf32>
    %225 = arith.divf %221, %224 : vector<6x3xf32>
    %cst_94 = arith.constant 9.99999997E-7 : f32
    %226 = vector.broadcast %cst_94 : f32 to vector<6x3xf32>
    %227 = arith.addf %225, %226 : vector<6x3xf32>
    %228 = math.log %227 : vector<6x3xf32>
    %cst_95 = arith.constant dense<0.000000e+00> : vector<6x2xf32>
    %229 = tpu.matmul %228, %10, %cst_95 {dimension_numbers = #tpu.dot_dimension_numbers<[1], [0], [0], [1], [0, 0, 1, 1], [], []>} : vector<6x3xf32>, vector<3x2xf32>, vector<6x2xf32> -> vector<6x2xf32>
    %230 = math.exp %229 : vector<6x2xf32>
    %231 = tpu.concatenate %204, %206 in 1 : vector<6x32xf32>, vector<6x32xf32> -> vector<6x64xf32>
    %232 = math.tanh %231 : vector<6x64xf32>
    %cst_96 = arith.constant dense<0.000000e+00> : vector<6x3xf32>
    %233 = tpu.matmul %232, %8, %cst_96 {dimension_numbers = #tpu.dot_dimension_numbers<[1], [0], [0], [1], [0, 0, 1, 1], [], []>} : vector<6x64xf32>, vector<64x3xf32>, vector<6x3xf32> -> vector<6x3xf32>
    %234 = vector.broadcast %9 : vector<1x3xf32> to vector<6x3xf32>
    %235 = arith.addf %233, %234 : vector<6x3xf32>
    %cst_97 = arith.constant dense<0xFF800000> : vector<6xf32>
    %236 = vector.multi_reduction <maximumf>, %235, %cst_97 [1] : vector<6x3xf32> to vector<6xf32>
    %cst_98 = arith.constant 0xFF800000 : f32
    %237 = vector.broadcast %cst_98 : f32 to vector<6xf32>
    %238 = arith.maximumf %237, %236 : vector<6xf32>
    %239 = vector.shape_cast %238 : vector<6xf32> to vector<6x1xf32>
    %240 = vector.broadcast %239 : vector<6x1xf32> to vector<6x3xf32>
    %241 = arith.subf %235, %240 : vector<6x3xf32>
    %242 = math.exp %241 : vector<6x3xf32>
    %cst_99 = arith.constant dense<0.000000e+00> : vector<6xf32>
    %243 = vector.multi_reduction <add>, %242, %cst_99 [1] : vector<6x3xf32> to vector<6xf32>
    %244 = vector.shape_cast %243 : vector<6xf32> to vector<6x1xf32>
    %245 = vector.broadcast %244 : vector<6x1xf32> to vector<6x3xf32>
    %246 = arith.divf %242, %245 : vector<6x3xf32>
    %247 = tpu.concatenate %206, %205 in 1 : vector<6x32xf32>, vector<6x32xf32> -> vector<6x64xf32>
    %248 = math.tanh %247 : vector<6x64xf32>
    %cst_100 = arith.constant dense<0.000000e+00> : vector<6x3xf32>
    %249 = tpu.matmul %248, %8, %cst_100 {dimension_numbers = #tpu.dot_dimension_numbers<[1], [0], [0], [1], [0, 0, 1, 1], [], []>} : vector<6x64xf32>, vector<64x3xf32>, vector<6x3xf32> -> vector<6x3xf32>
    %250 = vector.broadcast %9 : vector<1x3xf32> to vector<6x3xf32>
    %251 = arith.addf %249, %250 : vector<6x3xf32>
    %cst_101 = arith.constant dense<0xFF800000> : vector<6xf32>
    %252 = vector.multi_reduction <maximumf>, %251, %cst_101 [1] : vector<6x3xf32> to vector<6xf32>
    %cst_102 = arith.constant 0xFF800000 : f32
    %253 = vector.broadcast %cst_102 : f32 to vector<6xf32>
    %254 = arith.maximumf %253, %252 : vector<6xf32>
    %255 = vector.shape_cast %254 : vector<6xf32> to vector<6x1xf32>
    %256 = vector.broadcast %255 : vector<6x1xf32> to vector<6x3xf32>
    %257 = arith.subf %251, %256 : vector<6x3xf32>
    %258 = math.exp %257 : vector<6x3xf32>
    %cst_103 = arith.constant dense<0.000000e+00> : vector<6xf32>
    %259 = vector.multi_reduction <add>, %258, %cst_103 [1] : vector<6x3xf32> to vector<6xf32>
    %260 = vector.shape_cast %259 : vector<6xf32> to vector<6x1xf32>
    %261 = vector.broadcast %260 : vector<6x1xf32> to vector<6x3xf32>
    %262 = arith.divf %258, %261 : vector<6x3xf32>
    %cst_104 = arith.constant 9.99999997E-7 : f32
    %263 = vector.broadcast %cst_104 : f32 to vector<6x3xf32>
    %264 = arith.addf %246, %263 : vector<6x3xf32>
    %265 = math.log %264 : vector<6x3xf32>
    %cst_105 = arith.constant dense<0.000000e+00> : vector<6x2xf32>
    %266 = tpu.matmul %265, %11, %cst_105 {dimension_numbers = #tpu.dot_dimension_numbers<[1], [0], [0], [1], [0, 0, 1, 1], [], []>} : vector<6x3xf32>, vector<3x2xf32>, vector<6x2xf32> -> vector<6x2xf32>
    %267 = math.exp %266 : vector<6x2xf32>
    %cst_106 = arith.constant 9.99999997E-7 : f32
    %268 = vector.broadcast %cst_106 : f32 to vector<6x3xf32>
    %269 = arith.addf %262, %268 : vector<6x3xf32>
    %270 = math.log %269 : vector<6x3xf32>
    %cst_107 = arith.constant dense<0.000000e+00> : vector<6x2xf32>
    %271 = tpu.matmul %270, %12, %cst_107 {dimension_numbers = #tpu.dot_dimension_numbers<[1], [0], [0], [1], [0, 0, 1, 1], [], []>} : vector<6x3xf32>, vector<3x2xf32>, vector<6x2xf32> -> vector<6x2xf32>
    %272 = math.exp %271 : vector<6x2xf32>
    %273 = arith.mulf %267, %272 : vector<6x2xf32>
    %274 = math.sqrt %273 : vector<6x2xf32>
    %cst_108 = arith.constant 1.000000e+00 : f32
    %275 = vector.broadcast %cst_108 : f32 to vector<6x2xf32>
    %276 = arith.minimumf %274, %275 : vector<6x2xf32>
    %277 = vector.broadcast %208 : vector<6x1xf32> to vector<6x2xf32>
    %278 = arith.mulf %276, %277 : vector<6x2xf32>
    %279 = tpu.concatenate %204, %207 in 1 : vector<6x32xf32>, vector<6x32xf32> -> vector<6x64xf32>
    %280 = math.tanh %279 : vector<6x64xf32>
    %cst_109 = arith.constant dense<0.000000e+00> : vector<6x3xf32>
    %281 = tpu.matmul %280, %8, %cst_109 {dimension_numbers = #tpu.dot_dimension_numbers<[1], [0], [0], [1], [0, 0, 1, 1], [], []>} : vector<6x64xf32>, vector<64x3xf32>, vector<6x3xf32> -> vector<6x3xf32>
    %282 = vector.broadcast %9 : vector<1x3xf32> to vector<6x3xf32>
    %283 = arith.addf %281, %282 : vector<6x3xf32>
    %cst_110 = arith.constant dense<0xFF800000> : vector<6xf32>
    %284 = vector.multi_reduction <maximumf>, %283, %cst_110 [1] : vector<6x3xf32> to vector<6xf32>
    %cst_111 = arith.constant 0xFF800000 : f32
    %285 = vector.broadcast %cst_111 : f32 to vector<6xf32>
    %286 = arith.maximumf %285, %284 : vector<6xf32>
    %287 = vector.shape_cast %286 : vector<6xf32> to vector<6x1xf32>
    %288 = vector.broadcast %287 : vector<6x1xf32> to vector<6x3xf32>
    %289 = arith.subf %283, %288 : vector<6x3xf32>
    %290 = math.exp %289 : vector<6x3xf32>
    %cst_112 = arith.constant dense<0.000000e+00> : vector<6xf32>
    %291 = vector.multi_reduction <add>, %290, %cst_112 [1] : vector<6x3xf32> to vector<6xf32>
    %292 = vector.shape_cast %291 : vector<6xf32> to vector<6x1xf32>
    %293 = vector.broadcast %292 : vector<6x1xf32> to vector<6x3xf32>
    %294 = arith.divf %290, %293 : vector<6x3xf32>
    %295 = tpu.concatenate %207, %205 in 1 : vector<6x32xf32>, vector<6x32xf32> -> vector<6x64xf32>
    %296 = math.tanh %295 : vector<6x64xf32>
    %cst_113 = arith.constant dense<0.000000e+00> : vector<6x3xf32>
    %297 = tpu.matmul %296, %8, %cst_113 {dimension_numbers = #tpu.dot_dimension_numbers<[1], [0], [0], [1], [0, 0, 1, 1], [], []>} : vector<6x64xf32>, vector<64x3xf32>, vector<6x3xf32> -> vector<6x3xf32>
    %298 = vector.broadcast %9 : vector<1x3xf32> to vector<6x3xf32>
    %299 = arith.addf %297, %298 : vector<6x3xf32>
    %cst_114 = arith.constant dense<0xFF800000> : vector<6xf32>
    %300 = vector.multi_reduction <maximumf>, %299, %cst_114 [1] : vector<6x3xf32> to vector<6xf32>
    %cst_115 = arith.constant 0xFF800000 : f32
    %301 = vector.broadcast %cst_115 : f32 to vector<6xf32>
    %302 = arith.maximumf %301, %300 : vector<6xf32>
    %303 = vector.shape_cast %302 : vector<6xf32> to vector<6x1xf32>
    %304 = vector.broadcast %303 : vector<6x1xf32> to vector<6x3xf32>
    %305 = arith.subf %299, %304 : vector<6x3xf32>
    %306 = math.exp %305 : vector<6x3xf32>
    %cst_116 = arith.constant dense<0.000000e+00> : vector<6xf32>
    %307 = vector.multi_reduction <add>, %306, %cst_116 [1] : vector<6x3xf32> to vector<6xf32>
    %308 = vector.shape_cast %307 : vector<6xf32> to vector<6x1xf32>
    %309 = vector.broadcast %308 : vector<6x1xf32> to vector<6x3xf32>
    %310 = arith.divf %306, %309 : vector<6x3xf32>
    %cst_117 = arith.constant 9.99999997E-7 : f32
    %311 = vector.broadcast %cst_117 : f32 to vector<6x3xf32>
    %312 = arith.addf %294, %311 : vector<6x3xf32>
    %313 = math.log %312 : vector<6x3xf32>
    %cst_118 = arith.constant dense<0.000000e+00> : vector<6x2xf32>
    %314 = tpu.matmul %313, %11, %cst_118 {dimension_numbers = #tpu.dot_dimension_numbers<[1], [0], [0], [1], [0, 0, 1, 1], [], []>} : vector<6x3xf32>, vector<3x2xf32>, vector<6x2xf32> -> vector<6x2xf32>
    %315 = math.exp %314 : vector<6x2xf32>
    %cst_119 = arith.constant 9.99999997E-7 : f32
    %316 = vector.broadcast %cst_119 : f32 to vector<6x3xf32>
    %317 = arith.addf %310, %316 : vector<6x3xf32>
    %318 = math.log %317 : vector<6x3xf32>
    %cst_120 = arith.constant dense<0.000000e+00> : vector<6x2xf32>
    %319 = tpu.matmul %318, %12, %cst_120 {dimension_numbers = #tpu.dot_dimension_numbers<[1], [0], [0], [1], [0, 0, 1, 1], [], []>} : vector<6x3xf32>, vector<3x2xf32>, vector<6x2xf32> -> vector<6x2xf32>
    %320 = math.exp %319 : vector<6x2xf32>
    %321 = arith.mulf %315, %320 : vector<6x2xf32>
    %322 = math.sqrt %321 : vector<6x2xf32>
    %cst_121 = arith.constant 1.000000e+00 : f32
    %323 = vector.broadcast %cst_121 : f32 to vector<6x2xf32>
    %324 = arith.minimumf %322, %323 : vector<6x2xf32>
    %325 = vector.broadcast %209 : vector<6x1xf32> to vector<6x2xf32>
    %326 = arith.mulf %324, %325 : vector<6x2xf32>
    %327 = arith.maximumf %278, %326 : vector<6x2xf32>
    %328 = tpu.concatenate %230, %327 in 1 : vector<6x2xf32>, vector<6x2xf32> -> vector<6x4xf32>
    %cst_122 = arith.constant 9.99999997E-7 : f32
    %329 = vector.broadcast %cst_122 : f32 to vector<6x4xf32>
    %330 = arith.addf %328, %329 : vector<6x4xf32>
    %331 = math.log %330 : vector<6x4xf32>
    %cst_123 = arith.constant dense<0.000000e+00> : vector<6x24xf32>
    %332 = tpu.matmul %331, %13, %cst_123 {dimension_numbers = #tpu.dot_dimension_numbers<[1], [0], [0], [1], [0, 0, 1, 1], [], []>} : vector<6x4xf32>, vector<4x24xf32>, vector<6x24xf32> -> vector<6x24xf32>
    %333 = math.exp %332 : vector<6x24xf32>
    %334 = vector.extract_strided_slice %333 {offsets = [0, 0], sizes = [6, 6], strides = [1, 1]} : vector<6x24xf32> to vector<6x6xf32>
    %335 = vector.extract_strided_slice %333 {offsets = [0, 6], sizes = [6, 6], strides = [1, 1]} : vector<6x24xf32> to vector<6x6xf32>
    %336 = arith.maximumf %334, %335 : vector<6x6xf32>
    %337 = vector.extract_strided_slice %333 {offsets = [0, 12], sizes = [6, 6], strides = [1, 1]} : vector<6x24xf32> to vector<6x6xf32>
    %338 = arith.maximumf %336, %337 : vector<6x6xf32>
    %339 = vector.extract_strided_slice %333 {offsets = [0, 18], sizes = [6, 6], strides = [1, 1]} : vector<6x24xf32> to vector<6x6xf32>
    %340 = arith.maximumf %338, %339 : vector<6x6xf32>
    %c0_124 = arith.constant 0 : index
    %c0_125 = arith.constant 0 : index
    %c0_126 = arith.constant 0 : index
    %341 = vector.load %arg4[%c0_124, %c0_125, %c0_126] : memref<1x4x6xf32, #tpu.memory_space<vmem>>, vector<1x4x6xf32>
    %342 = vector.shape_cast %341 : vector<1x4x6xf32> to vector<4x6xf32>
    %cst_127 = arith.constant dense<0.000000e+00> : vector<4xf32>
    %343 = vector.multi_reduction <add>, %342, %cst_127 [1] : vector<4x6xf32> to vector<4xf32>
    %344 = vector.shape_cast %343 : vector<4xf32> to vector<4x1xf32>
    %cst_128 = arith.constant 5.000000e-01 : f32
    %345 = vector.broadcast %cst_128 : f32 to vector<4x6xf32>
    %346 = arith.cmpf ogt, %342, %345 : vector<4x6xf32>
    %cst_129 = arith.constant 1.000000e+00 : f32
    %347 = vector.broadcast %cst_129 : f32 to vector<4x6xf32>
    %348 = arith.subf %347, %203 : vector<4x6xf32>
    %349 = arith.select %346, %203, %348 : vector<4x6xi1>, vector<4x6xf32>
    %350 = math.log %349 : vector<4x6xf32>
    %cst_130 = arith.constant 0.000000e+00 : f32
    %351 = vector.broadcast %cst_130 : f32 to vector<4x6xf32>
    %352 = arith.subf %351, %350 : vector<4x6xf32>
    %353 = arith.cmpf one, %352, %352 : vector<4x6xf32>
    %cst_131 = arith.constant 0.000000e+00 : f32
    %354 = vector.broadcast %cst_131 : f32 to vector<4x6xf32>
    %355 = arith.select %353, %354, %352 : vector<4x6xi1>, vector<4x6xf32>
    %cst_132 = arith.constant 5.000000e-01 : f32
    %356 = vector.broadcast %cst_132 : f32 to vector<4x1xf32>
    %357 = arith.cmpf ogt, %344, %356 : vector<4x1xf32>
    %cst_133 = arith.constant 0.000000e+00 : f32
    %358 = vector.shape_cast %357 : vector<4x1xi1> to vector<4x1xi1>
    %359 = vector.broadcast %358 : vector<4x1xi1> to vector<4x6xi1>
    %360 = vector.broadcast %cst_133 : f32 to vector<4x6xf32>
    %361 = arith.select %359, %355, %360 : vector<4x6xi1>, vector<4x6xf32>
    %cst_134 = arith.constant dense<0.000000e+00> : vector<4xf32>
    %362 = vector.multi_reduction <add>, %361, %cst_134 [1] : vector<4x6xf32> to vector<4xf32>
    %363 = vector.shape_cast %362 : vector<4xf32> to vector<4x1xf32>
    %cst_135 = arith.constant dense<0.000000e+00> : vector<1xf32>
    %364 = vector.multi_reduction <add>, %363, %cst_135 [0] : vector<4x1xf32> to vector<1xf32>
    %365 = vector.shape_cast %364 : vector<1xf32> to vector<1x1xf32>
    %c0_136 = arith.constant 0 : index
    %c0_137 = arith.constant 0 : index
    %c0_138 = arith.constant 0 : index
    %366 = vector.load %arg5[%c0_136, %c0_137, %c0_138] : memref<1x6x6xf32, #tpu.memory_space<vmem>>, vector<1x6x6xf32>
    %367 = vector.shape_cast %366 : vector<1x6x6xf32> to vector<6x6xf32>
    %cst_139 = arith.constant dense<0.000000e+00> : vector<6xf32>
    %368 = vector.multi_reduction <add>, %367, %cst_139 [1] : vector<6x6xf32> to vector<6xf32>
    %369 = vector.shape_cast %368 : vector<6xf32> to vector<6x1xf32>
    %cst_140 = arith.constant 5.000000e-01 : f32
    %370 = vector.broadcast %cst_140 : f32 to vector<6x6xf32>
    %371 = arith.cmpf ogt, %367, %370 : vector<6x6xf32>
    %cst_141 = arith.constant 1.000000e+00 : f32
    %372 = vector.broadcast %cst_141 : f32 to vector<6x6xf32>
    %373 = arith.subf %372, %340 : vector<6x6xf32>
    %374 = arith.select %371, %340, %373 : vector<6x6xi1>, vector<6x6xf32>
    %375 = math.log %374 : vector<6x6xf32>
    %cst_142 = arith.constant 0.000000e+00 : f32
    %376 = vector.broadcast %cst_142 : f32 to vector<6x6xf32>
    %377 = arith.subf %376, %375 : vector<6x6xf32>
    %378 = arith.cmpf one, %377, %377 : vector<6x6xf32>
    %cst_143 = arith.constant 0.000000e+00 : f32
    %379 = vector.broadcast %cst_143 : f32 to vector<6x6xf32>
    %380 = arith.select %378, %379, %377 : vector<6x6xi1>, vector<6x6xf32>
    %cst_144 = arith.constant 5.000000e-01 : f32
    %381 = vector.broadcast %cst_144 : f32 to vector<6x1xf32>
    %382 = arith.cmpf ogt, %369, %381 : vector<6x1xf32>
    %cst_145 = arith.constant 0.000000e+00 : f32
    %383 = vector.shape_cast %382 : vector<6x1xi1> to vector<6x1xi1>
    %384 = vector.broadcast %383 : vector<6x1xi1> to vector<6x6xi1>
    %385 = vector.broadcast %cst_145 : f32 to vector<6x6xf32>
    %386 = arith.select %384, %380, %385 : vector<6x6xi1>, vector<6x6xf32>
    %cst_146 = arith.constant dense<0.000000e+00> : vector<6xf32>
    %387 = vector.multi_reduction <add>, %386, %cst_146 [1] : vector<6x6xf32> to vector<6xf32>
    %388 = vector.shape_cast %387 : vector<6xf32> to vector<6x1xf32>
    %cst_147 = arith.constant dense<0.000000e+00> : vector<1xf32>
    %389 = vector.multi_reduction <add>, %388, %cst_147 [0] : vector<6x1xf32> to vector<1xf32>
    %390 = vector.shape_cast %389 : vector<1xf32> to vector<1x1xf32>
    %cst_148 = arith.constant 0.000000e+00 : f32
    %391 = vector.broadcast %cst_148 : f32 to vector<4x122xf32>
    %392 = tpu.concatenate %203, %391 in 1 : vector<4x6xf32>, vector<4x122xf32> -> vector<4x128xf32>
    %c0_149 = arith.constant 0 : index
    %c0_150 = arith.constant 0 : index
    %c0_151 = arith.constant 0 : index
    %393 = vector.load %arg18[%c0_149, %c0_150, %c0_151] : memref<1x4x128xf32, #tpu.memory_space<vmem>>, vector<1x4x128xf32>
    %394 = vector.shape_cast %393 : vector<1x4x128xf32> to vector<4x128xf32>
    %395 = vector.shape_cast %392 : vector<4x128xf32> to vector<1x4x128xf32>
    tpu.vector_store %arg18[%c0_149, %c0_150, %c0_151], %395 {strides = array<i32>} : memref<1x4x128xf32, #tpu.memory_space<vmem>>, vector<1x4x128xf32>,
    %cst_152 = arith.constant 0.000000e+00 : f32
    %396 = vector.broadcast %cst_152 : f32 to vector<6x122xf32>
    %397 = tpu.concatenate %340, %396 in 1 : vector<6x6xf32>, vector<6x122xf32> -> vector<6x128xf32>
    %c0_153 = arith.constant 0 : index
    %c0_154 = arith.constant 0 : index
    %c0_155 = arith.constant 0 : index
    %398 = vector.load %arg19[%c0_153, %c0_154, %c0_155] : memref<1x6x128xf32, #tpu.memory_space<vmem>>, vector<1x6x128xf32>
    %399 = vector.shape_cast %398 : vector<1x6x128xf32> to vector<6x128xf32>
    %400 = vector.shape_cast %397 : vector<6x128xf32> to vector<1x6x128xf32>
    tpu.vector_store %arg19[%c0_153, %c0_154, %c0_155], %400 {strides = array<i32>} : memref<1x6x128xf32, #tpu.memory_space<vmem>>, vector<1x6x128xf32>,
    %cst_156 = arith.constant 0.000000e+00 : f32
    %401 = vector.broadcast %cst_156 : f32 to vector<1x126xf32>
    %402 = tpu.concatenate %365, %390, %401 in 1 : vector<1x1xf32>, vector<1x1xf32>, vector<1x126xf32> -> vector<1x128xf32>
    %c0_157 = arith.constant 0 : index
    %c0_158 = arith.constant 0 : index
    %c0_159 = arith.constant 0 : index
    %403 = vector.load %arg20[%c0_157, %c0_158, %c0_159] : memref<1x1x128xf32, #tpu.memory_space<vmem>>, vector<1x1x128xf32>
    %404 = vector.shape_cast %403 : vector<1x1x128xf32> to vector<1x128xf32>
    %405 = vector.shape_cast %402 : vector<1x128xf32> to vector<1x1x128xf32>
    tpu.vector_store %arg20[%c0_157, %c0_158, %c0_159], %405 {strides = array<i32>} : memref<1x1x128xf32, #tpu.memory_space<vmem>>, vector<1x1x128xf32>,
    return
  }
  func.func @transform_0(%arg0: i32) -> (i32, i32, i32) {
    %c0_i32 = arith.constant 0 : i32
    %c0_i32_0 = arith.constant 0 : i32
    %c0_i32_1 = arith.constant 0 : i32
    return %arg0, %c0_i32, %c0_i32_0 : i32, i32, i32
  }
  func.func @transform_1(%arg0: i32) -> (i32, i32, i32) {
    %c0_i32 = arith.constant 0 : i32
    %c0_i32_0 = arith.constant 0 : i32
    %c0_i32_1 = arith.constant 0 : i32
    return %arg0, %c0_i32, %c0_i32_0 : i32, i32, i32
  }
  func.func @transform_2(%arg0: i32) -> (i32, i32, i32) {
    %c0_i32 = arith.constant 0 : i32
    %c0_i32_0 = arith.constant 0 : i32
    %c0_i32_1 = arith.constant 0 : i32
    return %arg0, %c0_i32, %c0_i32_0 : i32, i32, i32
  }
  func.func @transform_3(%arg0: i32) -> (i32, i32, i32) {
    %c0_i32 = arith.constant 0 : i32
    %c0_i32_0 = arith.constant 0 : i32
    %c0_i32_1 = arith.constant 0 : i32
    return %arg0, %c0_i32, %c0_i32_0 : i32, i32, i32
  }
  func.func @transform_4(%arg0: i32) -> (i32, i32, i32) {
    %c0_i32 = arith.constant 0 : i32
    %c0_i32_0 = arith.constant 0 : i32
    %c0_i32_1 = arith.constant 0 : i32
    return %arg0, %c0_i32, %c0_i32_0 : i32, i32, i32
  }
  func.func @transform_5(%arg0: i32) -> (i32, i32) {
    %c0_i32 = arith.constant 0 : i32
    %c0_i32_0 = arith.constant 0 : i32
    %c0_i32_1 = arith.constant 0 : i32
    return %c0_i32, %c0_i32_0 : i32, i32
  }
  func.func @transform_6(%arg0: i32) -> (i32, i32) {
    %c0_i32 = arith.constant 0 : i32
    %c0_i32_0 = arith.constant 0 : i32
    %c0_i32_1 = arith.constant 0 : i32
    return %c0_i32, %c0_i32_0 : i32, i32
  }
  func.func @transform_7(%arg0: i32) -> (i32, i32) {
    %c0_i32 = arith.constant 0 : i32
    %c0_i32_0 = arith.constant 0 : i32
    %c0_i32_1 = arith.constant 0 : i32
    return %c0_i32, %c0_i32_0 : i32, i32
  }
  func.func @transform_8(%arg0: i32) -> (i32, i32) {
    %c0_i32 = arith.constant 0 : i32
    %c0_i32_0 = arith.constant 0 : i32
    %c0_i32_1 = arith.constant 0 : i32
    return %c0_i32, %c0_i32_0 : i32, i32
  }
  func.func @transform_9(%arg0: i32) -> (i32, i32) {
    %c0_i32 = arith.constant 0 : i32
    %c0_i32_0 = arith.constant 0 : i32
    %c0_i32_1 = arith.constant 0 : i32
    return %c0_i32, %c0_i32_0 : i32, i32
  }
  func.func @transform_10(%arg0: i32) -> (i32, i32) {
    %c0_i32 = arith.constant 0 : i32
    %c0_i32_0 = arith.constant 0 : i32
    %c0_i32_1 = arith.constant 0 : i32
    return %c0_i32, %c0_i32_0 : i32, i32
  }
  func.func @transform_11(%arg0: i32) -> (i32, i32) {
    %c0_i32 = arith.constant 0 : i32
    %c0_i32_0 = arith.constant 0 : i32
    %c0_i32_1 = arith.constant 0 : i32
    return %c0_i32, %c0_i32_0 : i32, i32
  }
  func.func @transform_12(%arg0: i32) -> (i32, i32) {
    %c0_i32 = arith.constant 0 : i32
    %c0_i32_0 = arith.constant 0 : i32
    %c0_i32_1 = arith.constant 0 : i32
    return %c0_i32, %c0_i32_0 : i32, i32
  }
  func.func @transform_13(%arg0: i32) -> (i32, i32) {
    %c0_i32 = arith.constant 0 : i32
    %c0_i32_0 = arith.constant 0 : i32
    %c0_i32_1 = arith.constant 0 : i32
    return %c0_i32, %c0_i32_0 : i32, i32
  }
  func.func @transform_14(%arg0: i32) -> (i32, i32) {
    %c0_i32 = arith.constant 0 : i32
    %c0_i32_0 = arith.constant 0 : i32
    %c0_i32_1 = arith.constant 0 : i32
    return %c0_i32, %c0_i32_0 : i32, i32
  }
  func.func @transform_15(%arg0: i32) -> (i32, i32) {
    %c0_i32 = arith.constant 0 : i32
    %c0_i32_0 = arith.constant 0 : i32
    %c0_i32_1 = arith.constant 0 : i32
    return %c0_i32, %c0_i32_0 : i32, i32
  }
  func.func @transform_16(%arg0: i32) -> (i32, i32) {
    %c0_i32 = arith.constant 0 : i32
    %c0_i32_0 = arith.constant 0 : i32
    %c0_i32_1 = arith.constant 0 : i32
    return %c0_i32, %c0_i32_0 : i32, i32
  }
  func.func @transform_17(%arg0: i32) -> (i32, i32, i32) {
    %c0_i32 = arith.constant 0 : i32
    %c0_i32_0 = arith.constant 0 : i32
    %c0_i32_1 = arith.constant 0 : i32
    return %arg0, %c0_i32, %c0_i32_0 : i32, i32, i32
  }
  func.func @transform_18(%arg0: i32) -> (i32, i32, i32) {
    %c0_i32 = arith.constant 0 : i32
    %c0_i32_0 = arith.constant 0 : i32
    %c0_i32_1 = arith.constant 0 : i32
    return %arg0, %c0_i32, %c0_i32_0 : i32, i32, i32
  }
  func.func @transform_19(%arg0: i32) -> (i32, i32, i32) {
    %c0_i32 = arith.constant 0 : i32
    %c0_i32_0 = arith.constant 0 : i32
    %c0_i32_1 = arith.constant 0 : i32
    return %arg0, %c0_i32, %c0_i32_0 : i32, i32, i32
  }
}

</mosaic_0001>

<bundles_post_ra>
// kernel: device_forward.2
= control target key start
LH: loop header
LB: loop body
LE: loop exit
PB: predicated region body
PF: predicated region fallthrough
CT: control target
= control target key end

     0   :  { %v744_v8 = vmov 0.0   ;;  %vm44_vm0 = vcmask 261120   ;;  %vm109_vm9 = vcmask 130048   ;;  %s967_s3 = inlined_call_operand.vmem [shape: f32[16,48], index: 3, kind: input, shape index: {}]   ;;  %s968_s2 = inlined_call_operand.vmem [shape: f32[32,48], index: 2, kind: input, shape index: {}]   ;;  %s969_s7 = inlined_call_operand.vmem [shape: f32[16,48], index: 7, kind: input, shape index: {}]   ;;  %s970_s6 = inlined_call_operand.vmem [shape: f32[32,48], index: 6, kind: input, shape index: {}]   ;;  %s971_s0 = inlined_call_operand.vmem [shape: f32[8,32], index: 0, kind: input, shape index: {}]   ;;  %s972_s4 = inlined_call_operand.vmem [shape: f32[1,48], index: 4, kind: input, shape index: {}]   ;;  %s973_s5 = inlined_call_operand.vmem [shape: f32[1,48], index: 5, kind: input, shape index: {}]   ;;  %s974_s1 = inlined_call_operand.vmem [shape: f32[8,32], index: 1, kind: input, shape index: {}]   ;;  %s975_s9 = inlined_call_operand.vmem [shape: f32[1,48], index: 9, kind: input, shape index: {}]   ;;  %s976_s8 = inlined_call_operand.vmem [shape: f32[1,48], index: 8, kind: input, shape index: {}]   ;;  %s977_s10 = inlined_call_operand.vmem [shape: f32[8,32], index: 10, kind: output, shape index: {}]  }
   0x1   :  { %v101_v0 = vld [vmem:[%s967_s3 + $0x8] sm:$0xff]  ;;  %v39_v1 = vld [vmem:[%s968_s2 + $0x18] sm:$0xff]  ;;  %v100_v2 = vld [vmem:[%s967_s3] sm:$0xff] }
   0x2   :  { %127 = vmatpush.msra.mxu2 %v101_v0  ;;  %60 = vmatpush.msra.mxu0 %v39_v1  ;;  %v38_v3 = vld [vmem:[%s968_s2 + $0x10] sm:$0xff]  ;;  %v37_v4 = vld [vmem:[%s968_s2 + $0x8] sm:$0xff]  ;;  %v103_v6 = vld [vmem:[%s969_s7] sm:$0xff] }
   0x3   :  { %v104_v5 = vld [vmem:[%s969_s7 + $0x8] sm:$0xff]  ;;  %v72_v7 = vld [vmem:[%s970_s6 + $0x18] sm:$0xff]  ;;  %v36_v9 = vld [vmem:[%s968_s2] sm:$0xff] }
   0x4   :  { %128 = vmatpush.msra.mxu2 %v100_v2  ;;  %61 = vmatpush.msra.mxu0 %v38_v3  ;;  %v35_v10 = vld [vmem:[%s971_s0] sm:$0xff]  ;;  %v71_v11 = vld [vmem:[%s970_s6 + $0x10] sm:$0xff]  ;;  %v70_v12 = vld [vmem:[%s970_s6 + $0x8] sm:$0xff] }
   0x5   :  { %129 = vmatmul.f32.vlgmr.msra.gmra.mxu2 %v744_v8  ;;  %189 = vmatpush.msra.mxu3 %v104_v5  ;;  %v69_v13 = vld [vmem:[%s970_s6] sm:$0xff] }
   0x6   :  { %62 = vmatpush.msra.mxu0 %v37_v4  ;;  %92 = vmatpush.msra.mxu1 %v72_v7  ;;  %v68_v14 = vld [vmem:[%s974_s1] sm:$0xff]  ;;  %s745_s1 = smov 96  }
   0x7   :  { %190 = vmatpush.msra.mxu3 %v103_v6  ;;  %255 = vmatpush.msrb.mxu2 %v101_v0  ;;  %v850_v15 = vld [vmem:[%s973_s5] ss:$0 sm:$0xff] }
   0x8   :  { %63 = vmatpush.msra.mxu0 %v36_v9  ;;  %191 = vmatmul.f32.vlgmr.msra.gmra.mxu3 %v744_v8  ;;  %v857_v18 = vld [vmem:[%s975_s9] ss:$0 sm:$0xff] }
   0x9   :  { %672 = vmatmul.msk.f32.vlgmr.msra.gmra.mxu0 %vm44_vm0, %v35_v10  ;;  %93 = vmatpush.msra.mxu1 %v71_v11  ;;  %v692_v21 = vld [vmem:[%s972_s4] ss:$0 sm:$0xff]  ;;  %s746_s4 = smov 32  }
   0xa   :  { %256 = vmatpush.msrb.mxu2 %v100_v2  ;;  %323 = vmatpush.msrb.mxu3 %v104_v5  ;;  %v695_v25 = vld [vmem:[%s976_s8] ss:$0 sm:$0xff]  ;;  %s747_s8 = smov 112  }
   0xb   :  { %94 = vmatpush.msra.mxu1 %v70_v12  ;;  %396 = vmatpush.msrb.mxu0 %v101_v0 }
   0xc   :  { %324 = vmatpush.msrb.mxu3 %v103_v6  ;;  %538 = vmatpush.msra.mxu2 %v101_v0 }
   0xd   :  { %95 = vmatpush.msra.mxu1 %v69_v13  ;;  %397 = vmatpush.msrb.mxu0 %v100_v2 }
   0xe   :  { %673 = vmatmul.msk.f32.vlgmr.msra.gmra.mxu1 %vm44_vm0, %v68_v14  ;;  %539 = vmatpush.msra.mxu2 %v100_v2 }
   0xf   :  { %465 = vmatpush.msrb.mxu1 %v104_v5  ;;  %607 = vmatpush.msra.mxu3 %v104_v5 }
  0x11   :  { %466 = vmatpush.msrb.mxu1 %v103_v6  ;;  %608 = vmatpush.msra.mxu3 %v103_v6 }
  0x86   :  { %v65_v22 = vpop.f32.mrf.mxu0 }
  0x87   :  { %v864_v23 = vadd.f32 %v692_v21, %v65_v22 }
  0x88   :  { %v130_v16 = vpop.f32.mrf.mxu2 }
  0x89   :  { %v131_v17 = vadd.f32 %v850_v15, %v130_v16 }
  0x8b   :  { %154 = vrot.lane.b32.xlu0 %v131_v17, %s745_s1  ;;  %v192_v19 = vpop.f32.mrf.mxu3  ;;  %v133_v24 = vadd.f32 %v131_v17, %v864_v23  ;;  %v97_v26 = vpop.f32.mrf.mxu1 }
  0x8c   :  { %v193_v20 = vadd.f32 %v857_v18, %v192_v19  ;;  %v870_v28 = vadd.f32 %v695_v25, %v97_v26 }
  0x8d   :  { %v674_v27 = vmul.f32 -1.442695, %v133_v24 }
  0x8e   :  { %v195_v29 = vadd.f32 %v193_v20, %v870_v28 }
  0x8f   :  { %696 = vpow2.f32 %v674_v27 }
  0x90   :  { %v675_v30 = vmul.f32 -1.442695, %v195_v29 }
  0x92   :  { %698 = vpow2.f32 %v675_v30 }
  0x93   :  { %216 = vrot.lane.b32.xlu0 %v193_v20, %s745_s1 }
  0x95   :  { %v697_v31 = vpop.eup %696 }
  0x96   :  { %v137_v32 = vadd.f32 1.0, %v697_v31 }
  0x98   :  { %700 = vrcp.f32 %v137_v32  ;;  %v699_v33 = vpop.eup %698  ;;  %v149_v43 = vand.u32 2147483648, %v137_v32  ;;  %vm143_vm2 = vweird.f32 %v137_v32  ;;  %v147_v44 = vand.u32 2147483647, %v137_v32 }
  0x99   :  { %v199_v34 = vadd.f32 1.0, %v699_v33 }
  0x9a   :  { %v150_v47 = vor.u32 1.1754944e-38, %v149_v43  ;;  %vm148_vm4 = vcmp.eq.f32.partialorder %v147_v44, 8.507059e+37 }
  0x9b   :  { %702 = vrcp.f32 %v199_v34  ;;  %vm205_vm5 = vweird.f32 %v199_v34  ;;  %v211_v50 = vand.u32 2147483648, %v199_v34  ;;  %v209_v53 = vand.u32 2147483647, %v199_v34 }
  0x9d   :  { %v212_v54 = vor.u32 1.1754944e-38, %v211_v50  ;;  %vm210_vm8 = vcmp.eq.f32.partialorder %v209_v53, 8.507059e+37 }
  0x9e   :  { %v701_v35 = vpop.eup %700 }
  0x9f   :  { %v139_v36 = vmul.f32 %v701_v35, %v137_v32  ;;  %vm144_vm1 = vweird.f32 %v701_v35 }
  0xa0   :  { %vm145_vm3 = vmor %vm143_vm2, %vm144_vm1 }
  0xa1   :  { %v140_v37 = vsub.f32 1.0, %v139_v36  ;;  %v703_v38 = vpop.eup %702 }
  0xa2   :  { %v201_v40 = vmul.f32 %v703_v38, %v199_v34  ;;  %vm206_vm6 = vweird.f32 %v703_v38 }
  0xa3   :  { %v141_v39 = vmul.f32 %v701_v35, %v140_v37  ;;  %vm207_vm7 = vmor %vm205_vm5, %vm206_vm6 }
  0xa4   :  { %v202_v42 = vsub.f32 1.0, %v201_v40 }
  0xa5   :  { %v142_v41 = vadd.f32 %v701_v35, %v141_v39 }
  0xa6   :  { %v203_v46 = vmul.f32 %v703_v38, %v202_v42 }
  0xa7   :  { %v146_v45 = vsel %vm145_vm3, %v701_v35, %v142_v41 }
  0xa8   :  { %v151_v49 = vsel %vm148_vm4, %v150_v47, %v146_v45  ;;  %v204_v52 = vadd.f32 %v703_v38, %v203_v46 }
  0xa9   :  { %v164_v1 = vsub.f32 1.0, %v151_v49  ;;  %v170_v3 = vmul.f32 0.0, %v151_v49 }
  0xaa   :  { %v208_v55 = vsel %vm207_vm7, %v703_v38, %v204_v52 }
  0xab   :  { %v213_v57 = vsel %vm210_vm8, %v212_v54, %v208_v55 }
  0xac   :  { %v226_v6 = vsub.f32 1.0, %v213_v57  ;;  %v232_v8 = vmul.f32 0.0, %v213_v57 }
  0xfd   :  { %v155_v48 = vpop.permute.xlu0 %154 }
  0xfe   :  { %v157_v51 = vmul.f32 %v155_v48, %v151_v49 }
 0x100   :  { %159 = vrot.lane.b32.xlu1 %v157_v51, %s746_s4 }
 0x105   :  { %v217_v56 = vpop.permute.xlu0 %216 }
 0x106   :  { %v219_v58 = vmul.f32 %v217_v56, %v213_v57 }
 0x108   :  { %221 = vrot.lane.b32.xlu1 %v219_v58, %s746_s4 }
 0x172   :  { %v160_v59 = vpop.permute.xlu1 %159 }
 0x173   :  { %v162_v60 = vadd.f32 %v160_v59, %v864_v23 }
 0x175   :  { %704 = vtanh.f32 %v162_v60 }
 0x17a   :  { %v222_v61 = vpop.permute.xlu1 %221 }
 0x17b   :  { %v705_v62 = vpop.eup %704  ;;  %v224_v63 = vadd.f32 %v222_v61, %v870_v28 }
 0x17c   :  { %166 = vrot.lane.b32.xlu2 %v705_v62, %s747_s8 }
 0x17d   :  { %706 = vtanh.f32 %v224_v63 }
 0x183   :  { %v707_v0 = vpop.eup %706 }
 0x184   :  { %228 = vrot.lane.b32.xlu2 %v707_v0, %s747_s8 }
 0x1d6   :  { %v167_v2 = vpop.permute.xlu2 %166 }
 0x1d7   :  { %v169_v4 = vmul.f32 %v167_v2, %v164_v1 }
 0x1d9   :  { %v171_v5 = vadd.f32 %v170_v3, %v169_v4 }
 0x1db   :  { %235 = vrot.lane.b32.xlu0 %v171_v5, %s747_s8  ;;  %v300_v35 = vrot.slane %v171_v5, 6 }
 0x1de   :  { %v229_v7 = vpop.permute.xlu2 %228 }
 0x1df   :  { %v231_v9 = vmul.f32 %v229_v7, %v226_v6 }
 0x1e1   :  { %v880_v10 = vadd.f32 %v232_v8, %v231_v9 }
 0x1e3   :  { %305 = vrot.lane.b32.xlu1 %v880_v10, %s747_s8  ;;  %v368_v5 = vrot.slane %v880_v10, 6 }
 0x24d   :  { %v884_v11 = vpop.permute.xlu0 %235 }
 0x24e   :  { %676 = vmatmul.msk.f32.vlgmr.msrb.gmra.mxu2 %vm109_vm9, %v884_v11 }
 0x255   :  { %v306_v12 = vpop.permute.xlu1 %305 }
 0x256   :  { %678 = vmatmul.msk.f32.vlgmr.msrb.gmra.mxu3 %vm109_vm9, %v306_v12 }
 0x2d1   :  { %v258_v13 = vpop.f32.mrf.mxu2 }
 0x2d2   :  { %v259_v14 = vadd.f32 %v850_v15, %v258_v13 }
 0x2d4   :  { %v262_v16 = vrot.slane %v259_v14, 6 }
 0x2d6   :  { %v264_v17 = vadd.f32 %v262_v16, %v864_v23  ;;  %284 = vrot.lane.b32.xlu2 %v262_v16, %s745_s1 }
 0x2d8   :  { %v677_v19 = vmul.f32 -1.442695, %v264_v17 }
 0x2d9   :  { %v326_v20 = vpop.f32.mrf.mxu3 }
 0x2da   :  { %708 = vpow2.f32 %v677_v19  ;;  %v327_v21 = vadd.f32 %v857_v18, %v326_v20 }
 0x2dc   :  { %v330_v22 = vrot.slane %v327_v21, 6 }
 0x2de   :  { %352 = vrot.lane.b32.xlu0 %v330_v22, %s745_s1  ;;  %v332_v39 = vadd.f32 %v330_v22, %v870_v28 }
 0x2e0   :  { %v709_v24 = vpop.eup %708  ;;  %v679_v40 = vmul.f32 -1.442695, %v332_v39 }
 0x2e1   :  { %v268_v25 = vadd.f32 1.0, %v709_v24 }
 0x2e3   :  { %710 = vrcp.f32 %v268_v25  ;;  %v280_v30 = vand.u32 2147483648, %v268_v25  ;;  %v278_v32 = vand.u32 2147483647, %v268_v25  ;;  %vm274_vm11 = vweird.f32 %v268_v25 }
 0x2e4   :  { %712 = vpow2.f32 %v679_v40 }
 0x2e5   :  { %v281_v34 = vor.u32 1.1754944e-38, %v280_v30  ;;  %vm279_vm13 = vcmp.eq.f32.partialorder %v278_v32, 8.507059e+37 }
 0x2e9   :  { %v711_v26 = vpop.eup %710 }
 0x2ea   :  { %v270_v27 = vmul.f32 %v711_v26, %v268_v25  ;;  %vm275_vm10 = vweird.f32 %v711_v26  ;;  %v713_v41 = vpop.eup %712 }
 0x2eb   :  { %vm276_vm12 = vmor %vm274_vm11, %vm275_vm10  ;;  %v336_v42 = vadd.f32 1.0, %v713_v41 }
 0x2ec   :  { %v271_v29 = vsub.f32 1.0, %v270_v27 }
 0x2ed   :  { %714 = vrcp.f32 %v336_v42  ;;  %v348_v50 = vand.u32 2147483648, %v336_v42  ;;  %vm342_vm15 = vweird.f32 %v336_v42  ;;  %v346_v51 = vand.u32 2147483647, %v336_v42 }
 0x2ee   :  { %v272_v31 = vmul.f32 %v711_v26, %v271_v29 }
 0x2ef   :  { %v349_v53 = vor.u32 1.1754944e-38, %v348_v50  ;;  %vm347_vm2 = vcmp.eq.f32.partialorder %v346_v51, 8.507059e+37 }
 0x2f0   :  { %v273_v33 = vadd.f32 %v711_v26, %v272_v31 }
 0x2f2   :  { %v277_v36 = vsel %vm276_vm12, %v711_v26, %v273_v33 }
 0x2f3   :  { %v282_v37 = vsel %vm279_vm13, %v281_v34, %v277_v36  ;;  %v715_v45 = vpop.eup %714 }
 0x2f4   :  { %v302_v38 = vmul.f32 %v300_v35, %v282_v37  ;;  %v338_v46 = vmul.f32 %v715_v45, %v336_v42  ;;  %vm343_vm14 = vweird.f32 %v715_v45  ;;  %v294_v63 = vsub.f32 1.0, %v282_v37 }
 0x2f5   :  { %vm344_vm1 = vmor %vm342_vm15, %vm343_vm14 }
 0x2f6   :  { %v339_v47 = vsub.f32 1.0, %v338_v46 }
 0x2f8   :  { %v340_v48 = vmul.f32 %v715_v45, %v339_v47 }
 0x2fa   :  { %v341_v49 = vadd.f32 %v715_v45, %v340_v48 }
 0x2fc   :  { %v345_v52 = vsel %vm344_vm1, %v715_v45, %v341_v49 }
 0x2fd   :  { %v350_v55 = vsel %vm347_vm2, %v349_v53, %v345_v52 }
 0x2fe   :  { %v362_v4 = vsub.f32 1.0, %v350_v55  ;;  %v370_v7 = vmul.f32 %v368_v5, %v350_v55 }
 0x330   :  { %v285_v43 = vpop.permute.xlu2 %284 }
 0x331   :  { %v287_v44 = vmul.f32 %v285_v43, %v282_v37 }
 0x333   :  { %289 = vrot.lane.b32.xlu1 %v287_v44, %s746_s4 }
 0x350   :  { %v353_v54 = vpop.permute.xlu0 %352 }
 0x351   :  { %v355_v56 = vmul.f32 %v353_v54, %v350_v55 }
 0x353   :  { %357 = vrot.lane.b32.xlu2 %v355_v56, %s746_s4 }
 0x3a5   :  { %v290_v57 = vpop.permute.xlu1 %289 }
 0x3a6   :  { %v292_v58 = vadd.f32 %v290_v57, %v864_v23 }
 0x3a8   :  { %716 = vtanh.f32 %v292_v58 }
 0x3ad   :  { %v358_v59 = vpop.permute.xlu2 %357 }
 0x3ae   :  { %v717_v60 = vpop.eup %716  ;;  %v360_v61 = vadd.f32 %v358_v59, %v870_v28 }
 0x3af   :  { %296 = vrot.lane.b32.xlu0 %v717_v60, %s747_s8 }
 0x3b0   :  { %718 = vtanh.f32 %v360_v61 }
 0x3b6   :  { %v719_v62 = vpop.eup %718 }
 0x3b7   :  { %364 = vrot.lane.b32.xlu1 %v719_v62, %s747_s8 }
 0x421   :  { %v297_v0 = vpop.permute.xlu0 %296 }
 0x422   :  { %v299_v1 = vmul.f32 %v297_v0, %v294_v63 }
 0x424   :  { %v901_v2 = vadd.f32 %v302_v38, %v299_v1 }
 0x426   :  { %v377_v3 = vrot.slane %v901_v2, 2  ;;  %v441_v0 = vrot.slane %v901_v2, 6 }
 0x428   :  { %378 = vrot.lane.b32.xlu2 %v377_v3, %s747_s8 }
 0x429   :  { %v365_v6 = vpop.permute.xlu1 %364 }
 0x42a   :  { %v367_v8 = vmul.f32 %v365_v6, %v362_v4 }
 0x42c   :  { %v906_v9 = vadd.f32 %v370_v7, %v367_v8 }
 0x42e   :  { %v446_v12 = vrot.slane %v906_v9, 2  ;;  %v510_v8 = vrot.slane %v906_v9, 6 }
 0x430   :  { %447 = vrot.lane.b32.xlu0 %v446_v12, %s747_s8 }
 0x482   :  { %v379_v13 = vpop.permute.xlu2 %378 }
 0x483   :  { %680 = vmatmul.msk.f32.vlgmr.msrb.gmra.mxu0 %vm109_vm9, %v379_v13 }
 0x4a2   :  { %v448_v14 = vpop.permute.xlu0 %447 }
 0x4a3   :  { %682 = vmatmul.msk.f32.vlgmr.msrb.gmra.mxu1 %vm109_vm9, %v448_v14 }
 0x500   :  { %v399_v16 = vpop.f32.mrf.mxu0 }
 0x501   :  { %v400_v17 = vadd.f32 %v850_v15, %v399_v16 }
 0x503   :  { %v403_v19 = vrot.slane %v400_v17, 4 }
 0x505   :  { %425 = vrot.lane.b32.xlu1 %v403_v19, %s745_s1  ;;  %v405_v24 = vadd.f32 %v403_v19, %v864_v23 }
 0x507   :  { %v681_v25 = vmul.f32 -1.442695, %v405_v24 }
 0x509   :  { %720 = vpow2.f32 %v681_v25 }
 0x50f   :  { %v721_v29 = vpop.eup %720 }
 0x510   :  { %v409_v30 = vadd.f32 1.0, %v721_v29 }
 0x512   :  { %v421_v41 = vand.u32 2147483648, %v409_v30  ;;  %vm415_vm4 = vweird.f32 %v409_v30  ;;  %v419_v42 = vand.u32 2147483647, %v409_v30 }
 0x514   :  { %v422_v45 = vor.u32 1.1754944e-38, %v421_v41  ;;  %vm420_vm6 = vcmp.eq.f32.partialorder %v419_v42, 8.507059e+37 }
 0x520   :  { %v468_v20 = vpop.f32.mrf.mxu1 }
 0x521   :  { %v469_v21 = vadd.f32 %v857_v18, %v468_v20 }
 0x523   :  { %v472_v22 = vrot.slane %v469_v21, 4 }
 0x525   :  { %494 = vrot.lane.b32.xlu2 %v472_v22, %s745_s1  ;;  %v474_v26 = vadd.f32 %v472_v22, %v870_v28 }
 0x527   :  { %v683_v27 = vmul.f32 -1.442695, %v474_v26 }
 0x529   :  { %722 = vpow2.f32 %v683_v27 }
 0x52a   :  { %724 = vrcp.f32 %v409_v30 }
 0x52f   :  { %v723_v31 = vpop.eup %722 }
 0x530   :  { %v478_v32 = vadd.f32 1.0, %v723_v31  ;;  %v725_v33 = vpop.eup %724 }
 0x531   :  { %v411_v34 = vmul.f32 %v725_v33, %v409_v30  ;;  %vm416_vm3 = vweird.f32 %v725_v33 }
 0x532   :  { %726 = vrcp.f32 %v478_v32  ;;  %vm417_vm5 = vmor %vm415_vm4, %vm416_vm3  ;;  %v490_v50 = vand.u32 2147483648, %v478_v32  ;;  %vm484_vm8 = vweird.f32 %v478_v32  ;;  %v488_v51 = vand.u32 2147483647, %v478_v32 }
 0x533   :  { %v412_v35 = vsub.f32 1.0, %v411_v34 }
 0x534   :  { %v491_v53 = vor.u32 1.1754944e-38, %v490_v50  ;;  %vm489_vm11 = vcmp.eq.f32.partialorder %v488_v51, 8.507059e+37 }
 0x535   :  { %v413_v37 = vmul.f32 %v725_v33, %v412_v35 }
 0x537   :  { %v414_v39 = vadd.f32 %v725_v33, %v413_v37 }
 0x538   :  { %v727_v36 = vpop.eup %726 }
 0x539   :  { %v480_v38 = vmul.f32 %v727_v36, %v478_v32  ;;  %v418_v43 = vsel %vm417_vm5, %v725_v33, %v414_v39  ;;  %vm485_vm7 = vweird.f32 %v727_v36  ;;  %vm661_vm5 = vcmask 1041408  }
 0x53a   :  { %v423_v47 = vsel %vm420_vm6, %v422_v45, %v418_v43  ;;  %vm486_vm10 = vmor %vm484_vm8, %vm485_vm7  ;;  %vm663_vm6 = vcmask 1043456   ;;  %vm665_vm7 = vcmask 1045504  }
 0x53b   :  { %v481_v40 = vsub.f32 1.0, %v480_v38  ;;  %v435_v63 = vsub.f32 1.0, %v423_v47  ;;  %v443_v3 = vmul.f32 %v441_v0, %v423_v47 }
 0x53d   :  { %v482_v44 = vmul.f32 %v727_v36, %v481_v40 }
 0x53f   :  { %v483_v49 = vadd.f32 %v727_v36, %v482_v44 }
 0x541   :  { %v487_v52 = vsel %vm486_vm10, %v727_v36, %v483_v49 }
 0x542   :  { %v492_v54 = vsel %vm489_vm11, %v491_v53, %v487_v52 }
 0x543   :  { %v504_v7 = vsub.f32 1.0, %v492_v54  ;;  %v512_v13 = vmul.f32 %v510_v8, %v492_v54 }
 0x577   :  { %v426_v46 = vpop.permute.xlu1 %425 }
 0x578   :  { %v428_v48 = vmul.f32 %v426_v46, %v423_v47 }
 0x57a   :  { %430 = vrot.lane.b32.xlu0 %v428_v48, %s746_s4 }
 0x57f   :  { %v495_v55 = vpop.permute.xlu2 %494 }
 0x580   :  { %v497_v56 = vmul.f32 %v495_v55, %v492_v54 }
 0x582   :  { %499 = vrot.lane.b32.xlu1 %v497_v56, %s746_s4 }
 0x5ec   :  { %v431_v57 = vpop.permute.xlu0 %430 }
 0x5ed   :  { %v433_v58 = vadd.f32 %v431_v57, %v864_v23 }
 0x5ef   :  { %728 = vtanh.f32 %v433_v58 }
 0x5f4   :  { %v500_v59 = vpop.permute.xlu1 %499 }
 0x5f5   :  { %v729_v60 = vpop.eup %728  ;;  %v502_v61 = vadd.f32 %v500_v59, %v870_v28 }
 0x5f6   :  { %437 = vrot.lane.b32.xlu2 %v729_v60, %s747_s8 }
 0x5f7   :  { %730 = vtanh.f32 %v502_v61 }
 0x5fd   :  { %v731_v62 = vpop.eup %730 }
 0x5fe   :  { %506 = vrot.lane.b32.xlu0 %v731_v62, %s747_s8 }
 0x650   :  { %v438_v1 = vpop.permute.xlu2 %437 }
 0x651   :  { %v440_v4 = vmul.f32 %v438_v1, %v435_v63 }
 0x653   :  { %v925_v5 = vadd.f32 %v443_v3, %v440_v4 }
 0x655   :  { %v519_v6 = vrot.slane %v925_v5, 4 }
 0x657   :  { %520 = vrot.lane.b32.xlu1 %v519_v6, %s747_s8 }
 0x670   :  { %v507_v12 = vpop.permute.xlu0 %506 }
 0x671   :  { %v509_v14 = vmul.f32 %v507_v12, %v504_v7 }
 0x673   :  { %v930_v16 = vadd.f32 %v512_v13, %v509_v14 }
 0x675   :  { %v588_v17 = vrot.slane %v930_v16, 4  ;;  %v652_v14 = vrot.slane %v930_v16, 6 }
 0x677   :  { %589 = vrot.lane.b32.xlu2 %v588_v17, %s747_s8 }
 0x6c9   :  { %v521_v19 = vpop.permute.xlu1 %520 }
 0x6ca   :  { %684 = vmatmul.msk.f32.vlgmr.msra.gmra.mxu2 %vm109_vm9, %v521_v19 }
 0x6d1   :  { %v590_v20 = vpop.permute.xlu2 %589 }
 0x6d2   :  { %686 = vmatmul.msk.f32.vlgmr.msra.gmra.mxu3 %vm109_vm9, %v590_v20  ;;  %v238_v20 = vsel %vm109_vm9, %v884_v11, %v880_v10 }
 0x74d   :  { %v541_v21 = vpop.f32.mrf.mxu2 }
 0x74e   :  { %v542_v22 = vadd.f32 %v850_v15, %v541_v21 }
 0x750   :  { %v545_v24 = vrot.slane %v542_v22, 2 }
 0x752   :  { %567 = vrot.lane.b32.xlu0 %v545_v24, %s745_s1  ;;  %v547_v29 = vadd.f32 %v545_v24, %v864_v23 }
 0x754   :  { %v685_v30 = vmul.f32 -1.442695, %v547_v29 }
 0x755   :  { %v610_v25 = vpop.f32.mrf.mxu3 }
 0x756   :  { %v611_v26 = vadd.f32 %v857_v18, %v610_v25  ;;  %732 = vpow2.f32 %v685_v30 }
 0x758   :  { %v614_v27 = vrot.slane %v611_v26, 2 }
 0x75a   :  { %636 = vrot.lane.b32.xlu1 %v614_v27, %s745_s1  ;;  %v616_v31 = vadd.f32 %v614_v27, %v870_v28 }
 0x75c   :  { %v687_v32 = vmul.f32 -1.442695, %v616_v31  ;;  %v733_v33 = vpop.eup %732 }
 0x75d   :  { %v551_v34 = vadd.f32 1.0, %v733_v33 }
 0x75e   :  { %734 = vpow2.f32 %v687_v32 }
 0x75f   :  { %736 = vrcp.f32 %v551_v34  ;;  %v563_v43 = vand.u32 2147483648, %v551_v34  ;;  %vm557_vm13 = vweird.f32 %v551_v34  ;;  %v561_v44 = vand.u32 2147483647, %v551_v34 }
 0x761   :  { %v564_v47 = vor.u32 1.1754944e-38, %v563_v43  ;;  %vm562_vm15 = vcmp.eq.f32.partialorder %v561_v44, 8.507059e+37 }
 0x764   :  { %v735_v15 = vpop.eup %734 }
 0x765   :  { %v620_v35 = vadd.f32 1.0, %v735_v15  ;;  %v737_v36 = vpop.eup %736 }
 0x766   :  { %v553_v37 = vmul.f32 %v737_v36, %v551_v34  ;;  %vm558_vm12 = vweird.f32 %v737_v36 }
 0x767   :  { %738 = vrcp.f32 %v620_v35  ;;  %vm559_vm14 = vmor %vm557_vm13, %vm558_vm12  ;;  %v632_v52 = vand.u32 2147483648, %v620_v35  ;;  %vm626_vm2 = vweird.f32 %v620_v35  ;;  %v630_v53 = vand.u32 2147483647, %v620_v35 }
 0x768   :  { %v554_v18 = vsub.f32 1.0, %v553_v37 }
 0x769   :  { %v633_v55 = vor.u32 1.1754944e-38, %v632_v52  ;;  %vm631_vm4 = vcmp.eq.f32.partialorder %v630_v53, 8.507059e+37 }
 0x76a   :  { %v555_v39 = vmul.f32 %v737_v36, %v554_v18 }
 0x76c   :  { %v556_v41 = vadd.f32 %v737_v36, %v555_v39 }
 0x76d   :  { %v739_v38 = vpop.eup %738 }
 0x76e   :  { %v622_v40 = vmul.f32 %v739_v38, %v620_v35  ;;  %v560_v45 = vsel %vm559_vm14, %v737_v36, %v556_v41  ;;  %vm627_vm1 = vweird.f32 %v739_v38 }
 0x76f   :  { %v565_v49 = vsel %vm562_vm15, %v564_v47, %v560_v45  ;;  %vm628_vm3 = vmor %vm626_vm2, %vm627_vm1 }
 0x770   :  { %v623_v42 = vsub.f32 1.0, %v622_v40  ;;  %v577_v1 = vsub.f32 1.0, %v565_v49 }
 0x772   :  { %v624_v46 = vmul.f32 %v739_v38, %v623_v42 }
 0x774   :  { %v625_v51 = vadd.f32 %v739_v38, %v624_v46 }
 0x776   :  { %v629_v54 = vsel %vm628_vm3, %v739_v38, %v625_v51 }
 0x777   :  { %v634_v57 = vsel %vm631_vm4, %v633_v55, %v629_v54 }
 0x778   :  { %v646_v8 = vsub.f32 1.0, %v634_v57  ;;  %v654_v19 = vmul.f32 %v652_v14, %v634_v57 }
 0x7c4   :  { %v568_v48 = vpop.permute.xlu0 %567 }
 0x7c5   :  { %v570_v50 = vmul.f32 %v568_v48, %v565_v49 }
 0x7c7   :  { %572 = vrot.lane.b32.xlu2 %v570_v50, %s746_s4 }
 0x7cc   :  { %v637_v56 = vpop.permute.xlu1 %636 }
 0x7cd   :  { %v639_v58 = vmul.f32 %v637_v56, %v634_v57 }
 0x7cf   :  { %641 = vrot.lane.b32.xlu0 %v639_v58, %s746_s4 }
 0x7d7   :  { %373 = vrot.lane.b32.xlu0 %v901_v2, %s747_s8  ;;  %v583_v2 = vrot.slane %v925_v5, 6 }
 0x7d9   :  { %v585_v4 = vmul.f32 %v583_v2, %v565_v49 }
 0x821   :  { %v573_v59 = vpop.permute.xlu2 %572 }
 0x822   :  { %v575_v60 = vadd.f32 %v573_v59, %v864_v23 }
 0x824   :  { %740 = vtanh.f32 %v575_v60 }
 0x82a   :  { %v741_v61 = vpop.eup %740 }
 0x82b   :  { %579 = vrot.lane.b32.xlu1 %v741_v61, %s747_s8 }
 0x833   :  { %515 = vrot.lane.b32.xlu1 %v925_v5, %s747_s8 }
 0x841   :  { %v642_v62 = vpop.permute.xlu0 %641 }
 0x842   :  { %v644_v63 = vadd.f32 %v642_v62, %v870_v28 }
 0x844   :  { %742 = vtanh.f32 %v644_v63 }
 0x849   :  { %v374_v12 = vpop.permute.xlu0 %373 }
 0x84a   :  { %v743_v0 = vpop.eup %742  ;;  %v376_v17 = vsel %vm109_vm9, %v374_v12, %v906_v9 }
 0x84b   :  { %648 = vrot.lane.b32.xlu2 %v743_v0, %s747_s8  ;;  %v662_v22 = vsel %vm661_vm5, %v238_v20, %v376_v17 }
 0x89d   :  { %v580_v3 = vpop.permute.xlu1 %579 }
 0x89e   :  { %v582_v23 = vmul.f32 %v580_v3, %v577_v1 }
 0x8a0   :  { %v586_v6 = vadd.f32 %v585_v4, %v582_v23 }
 0x8a2   :  { %657 = vrot.lane.b32.xlu2 %v586_v6, %s747_s8 }
 0x8a5   :  { %v649_v7 = vpop.permute.xlu2 %648  ;;  %v516_v13 = vpop.permute.xlu1 %515 }
 0x8a6   :  { %v651_v28 = vmul.f32 %v649_v7, %v646_v8  ;;  %v518_v5 = vsel %vm109_vm9, %v516_v13, %v930_v16 }
 0x8a7   :  { %v664_v25 = vsel %vm663_vm6, %v662_v22, %v518_v5 }
 0x8a8   :  { %v655_v21 = vadd.f32 %v654_v19, %v651_v28 }
 0x8fc   :  { %v658_v24 = vpop.permute.xlu2 %657 }
 0x8fd   :  { %v660_v26 = vsel %vm109_vm9, %v658_v24, %v655_v21 }
 0x8fe   :  { %v666_v27 = vsel %vm665_vm7, %v664_v25, %v660_v26 }
 0x8ff   :  { %667 = vst.msk [vmem:[%s977_s10] sm:$0xff] %vm44_vm0, %v666_v27 }

// kernel: device_forward.3
= control target key start
LH: loop header
LB: loop body
LE: loop exit
PB: predicated region body
PF: predicated region fallthrough
CT: control target
= control target key end

     0   :  { %s3250_s0 = inlined_call_operand.vmem [shape: f32[2,4,32], index: 0, kind: input, shape index: {}]   ;;  %s3251_s1 = inlined_call_operand.vmem [shape: f32[2,1,32], index: 1, kind: input, shape index: {}]   ;;  %s3252_s2 = inlined_call_operand.vmem [shape: f32[2,1,5], index: 2, kind: input, shape index: {}]   ;;  %s3253_s3 = inlined_call_operand.vmem [shape: f32[2,4,6], index: 3, kind: input, shape index: {}]   ;;  %s3254_s4 = inlined_call_operand.vmem [shape: f32[2,6,6], index: 4, kind: input, shape index: {}]   ;;  %s3255_s5 = inlined_call_operand.vmem [shape: f32[32,32], index: 5, kind: input, shape index: {}]   ;;  %s3256_s6 = inlined_call_operand.vmem [shape: f32[1,32], index: 6, kind: input, shape index: {}]   ;;  %s3257_s7 = inlined_call_operand.vmem [shape: f32[64,3], index: 7, kind: input, shape index: {}]   ;;  %s3258_s8 = inlined_call_operand.vmem [shape: f32[1,3], index: 8, kind: input, shape index: {}]   ;;  %s3259_s9 = inlined_call_operand.vmem [shape: f32[32,1], index: 9, kind: input, shape index: {}]   ;;  %s3260_s10 = inlined_call_operand.vmem [shape: f32[32,1], index: 10, kind: input, shape index: {}]   ;;  %s3261_s11 = inlined_call_operand.vmem [shape: f32[3,2], index: 11, kind: input, shape index: {}]   ;;  %s3262_s12 = inlined_call_operand.vmem [shape: f32[3,2], index: 12, kind: input, shape index: {}]   ;;  %s3263_s13 = inlined_call_operand.vmem [shape: f32[3,2], index: 13, kind: input, shape index: {}]   ;;  %s3264_s14 = inlined_call_operand.vmem [shape: f32[4,24], index: 14, kind: input, shape index: {}]   ;;  %s3265_s15 = inlined_call_operand.vmem [shape: f32[6,4], index: 15, kind: input, shape index: {}]   ;;  %s3266_s16 = inlined_call_operand.vmem [shape: f32[6,4], index: 16, kind: input, shape index: {}]   ;;  %s3267_s17 = inlined_call_operand.hbm [shape: f32[2,4,128], index: 17, kind: output, shape index: {0}]   ;;  %s3268_s18 = inlined_call_operand.vmem [shape: f32[2,6,128], index: 18, kind: output, shape index: {1}]   ;;  %s3269_s19 = inlined_call_operand.vmem [shape: f32[2,1,128], index: 19, kind: output, shape index: {2}]  }
   0x1   :  { %3276 = sst [smem:[#allocation11_spill]] %s3250_s0 }
   0x2   :  { %3277 = sst [smem:[#allocation12_spill]] %s3251_s1 }
   0x3   :  { %3278 = sst [smem:[#allocation13_spill]] %s3252_s2 }
   0x4   :  { %3279 = sst [smem:[#allocation14_spill]] %s3253_s3 }
   0x5   :  { %3280 = sst [smem:[#allocation15_spill]] %s3254_s4 }
   0x6   :  { %3281 = sst [smem:[#allocation16_spill]] %s3255_s5 }
   0x7   :  { %3282 = sst [smem:[#allocation17_spill]] %s3260_s10 }
   0x8   :  { %25 = vsyncpa [#allocation3], 0 }
   0x9   :  { %27 = vsyncpa [#allocation3 + $0x1], 0  ;;  %s2692_s0 = smov 0   ;;  %s2694_s30 = smov 0  }
   0xa   :  { %s2696_s20 = smov 0   ;;  %s2698_s21 = smov 0  }
   0xb LB: > { %3283 = sst [smem:[#allocation5_spill]] %s2570_s0  ;;  %s2713_s1 = sadd.s32 4294967295, %s2582_s21   ;;  %s2582_s21 = sphi %s2698_s21, %s3301_s21   ;;  %s2578_s20 = sphi %s2696_s20, %s3303_s20   ;;  %s2574_s30 = sphi %s2694_s30, %s3305_s30   ;;  %s2570_s0 = sphi %s2692_s0, %s3304_s0  }
   0xc   : > { %3284 = sst [smem:[#allocation6_spill]] %s2578_s20  ;;  %s2275_s22 = sadd.s32 4294967294, %s2582_s21  }
   0xd   : > { %3285 = sst [smem:[#allocation7_spill]] %s2582_s21  ;;  %s2717_s2 = sadd.s32 1, %s2582_s21  }
   0xe   : > { %3286 = sst [smem:[#allocation8_spill]] %s2717_s2  ;;  %s422_s23 = sadd.s32 1, %s2578_s20 }
   0xf   : > { %s419_s24 = ssub.s32 %s2582_s21, %s2717_s2  ;;  %p432_p0 = scmp.ne.s32.totalorder %s2578_s20, %s2574_s30 }
  0x10   : > { %p420_p1 = scmp.eq.s32.totalorder %s419_s24, 0  ;;  %p433_p2 = scmp.eq.s32.totalorder %s2713_s1, 1 }
  0x11   : > { %p438_p3 = scmp.ne.s32.totalorder %s2574_s30, %s2570_s0  ;;  %p439_p4 = scmp.eq.s32.totalorder %s2275_s22, 1 }
  0x12   : > { %s2728_s25 = scalar_select %p420_p1, %s2578_s20, %s422_s23  }
  0x13   : > { %p2730_p5 = por %p433_p2, %p432_p0  ;;  %p2734_p6 = por %p439_p4, %p438_p3 }
  0x14   : > { %3287 = sst [smem:[#allocation9_spill]] %s2728_s25  ;;  %p2278_p7 = scmp.ge.s32.totalorder %s2582_s21, 1 }
  0x15   : > { %s3289_s26 = scalar_select %p2734_p6, 1, 0 }
  0x16   : > { %p578_p8 = scmp.lt.s32.totalorder %s2582_s21, 3 }
  0x17   : > { %3290 = sst [smem:[#allocation10_spill]] %s3289_s26 }
  0x18   : > { %p579_p9 = pnand %p2278_p7, %p578_p8 }
  0x19   : > { %s3291_s5 = sld [smem:[#allocation16_spill]] (!%p579_p9)  ;;  %p654_p10 = scmp.lt.s32.totalorder (!%p579_p9), %s2713_s1, 1 }
  0x1a   : > { %582 = sbr.rel (%p579_p9) target bundleno = 3525 (0xdc5), region = 88  ;;  %s3292_s10 = sld [smem:[#allocation17_spill]] (!%p579_p9) }
  0x1b   : > { %s3293_s26 = sld [smem:[#allocation12_spill]] (!%p579_p9)  ;;  %s2586_s25 = smov (!%p579_p9), 32  }
  0x1c   : > { %s3294_s27 = sld [smem:[#allocation11_spill]] (!%p579_p9) }
  0x1d   : > { %s3295_s29 = sld [smem:[#allocation13_spill]] (!%p579_p9) }
  0x1e   : > { %s3296_s24 = sld [smem:[#allocation14_spill]] (!%p579_p9) }
  0x1f   : > { %v684_v0 = vld [vmem:[%s3291_s5 + $0x18] sm:$0xff]  ;;  %v683_v1 = vld [vmem:[%s3291_s5 + $0x10] sm:$0xff]  ;;  %v682_v3 = vld [vmem:[%s3291_s5 + $0x8] sm:$0xff]  ;;  %s2754_s2 = scalar_select %p654_p10, %s2713_s1, 1  ;;  %vm686_vm0 = vcmask 261120   ;;  %vm728_vm1 = vcmask 1043456   ;;  %v843_v44 = vlaneseq }
  0x20   : > { %702 = vmatpush.msra.mxu0 %v684_v0  ;;  %v760_v2 = vld [vmem:[%s3292_s10 + $0x18] sm:$0xff]  ;;  %v681_v4 = vld [vmem:[%s3291_s5] sm:$0xff]  ;;  %v759_v6 = vld [vmem:[%s3292_s10 + $0x10] sm:$0xff]  ;;  %vm875_vm2 = vcmask 1044480   ;;  %vm784_vm3 = vcmask 7168   ;;  %vm791_vm4 = vcmask 15360  }
  0x21   : > { %776 = vmatpush.msra.mxu2 %v760_v2  ;;  %s660_s0 = scalar_lea.vmem %s3293_s26, %s2754_s2  ;;  %v758_v7 = vld [vmem:[%s3292_s10 + $0x8] sm:$0xff]  ;;  %v757_v8 = vld [vmem:[%s3292_s10] sm:$0xff]  ;;  %v733_v9 = vld [vmem:[%s3259_s9 + $0x18] sm:$0xff]  ;;  %s2280_s20 = sshll.u32 %s2754_s2, 2  ;;  %v2585_v24 = vmov 0   ;;  %vm846_vm11 = vcmask 35840  }
  0x22   : > { %703 = vmatpush.msra.mxu0 %v683_v1  ;;  %v680_v5 = vld [vmem:[%s660_s0] sm:$0x1]  ;;  %v732_v10 = vld [vmem:[%s3259_s9 + $0x10] sm:$0xff]  ;;  %749 = vmatpush.msra.mxu1 %v733_v9  ;;  %v731_v11 = vld [vmem:[%s3259_s9 + $0x8] sm:$0xff]  ;;  %s657_s28 = scalar_lea.vmem %s3294_s27, %s2280_s20  ;;  %s2584_s10 = smov 1   ;;  %v844_v45 = vand.u32 127, %v843_v44 }
  0x23   : > { %777 = vmatpush.msra.mxu2 %v759_v6  ;;  %v730_v12 = vld [vmem:[%s3259_s9] sm:$0xff]  ;;  %2393 = vset.pattern.permute.xlu0 %v2585_v24  ;;  %s663_s22 = scalar_lea.vmem %s3295_s29, %s2754_s2  ;;  %v2825_v51 = vld [vmem:[%s3257_s7 + $0x38] sm:$0xff]  ;;  %v2830_v52 = vld [vmem:[%s3257_s7 + $0x30] sm:$0xff]  ;;  %vm871_vm13 = vcmask 39936   ;;  %v2587_v60 = vmov 0.0   ;;  %vm931_vm15 = vcmask 523264  }
  0x24   : > { %704 = vmatpush.msra.mxu0 %v682_v3  ;;  %750 = vmatpush.msra.mxu1 %v732_v10  ;;  %v2791_v13 = vld [vmem:[%s657_s28] sm:$0xf]  ;;  %v2813_v46 = vcvt.s32.f32 %v844_v45  ;;  %v2837_v53 = vld [vmem:[%s3257_s7 + $0x28] sm:$0xff]  ;;  %v2857_v55 = vld [vmem:[%s3257_s7 + $0x18] sm:$0xff]  ;;  %s2588_s26 = smov 2   ;;  %s2590_s29 = smov 110  }
  0x25   : > { %778 = vmatpush.msra.mxu2 %v758_v7  ;;  %v685_v14 = vld [vmem:[%s3256_s6] sm:$0x1]  ;;  %2394 = vset.pattern.permute.xlu1 %v2585_v24  ;;  %v2863_v56 = vld [vmem:[%s3257_s7 + $0x10] sm:$0xff]  ;;  %v2869_v57 = vld [vmem:[%s3257_s7 + $0x8] sm:$0xff]  ;;  %s667_s27 = scalar_lea.vmem %s3296_s24, %s2280_s20  ;;  %s2591_s20 = smov 122  }
  0x26   : > { %705 = vmatpush.msra.mxu0 %v681_v4  ;;  %751 = vmatpush.msra.mxu1 %v731_v11  ;;  %v837_v29 = vld [vmem:[%s663_s22] sm:$0x1]  ;;  %s640_s28 = sand.u32 1, %s2574_s30   ;;  %s3297_s4 = sld [smem:[#allocation15_spill]] }
  0x27   : > { %2284 = vmatmul.msk.f32.vlgmr.msra.gmra.mxu0 %vm686_vm0, %v680_v5  ;;  %779 = vmatpush.msra.mxu2 %v757_v8  ;;  %vm838_vm5 = vcmp.gt.f32.partialorder %v837_v29, 0.5  ;;  %v2845_v54 = vld [vmem:[%s3257_s7 + $0x20] sm:$0xff]  ;;  %s3172_s0 = sshll.u32 %s640_s28, 2  ;;  %s2343_s24 = sshll.u32 %s2713_s1, 2 }
  0x28   : > { %752 = vmatpush.msra.mxu1 %v730_v12  ;;  %v839_v32 = vsel %vm838_vm5, 1, %v2585_v24  ;;  %v2877_v58 = vld [vmem:[%s3257_s7] sm:$0xff]  ;;  %vm955_vm5 = vcmask 19456   ;;  %s642_s5 = scalar_lea.vmem [#allocation2], %s3172_s0 }
  0x29   : > { %2285 = vmatmul.msk.f32.vlgmr.msra.gmra.mxu1 %vm686_vm0, %v2791_v13  ;;  %v840_v35 = vperm.slane %v839_v32, 0  ;;  %v2907_v3 = vld [vmem:[%s3258_s8] ss:$0 sm:$0xff]  ;;  %s2122_s21 = sshll.u32 %s642_s5, 4  ;;  %s2123_s21 = int_to_ptr.vmem [resolvable:$true] %s2122_s21 }
  0x2a   : > { %943 = vmatpush.msrb.mxu1 %v2825_v51 }
  0x2b   : > { %vm841_vm9 = vcmp.eq.s32.totalorder %v840_v35, 1 }
  0x2c   : > { %944 = vmatpush.msrb.mxu1 %v2830_v52 }
  0x2e   : > { %945 = vmatpush.msrb.mxu1 %v2837_v53 }
  0x30   : > { %946 = vmatpush.msrb.mxu1 %v2845_v54 }
  0x32   : > { %947 = vmatpush.msrb.mxu1 %v2857_v55 }
  0x34   : > { %948 = vmatpush.msrb.mxu1 %v2863_v56 }
  0x36   : > { %949 = vmatpush.msrb.mxu1 %v2869_v57 }
  0x38   : > { %950 = vmatpush.msrb.mxu1 %v2877_v58 }
  0xa4   : > { %v707_v15 = vpop.f32.mrf.mxu0 }
  0xa5   : > { %v708_v16 = vadd.f32 %v707_v15, %v685_v14 }
  0xa6   : > { %v754_v20 = vpop.f32.mrf.mxu1 }
  0xa7   : > { %v726_v17 = vrot.slane %v708_v16, 4  ;;  %v785_v23 = vsel %vm784_vm3, %v754_v20, 1.0  ;;  %v921_v50 = vperm.slane %v708_v16, 0 }
  0xa9   : > { %v729_v18 = vsel %vm728_vm1, %v2791_v13, %v726_v17 }
  0xaa   : > { %2286 = vmatmul.msk.f32.vlgmr.msra.gmra.mxu2 %vm686_vm0, %v729_v18  ;;  %2294 = vmatpush.msk.msrb.mxu0 %vm875_vm2, %v729_v18 }
  0xac   : > { %1079 = vmatpush.msra.mxu0 %v2825_v51 }
  0xae   : > { %1080 = vmatpush.msra.mxu0 %v2830_v52 }
  0xb0   : > { %1081 = vmatpush.msra.mxu0 %v2837_v53 }
  0xb2   : > { %1082 = vmatpush.msra.mxu0 %v2845_v54 }
  0xb4   : > { %1083 = vmatpush.msra.mxu0 %v2857_v55 }
  0xb6   : > { %1084 = vmatpush.msra.mxu0 %v2863_v56 }
  0xb8   : > { %1085 = vmatpush.msra.mxu0 %v2869_v57 }
  0xba   : > { %1086 = vmatpush.msra.mxu0 %v2877_v58 }
 0x12d   : > { %v781_v19 = vpop.f32.mrf.mxu2 }
 0x12e   : > { %787 = vrot.lane.b32.xlu0 %v781_v19, %s2584_s10  ;;  %s2282_s10 = sshll.u32 %s2754_s2, 3 }
 0x12f   : > { %s671_s23 = scalar_lea.vmem %s3297_s4, %s2282_s10  ;;  %s2540_s4 = scalar_lea.hbm %s3267_s17, 8 }
 0x1a0   : > { %v788_v21 = vpop.permute.xlu0 %787 }
 0x1a1   : > { %v790_v22 = vsel %vm784_vm3, 1.0, %v788_v21 }
 0x1a2   : > { %2287 = vmatpush.xpose.msk.msra.mxu3 %vm791_vm4, %v790_v22 }
 0x1a5   : > { %2288 = vmatmul.msk.f32.vlgmr.msra.gmra.mxu3 %vm791_vm4, %v785_v23 }
 0x1a6   : > { %2292 = vmatpush.msk.msrb.mxu3 %vm875_vm2, %v729_v18 }
 0x1a8   : > { %1030 = vmatpush.msra.mxu3 %v2825_v51 }
 0x1aa   : > { %1031 = vmatpush.msra.mxu3 %v2830_v52 }
 0x1ac   : > { %1032 = vmatpush.msra.mxu3 %v2837_v53 }
 0x1ae   : > { %1033 = vmatpush.msra.mxu3 %v2845_v54 }
 0x1b0   : > { %1034 = vmatpush.msra.mxu3 %v2857_v55 }
 0x1b2   : > { %1035 = vmatpush.msra.mxu3 %v2863_v56 }
 0x1b4   : > { %1036 = vmatpush.msra.mxu3 %v2869_v57 }
 0x1b6   : > { %1037 = vmatpush.msra.mxu3 %v2877_v58 }
 0x228   : > { %v815_v25 = vpop.f32.mrf.mxu3 }
 0x229   : > { %v2289_v26 = vmul.f32 -1.442695, %v815_v25  ;;  %v2930_v25 = vld [vmem:[%s3261_s11] sm:$0x7] }
 0x22b   : > { %2396 = vpow2.f32 %v2289_v26 }
 0x231   : > { %v2397_v27 = vpop.eup %2396 }
 0x232   : > { %v821_v28 = vadd.f32 1.0, %v2397_v27 }
 0x234   : > { %2398 = vrcp.f32 %v821_v28  ;;  %v833_v34 = vand.u32 2147483648, %v821_v28  ;;  %v831_v37 = vand.u32 2147483647, %v821_v28  ;;  %vm827_vm7 = vweird.f32 %v821_v28 }
 0x236   : > { %v834_v39 = vor.u32 1.1754944e-38, %v833_v34  ;;  %vm832_vm10 = vcmp.eq.f32.partialorder %v831_v37, 8.507059e+37 }
 0x23a   : > { %v2399_v30 = vpop.eup %2398 }
 0x23b   : > { %v823_v31 = vmul.f32 %v2399_v30, %v821_v28  ;;  %vm828_vm6 = vweird.f32 %v2399_v30 }
 0x23c   : > { %vm829_vm8 = vmor %vm827_vm7, %vm828_vm6 }
 0x23d   : > { %v824_v33 = vsub.f32 1.0, %v823_v31 }
 0x23f   : > { %v825_v36 = vmul.f32 %v2399_v30, %v824_v33 }
 0x241   : > { %v826_v38 = vadd.f32 %v2399_v30, %v825_v36 }
 0x243   : > { %v830_v40 = vsel %vm829_vm8, %v2399_v30, %v826_v38  ;;  %vm987_vm8 = vcmask 1042432  }
 0x244   : > { %v835_v41 = vsel %vm832_vm10, %v834_v39, %v830_v40  ;;  %2297 = vmatpush.msk.msrb.mxu2 %vm987_vm8, %v2930_v25 }
 0x245   : > { %v2809_v42 = vsel %vm841_vm9, %v835_v41, -1.0 }
 0x246   : > { %v847_v43 = vsel %vm846_vm11, %v2809_v42, -inf }
 0x247   : > { %848 = vmax.xlane.f32.xlu0 %v847_v43 }
 0x2ba   : > { %v2815_v47 = vpop.xlane.xlu0 %848 }
 0x2bb   : > { %vm850_vm12 = vcmp.ge.f32.partialorder %v2809_v42, %v2815_v47 }
 0x2bc   : > { %v851_v48 = vsel %vm850_vm12, %v2813_v46, 5.0 }
 0x2bd   : > { %v852_v49 = vsel %vm846_vm11, %v851_v48, inf }
 0x2be   : > { %853 = vmin.xlane.f32.xlu1 %v852_v49 }
 0x2d7   : > { %923 = vrot.lane.b32.xlu1 %v921_v50, %s2586_s25 }
 0x331   : > { %v854_v59 = vpop.xlane.xlu1 %853 }
 0x332   : > { %vm855_vm14 = vcmp.eq.f32.partialorder %v2813_v46, %v854_v59 }
 0x333   : > { %v2290_v61 = vsel %vm855_vm14, 1.0, %v2587_v60 }
 0x334   : > { %2293 = vmatmul.msk.f32.vlgmr.msrb.gmra.mxu3 %vm871_vm13, %v2290_v61  ;;  %vm858_vm2 = vcmp.gt.f32.partialorder %v2290_v61, 0.5 }
 0x335   : > { %1258 = vmatpush.msrb.mxu3 %v2825_v51  ;;  %v859_v2 = vsel %vm858_vm2, -2.0, %v2809_v42 }
 0x336   : > { %v860_v4 = vsel %vm846_vm11, %v859_v2, -inf }
 0x337   : > { %1259 = vmatpush.msrb.mxu3 %v2830_v52 }
 0x339   : > { %1260 = vmatpush.msrb.mxu3 %v2837_v53 }
 0x33b   : > { %1261 = vmatpush.msrb.mxu3 %v2845_v54 }
 0x33d   : > { %1262 = vmatpush.msrb.mxu3 %v2857_v55 }
 0x33f   : > { %1263 = vmatpush.msrb.mxu3 %v2863_v56 }
 0x341   : > { %1264 = vmatpush.msrb.mxu3 %v2869_v57 }
 0x343   : > { %1265 = vmatpush.msrb.mxu3 %v2877_v58 }
 0x349   : > { %v2896_v62 = vpop.permute.xlu1 %923 }
 0x34a   : > { %v926_v63 = vsel %vm686_vm0, %v2791_v13, %v2896_v62 }
 0x34b   : > { %2400 = vtanh.f32 %v926_v63 }
 0x351   : > { %v2401_v0 = vpop.eup %2400 }
 0x352   : > { %2296 = vmatmul.msk.f32.vlgmr.msrb.gmra.mxu1 %vm931_vm15, %v2401_v0 }
 0x3b7   : > { %v895_v1 = vpop.f32.mrf.mxu3 }
 0x3b8   : > { %1014 = vrot.lane.b32.xlu2 %v895_v1, %s2586_s25  ;;  %v1066_v24 = vsel %vm686_vm0, %v895_v1, %v2896_v62 }
 0x3cf   : > { %v952_v5 = vpop.f32.mrf.mxu1 }
 0x3d0   : > { %v953_v6 = vadd.f32 %v2907_v3, %v952_v5 }
 0x3d2   : > { %v956_v7 = vsel %vm955_vm5, %v953_v6, -inf }
 0x3e1   : > { %861 = vmax.xlane.f32.xlu2 %v860_v4 }
 0x3e9   : > { %957 = vmax.xlane.f32.xlu2 %v956_v7 }
 0x412   : > { %v1015_v8 = vpop.permute.xlu2 %1014 }
 0x413   : > { %v1017_v9 = vsel %vm686_vm0, %v2791_v13, %v1015_v8 }
 0x414   : > { %2402 = vtanh.f32 %v1017_v9 }
 0x41a   : > { %v2403_v10 = vpop.eup %2402 }
 0x41b   : > { %2299 = vmatmul.msk.f32.vlgmr.msra.gmra.mxu3 %vm931_vm15, %v2403_v10 }
 0x41c   : > { %2317 = vmatpush.msk.msra.mxu3 %vm728_vm1, %v895_v1 }
 0x454   : > { %v2916_v11 = vpop.xlane.xlu2 %861 }
 0x455   : > { %vm863_vm6 = vcmp.ge.f32.partialorder %v859_v2, %v2916_v11 }
 0x456   : > { %v864_v12 = vsel %vm863_vm6, %v2813_v46, 5.0 }
 0x457   : > { %v865_v14 = vsel %vm846_vm11, %v864_v12, inf }
 0x458   : > { %866 = vmin.xlane.f32.xlu1 %v865_v14 }
 0x45c   : > { %v958_v15 = vpop.xlane.xlu2 %957 }
 0x45d   : > { %v959_v16 = vsub.f32 %v953_v6, %v958_v15 }
 0x45f   : > { %v960_v17 = vmul.f32 1.442695, %v959_v16 }
 0x461   : > { %2404 = vpow2.f32 %v960_v17 }
 0x462   : > { %2406 = vtanh.f32 %v1066_v24 }
 0x467   : > { %v2405_v18 = vpop.eup %2404 }
 0x468   : > { %v962_v19 = vsel %vm955_vm5, %v2405_v18, 0.0  ;;  %v2407_v27 = vpop.eup %2406 }
 0x469   : > { %963 = vadd.xlane.f32.xlu2 %v962_v19 }
 0x49e   : > { %v1039_v20 = vpop.f32.mrf.mxu3 }
 0x49f   : > { %v1040_v21 = vadd.f32 %v2907_v3, %v1039_v20 }
 0x4a1   : > { %v1042_v22 = vsel %vm955_vm5, %v1040_v21, -inf }
 0x4a2   : > { %1043 = vmax.xlane.f32.xlu0 %v1042_v22 }
 0x4cb   : > { %v867_v23 = vpop.xlane.xlu1 %866 }
 0x4cc   : > { %vm868_vm7 = vcmp.eq.f32.partialorder %v2813_v46, %v867_v23 }
 0x4cd   : > { %v2291_v26 = vsel %vm868_vm7, 1.0, %v2587_v60 }
 0x4ce   : > { %2295 = vmatmul.msk.f32.vlgmr.msrb.gmra.mxu0 %vm871_vm13, %v2291_v26  ;;  %vm983_vm13 = vcmask 23552  }
 0x4d6   : > { %2300 = vmatmul.msk.f32.vlgmr.msra.gmra.mxu0 %vm931_vm15, %v2407_v27 }
 0x4dc   : > { %v964_v28 = vpop.xlane.xlu2 %963 }
 0x4dd   : > { %2408 = vrcp.f32 %v964_v28  ;;  %v976_v32 = vand.u32 2147483648, %v964_v28  ;;  %v974_v34 = vand.u32 2147483647, %v964_v28  ;;  %vm970_vm10 = vweird.f32 %v964_v28 }
 0x4df   : > { %v977_v36 = vor.u32 1.1754944e-38, %v976_v32  ;;  %vm975_vm12 = vcmp.eq.f32.partialorder %v974_v34, 8.507059e+37 }
 0x4e3   : > { %v2409_v29 = vpop.eup %2408 }
 0x4e4   : > { %v966_v30 = vmul.f32 %v2409_v29, %v964_v28  ;;  %vm971_vm9 = vweird.f32 %v2409_v29 }
 0x4e5   : > { %vm972_vm11 = vmor %vm970_vm10, %vm971_vm9  ;;  %vm1374_vm9 = vcmask 31744  }
 0x4e6   : > { %v967_v31 = vsub.f32 1.0, %v966_v30 }
 0x4e8   : > { %v968_v33 = vmul.f32 %v2409_v29, %v967_v31  ;;  %v723_v31 = vld [vmem:[%s3265_s15] sm:$0x3f] }
 0x4ea   : > { %v969_v35 = vadd.f32 %v2409_v29, %v968_v33 }
 0x4ec   : > { %v973_v37 = vsel %vm972_vm11, %v2409_v29, %v969_v35 }
 0x4ed   : > { %v978_v38 = vsel %vm975_vm12, %v977_v36, %v973_v37  ;;  %v3005_v36 = vld [vmem:[%s3263_s13] sm:$0x7] }
 0x4ee   : > { %v979_v39 = vmul.f32 %v2405_v18, %v978_v38  ;;  %2303 = vmatpush.msk.msra.mxu1 %vm987_vm8, %v3005_v36 }
 0x4f0   : > { %v980_v40 = vadd.f32 1e-06, %v979_v39  ;;  %2309 = vmatpush.msk.msrb.mxu1 %vm987_vm8, %v3005_v36 }
 0x4f2   : > { %2410 = vlog2.f32 %v980_v40  ;;  %v3014_v40 = vld [vmem:[%s3266_s16] sm:$0x3f] }
 0x4f8   : > { %v2411_v41 = vpop.eup %2410 }
 0x4f9   : > { %v982_v42 = vmul.f32 0.6931472, %v2411_v41 }
 0x4fb   : > { %2298 = vmatmul.msk.f32.vlgmr.msrb.gmra.mxu2 %vm983_vm13, %v982_v42 }
 0x515   : > { %v1044_v43 = vpop.xlane.xlu0 %1043 }
 0x516   : > { %v1045_v44 = vsub.f32 %v1040_v21, %v1044_v43 }
 0x518   : > { %v1046_v45 = vmul.f32 1.442695, %v1045_v44 }
 0x51a   : > { %2412 = vpow2.f32 %v1046_v45 }
 0x520   : > { %v2413_v46 = vpop.eup %2412 }
 0x521   : > { %v1048_v48 = vsel %vm955_vm5, %v2413_v46, 0.0 }
 0x522   : > { %1049 = vadd.xlane.f32.xlu0 %v1048_v48 }
 0x54b   : > { %v2938_v49 = vpop.f32.mrf.mxu0 }
 0x54c   : > { %v1245_v50 = vsel %vm686_vm0, %v2938_v49, %v2896_v62  ;;  %1193 = vrot.lane.b32.xlu2 %v2938_v49, %s2586_s25  ;;  %v2959_v62 = vld [vmem:[%s3262_s12] sm:$0x7] }
 0x54d   : > { %2414 = vtanh.f32 %v1245_v50  ;;  %2301 = vmatpush.msk.msra.mxu2 %vm987_vm8, %v2959_v62  ;;  %2307 = vmatpush.msk.msrb.mxu0 %vm987_vm8, %v2959_v62 }
 0x54f   : > { %1209 = vmatpush.msrb.mxu2 %v2825_v51 }
 0x551   : > { %1210 = vmatpush.msrb.mxu2 %v2830_v52 }
 0x553   : > { %v2415_v59 = vpop.eup %2414  ;;  %v1088_v60 = vpop.f32.mrf.mxu0  ;;  %1211 = vmatpush.msrb.mxu2 %v2837_v53 }
 0x554   : > { %v1089_v61 = vadd.f32 %v2907_v3, %v1088_v60  ;;  %2306 = vmatmul.msk.f32.vlgmr.msrb.gmra.mxu3 %vm931_vm15, %v2415_v59 }
 0x555   : > { %1571 = vmatpush.msrb.mxu3 %v2825_v51  ;;  %1212 = vmatpush.msrb.mxu2 %v2845_v54 }
 0x556   : > { %v1091_v63 = vsel %vm955_vm5, %v1089_v61, -inf }
 0x557   : > { %1092 = vmax.xlane.f32.xlu0 %v1091_v63  ;;  %1572 = vmatpush.msrb.mxu3 %v2830_v52 }
 0x558   : > { %1213 = vmatpush.msrb.mxu2 %v2857_v55 }
 0x559   : > { %1573 = vmatpush.msrb.mxu3 %v2837_v53 }
 0x55a   : > { %1214 = vmatpush.msrb.mxu2 %v2863_v56 }
 0x55b   : > { %1574 = vmatpush.msrb.mxu3 %v2845_v54 }
 0x55c   : > { %1215 = vmatpush.msrb.mxu2 %v2869_v57  ;;  %2318 = vmatmul.msk.f32.vlgmr.msra.gmra.mxu3 %vm1374_vm9, %v3014_v40 }
 0x55d   : > { %1575 = vmatpush.msrb.mxu3 %v2857_v55 }
 0x55e   : > { %1216 = vmatpush.msrb.mxu2 %v2877_v58 }
 0x55f   : > { %1576 = vmatpush.msrb.mxu3 %v2863_v56 }
 0x561   : > { %1577 = vmatpush.msrb.mxu3 %v2869_v57 }
 0x563   : > { %1578 = vmatpush.msrb.mxu3 %v2877_v58 }
 0x565   : > { %2332 = vmatpush.msk.msra.mxu3 %vm987_vm8, %v3005_v36 }
 0x57e   : > { %v2984_v30 = vpop.f32.mrf.mxu2 }
 0x595   : > { %v1050_v0 = vpop.xlane.xlu0 %1049 }
 0x596   : > { %2416 = vrcp.f32 %v1050_v0  ;;  %v1062_v5 = vand.u32 2147483648, %v1050_v0  ;;  %v1060_v7 = vand.u32 2147483647, %v1050_v0  ;;  %vm1056_vm2 = vweird.f32 %v1050_v0 }
 0x598   : > { %v1063_v9 = vor.u32 1.1754944e-38, %v1062_v5  ;;  %vm1061_vm7 = vcmp.eq.f32.partialorder %v1060_v7, 8.507059e+37 }
 0x59c   : > { %v2417_v1 = vpop.eup %2416 }
 0x59d   : > { %v1052_v2 = vmul.f32 %v2417_v1, %v1050_v0  ;;  %vm1057_vm14 = vweird.f32 %v2417_v1 }
 0x59e   : > { %vm1058_vm6 = vmor %vm1056_vm2, %vm1057_vm14 }
 0x59f   : > { %v1053_v4 = vsub.f32 1.0, %v1052_v2 }
 0x5a1   : > { %v1054_v6 = vmul.f32 %v2417_v1, %v1053_v4 }
 0x5a3   : > { %v1055_v8 = vadd.f32 %v2417_v1, %v1054_v6 }
 0x5a5   : > { %v1059_v10 = vsel %vm1058_vm6, %v2417_v1, %v1055_v8 }
 0x5a6   : > { %v1064_v12 = vsel %vm1061_vm7, %v1063_v9, %v1059_v10  ;;  %v1194_v16 = vpop.permute.xlu2 %1193 }
 0x5a7   : > { %v1065_v14 = vmul.f32 %v2413_v46, %v1064_v12  ;;  %v1196_v18 = vsel %vm686_vm0, %v2791_v13, %v1194_v16 }
 0x5a9   : > { %v1115_v15 = vadd.f32 1e-06, %v1065_v14 }
 0x5ab   : > { %2418 = vlog2.f32 %v1115_v15 }
 0x5ac   : > { %2420 = vtanh.f32 %v1196_v18 }
 0x5b1   : > { %v2419_v17 = vpop.eup %2418 }
 0x5b2   : > { %v1117_v19 = vmul.f32 0.6931472, %v2419_v17  ;;  %v2421_v20 = vpop.eup %2420 }
 0x5b4   : > { %2302 = vmatmul.msk.f32.vlgmr.msra.gmra.mxu2 %vm983_vm13, %v1117_v19 }
 0x5b5   : > { %2315 = vmatpush.msk.msra.mxu2 %vm728_vm1, %v2791_v13 }
 0x5bc   : > { %2305 = vmatmul.msk.f32.vlgmr.msrb.gmra.mxu2 %vm931_vm15, %v2421_v20 }
 0x5bd   : > { %2323 = vmatpush.msk.msrb.mxu2 %vm728_vm1, %v2916_v11 }
 0x5c4   : > { %2316 = vmatmul.msk.f32.vlgmr.msra.gmra.mxu2 %vm1374_vm9, %v723_v31 }
 0x5c5   : > { %1702 = vmatpush.msra.mxu2 %v2825_v51 }
 0x5c7   : > { %1703 = vmatpush.msra.mxu2 %v2830_v52 }
 0x5c9   : > { %1704 = vmatpush.msra.mxu2 %v2837_v53 }
 0x5ca   : > { %v1093_v21 = vpop.xlane.xlu0 %1092 }
 0x5cb   : > { %v1094_v22 = vsub.f32 %v1089_v61, %v1093_v21  ;;  %1705 = vmatpush.msra.mxu2 %v2845_v54 }
 0x5cc   : > { %2324 = vmatmul.msk.f32.vlgmr.msrb.gmra.mxu2 %vm1374_vm9, %v3014_v40 }
 0x5cd   : > { %v1095_v23 = vmul.f32 1.442695, %v1094_v22  ;;  %1706 = vmatpush.msra.mxu2 %v2857_v55 }
 0x5cf   : > { %2422 = vpow2.f32 %v1095_v23  ;;  %1707 = vmatpush.msra.mxu2 %v2863_v56 }
 0x5d1   : > { %1708 = vmatpush.msra.mxu2 %v2869_v57 }
 0x5d3   : > { %1709 = vmatpush.msra.mxu2 %v2877_v58 }
 0x5d5   : > { %v2423_v28 = vpop.eup %2422  ;;  %2336 = vmatpush.msk.msrb.mxu2 %vm987_vm8, %v2959_v62 }
 0x5d6   : > { %v1097_v29 = vsel %vm955_vm5, %v2423_v28, 0.0 }
 0x5d7   : > { %v1267_v24 = vpop.f32.mrf.mxu3 }
 0x5d8   : > { %v1268_v26 = vadd.f32 %v2907_v3, %v1267_v24 }
 0x5da   : > { %v1270_v27 = vsel %vm955_vm5, %v1268_v26, -inf }
 0x5db   : > { %1271 = vmax.xlane.f32.xlu0 %v1270_v27 }
 0x5df   : > { %v1483_v23 = vpop.f32.mrf.mxu3 }
 0x5e3   : > { %1098 = vadd.xlane.f32.xlu0 %v1097_v29 }
 0x637   : > { %v2991_v32 = vpop.f32.mrf.mxu2 }
 0x63f   : > { %v1218_v33 = vpop.f32.mrf.mxu2 }
 0x640   : > { %v1219_v34 = vadd.f32 %v2907_v3, %v1218_v33 }
 0x642   : > { %v1221_v35 = vsel %vm955_vm5, %v1219_v34, -inf }
 0x643   : > { %1222 = vmax.xlane.f32.xlu1 %v1221_v35 }
 0x647   : > { %v1461_v8 = vpop.f32.mrf.mxu2 }
 0x648   : > { %1555 = vrot.lane.b32.xlu0 %v1461_v8, %s2586_s25 }
 0x64e   : > { %v1272_v37 = vpop.xlane.xlu0 %1271 }
 0x64f   : > { %v1273_v38 = vsub.f32 %v1268_v26, %v1272_v37 }
 0x651   : > { %v1274_v39 = vmul.f32 1.442695, %v1273_v38 }
 0x653   : > { %2424 = vpow2.f32 %v1274_v39 }
 0x656   : > { %v1099_v41 = vpop.xlane.xlu0 %1098 }
 0x657   : > { %2426 = vrcp.f32 %v1099_v41  ;;  %v1111_v48 = vand.u32 2147483648, %v1099_v41  ;;  %v1109_v59 = vand.u32 2147483647, %v1099_v41  ;;  %vm1105_vm11 = vweird.f32 %v1099_v41 }
 0x659   : > { %v2425_v42 = vpop.eup %2424  ;;  %v1112_v61 = vor.u32 1.1754944e-38, %v1111_v48  ;;  %vm1110_vm14 = vcmp.eq.f32.partialorder %v1109_v59, 8.507059e+37 }
 0x65a   : > { %v1276_v43 = vsel %vm955_vm5, %v2425_v42, 0.0 }
 0x65b   : > { %1277 = vadd.xlane.f32.xlu1 %v1276_v43 }
 0x65d   : > { %v2427_v44 = vpop.eup %2426 }
 0x65e   : > { %v1101_v45 = vmul.f32 %v2427_v44, %v1099_v41  ;;  %vm1106_vm10 = vweird.f32 %v2427_v44 }
 0x65f   : > { %vm1107_vm12 = vmor %vm1105_vm11, %vm1106_vm10 }
 0x660   : > { %v1102_v46 = vsub.f32 1.0, %v1101_v45 }
 0x662   : > { %v1103_v50 = vmul.f32 %v2427_v44, %v1102_v46 }
 0x664   : > { %v1104_v60 = vadd.f32 %v2427_v44, %v1103_v50 }
 0x666   : > { %v1108_v63 = vsel %vm1107_vm12, %v2427_v44, %v1104_v60 }
 0x667   : > { %v1113_v0 = vsel %vm1110_vm14, %v1112_v61, %v1108_v63 }
 0x668   : > { %v1114_v1 = vmul.f32 %v2423_v28, %v1113_v0 }
 0x66a   : > { %v1146_v2 = vadd.f32 1e-06, %v1114_v1 }
 0x66c   : > { %2428 = vlog2.f32 %v1146_v2 }
 0x672   : > { %v2429_v4 = vpop.eup %2428 }
 0x673   : > { %v1148_v5 = vmul.f32 0.6931472, %v2429_v4 }
 0x674   : > { %1637 = vrot.lane.b32.xlu1 %v1483_v23, %s2586_s25 }
 0x675   : > { %2304 = vmatmul.msk.f32.vlgmr.msra.gmra.mxu1 %vm983_vm13, %v1148_v5 }
 0x676   : > { %2313 = vmatpush.msk.msra.mxu1 %vm728_vm1, %v2791_v13 }
 0x6b6   : > { %v1223_v6 = vpop.xlane.xlu1 %1222 }
 0x6b7   : > { %v1224_v7 = vsub.f32 %v1219_v34, %v1223_v6  ;;  %v722_v34 = vld [vmem:[%s3264_s14] sm:$0xf] }
 0x6b8   : > { %2311 = vmatpush.msk.msra.mxu0 %vm728_vm1, %v722_v34 }
 0x6b9   : > { %v1225_v9 = vmul.f32 1.442695, %v1224_v7 }
 0x6ba   : > { %v3057_v31 = vpop.permute.xlu0 %1555 }
 0x6bb   : > { %2430 = vpow2.f32 %v1225_v9  ;;  %v1689_v33 = vsel %vm686_vm0, %v1483_v23, %v3057_v31  ;;  %v1144_v9 = vmul.f32 1.442695, %v2991_v32 }
 0x6c1   : > { %v3029_v10 = vpop.eup %2430 }
 0x6c2   : > { %v1227_v12 = vsel %vm955_vm5, %v3029_v10, 0.0 }
 0x6c3   : > { %1228 = vadd.xlane.f32.xlu2 %v1227_v12 }
 0x6ce   : > { %v1278_v14 = vpop.xlane.xlu1 %1277 }
 0x6cf   : > { %2432 = vrcp.f32 %v1278_v14  ;;  %v1290_v18 = vand.u32 2147483648, %v1278_v14  ;;  %v1288_v19 = vand.u32 2147483647, %v1278_v14  ;;  %vm1284_vm6 = vweird.f32 %v1278_v14 }
 0x6d1   : > { %v1291_v21 = vor.u32 1.1754944e-38, %v1290_v18  ;;  %vm1289_vm10 = vcmp.eq.f32.partialorder %v1288_v19, 8.507059e+37 }
 0x6d5   : > { %v2433_v15 = vpop.eup %2432 }
 0x6d6   : > { %v1280_v16 = vmul.f32 %v2433_v15, %v1278_v14  ;;  %vm1285_vm2 = vweird.f32 %v2433_v15 }
 0x6d7   : > { %vm1286_vm7 = vmor %vm1284_vm6, %vm1285_vm2 }
 0x6d8   : > { %v1281_v17 = vsub.f32 1.0, %v1280_v16 }
 0x6da   : > { %v1282_v13 = vmul.f32 %v2433_v15, %v1281_v17 }
 0x6dc   : > { %v1283_v20 = vadd.f32 %v2433_v15, %v1282_v13 }
 0x6de   : > { %v1287_v22 = vsel %vm1286_vm7, %v2433_v15, %v1283_v20 }
 0x6df   : > { %v1292_v24 = vsel %vm1289_vm10, %v1291_v21, %v1287_v22 }
 0x6e0   : > { %v1293_v26 = vmul.f32 %v2425_v42, %v1292_v24 }
 0x6e2   : > { %v1322_v27 = vadd.f32 1e-06, %v1293_v26 }
 0x6e4   : > { %2434 = vlog2.f32 %v1322_v27 }
 0x6e5   : > { %2436 = vtanh.f32 %v1689_v33 }
 0x6e6   : > { %v1638_v2 = vpop.permute.xlu1 %1637 }
 0x6ea   : > { %v2435_v28 = vpop.eup %2434 }
 0x6eb   : > { %v1324_v29 = vmul.f32 0.6931472, %v2435_v28  ;;  %v2437_v35 = vpop.eup %2436 }
 0x6ec   : > { %2329 = vmatmul.msk.f32.vlgmr.msra.gmra.mxu2 %vm931_vm15, %v2437_v35 }
 0x6ed   : > { %2310 = vmatmul.msk.f32.vlgmr.msrb.gmra.mxu1 %vm983_vm13, %v1324_v29  ;;  %2340 = vmatpush.msk.msra.mxu2 %vm728_vm1, %v722_v34 }
 0x6ee   : > { %2321 = vmatpush.msk.msrb.mxu1 %vm728_vm1, %v2815_v47 }
 0x6f2   : > { %v1172_v0 = vpop.f32.mrf.mxu1 }
 0x6f5   : > { %2314 = vmatmul.msk.f32.vlgmr.msra.gmra.mxu1 %vm1374_vm9, %v3014_v40 }
 0x6f6   : > { %1653 = vmatpush.msra.mxu1 %v2825_v51 }
 0x6f8   : > { %1654 = vmatpush.msra.mxu1 %v2830_v52 }
 0x6fa   : > { %1655 = vmatpush.msra.mxu1 %v2837_v53 }
 0x6fc   : > { %1656 = vmatpush.msra.mxu1 %v2845_v54 }
 0x6fd   : > { %2322 = vmatmul.msk.f32.vlgmr.msrb.gmra.mxu1 %vm1374_vm9, %v3014_v40 }
 0x6fe   : > { %1657 = vmatpush.msra.mxu1 %v2857_v55 }
 0x700   : > { %1658 = vmatpush.msra.mxu1 %v2863_v56 }
 0x702   : > { %1659 = vmatpush.msra.mxu1 %v2869_v57 }
 0x704   : > { %1660 = vmatpush.msra.mxu1 %v2877_v58 }
 0x706   : > { %1880 = vmatpush.msrb.mxu1 %v2825_v51 }
 0x708   : > { %1881 = vmatpush.msrb.mxu1 %v2830_v52 }
 0x70a   : > { %1882 = vmatpush.msrb.mxu1 %v2837_v53 }
 0x70c   : > { %1883 = vmatpush.msrb.mxu1 %v2845_v54 }
 0x70e   : > { %1884 = vmatpush.msrb.mxu1 %v2857_v55 }
 0x710   : > { %1885 = vmatpush.msrb.mxu1 %v2863_v56 }
 0x712   : > { %1886 = vmatpush.msrb.mxu1 %v2869_v57 }
 0x714   : > { %1887 = vmatpush.msrb.mxu1 %v2877_v58 }
 0x736   : > { %v1229_v37 = vpop.xlane.xlu2 %1228 }
 0x737   : > { %2438 = vrcp.f32 %v1229_v37  ;;  %v1241_v42 = vand.u32 2147483648, %v1229_v37  ;;  %v1239_v44 = vand.u32 2147483647, %v1229_v37  ;;  %vm1235_vm11 = vweird.f32 %v1229_v37 }
 0x739   : > { %v1242_v46 = vor.u32 1.1754944e-38, %v1241_v42  ;;  %vm1240_vm14 = vcmp.eq.f32.partialorder %v1239_v44, 8.507059e+37 }
 0x73d   : > { %v2439_v38 = vpop.eup %2438 }
 0x73e   : > { %v1231_v39 = vmul.f32 %v2439_v38, %v1229_v37  ;;  %vm1236_vm5 = vweird.f32 %v2439_v38 }
 0x73f   : > { %vm1237_vm12 = vmor %vm1235_vm11, %vm1236_vm5  ;;  %vm1583_vm5 = vcmask 21504  }
 0x740   : > { %v1232_v41 = vsub.f32 1.0, %v1231_v39 }
 0x742   : > { %v1233_v43 = vmul.f32 %v2439_v38, %v1232_v41 }
 0x744   : > { %v1234_v45 = vadd.f32 %v2439_v38, %v1233_v43 }
 0x746   : > { %v1238_v48 = vsel %vm1237_vm12, %v2439_v38, %v1234_v45 }
 0x747   : > { %v1243_v50 = vsel %vm1240_vm14, %v1242_v46, %v1238_v48 }
 0x748   : > { %v1244_v59 = vmul.f32 %v3029_v10, %v1243_v50 }
 0x74a   : > { %v1294_v60 = vadd.f32 1e-06, %v1244_v59  ;;  %v3085_v59 = vpop.f32.mrf.mxu2 }
 0x74c   : > { %2440 = vlog2.f32 %v1294_v60 }
 0x752   : > { %v2441_v61 = vpop.eup %2440 }
 0x753   : > { %v1296_v63 = vmul.f32 0.6931472, %v2441_v61 }
 0x755   : > { %2308 = vmatmul.msk.f32.vlgmr.msrb.gmra.mxu0 %vm983_vm13, %v1296_v63 }
 0x756   : > { %2319 = vmatpush.msk.msrb.mxu0 %vm728_vm1, %v2938_v49  ;;  %v1175_v49 = vmul.f32 1.442695, %v1172_v0 }
 0x76a   : > { %v1345_v1 = vpop.f32.mrf.mxu1 }
 0x76b   : > { %v1348_v16 = vmul.f32 1.442695, %v1345_v1 }
 0x76f   : > { %v1711_v0 = vpop.f32.mrf.mxu2 }
 0x770   : > { %v3091_v1 = vadd.f32 %v2907_v3, %v1711_v0 }
 0x772   : > { %v3071_v4 = vpop.f32.mrf.mxu1 }
 0x773   : > { %v1558_v5 = vsel %vm686_vm0, %v3071_v4, %v3057_v31  ;;  %v1640_v6 = vsel %vm686_vm0, %v3071_v4, %v1638_v2 }
 0x774   : > { %2442 = vtanh.f32 %v1558_v5 }
 0x775   : > { %2444 = vtanh.f32 %v1640_v6 }
 0x776   : > { %2446 = vpow2.f32 %v1175_v49 }
 0x777   : > { %2448 = vpow2.f32 %v1144_v9 }
 0x77a   : > { %v2443_v7 = vpop.eup %2442 }
 0x77b   : > { %v2445_v8 = vpop.eup %2444  ;;  %2325 = vmatmul.msk.f32.vlgmr.msrb.gmra.mxu3 %vm931_vm15, %v2443_v7  ;;  %v1011_v7 = vmul.f32 1.442695, %v2984_v30 }
 0x77c   : > { %2328 = vmatmul.msk.f32.vlgmr.msra.gmra.mxu1 %vm931_vm15, %v2445_v8  ;;  %2338 = vmatpush.msk.msrb.mxu3 %vm987_vm8, %v3005_v36  ;;  %v2447_v10 = vpop.eup %2446 }
 0x77d   : > { %v2449_v12 = vpop.eup %2448 }
 0x77e   : > { %v1177_v14 = vmul.f32 %v2449_v12, %v2447_v10 }
 0x780   : > { %2450 = vrsqrt.f32 %v1177_v14  ;;  %vm1185_vm2 = vcmp.eq.f32.partialorder %v1177_v14, inf  ;;  %v1188_v35 = vand.u32 2147483648, %v1177_v14  ;;  %vm1187_vm6 = vcmp.eq.f32.partialorder %v1177_v14, 0.0 }
 0x781   : > { %2452 = vpow2.f32 %v1348_v16 }
 0x786   : > { %v2451_v15 = vpop.eup %2450 }
 0x787   : > { %v1179_v13 = vmul.f32 %v2451_v15, %v1177_v14  ;;  %v2453_v20 = vpop.eup %2452 }
 0x789   : > { %v1180_v19 = vmul.f32 %v2451_v15, %v1179_v13 }
 0x78b   : > { %v1181_v36 = vmul.f32 0.5, %v1180_v19 }
 0x78d   : > { %v1182_v32 = vsub.f32 1.5, %v1181_v36 }
 0x78f   : > { %v1183_v23 = vmul.f32 %v2451_v15, %v1182_v32 }
 0x791   : > { %v1184_v27 = vmul.f32 %v1183_v23, %v1177_v14 }
 0x793   : > { %v1186_v33 = vsel %vm1185_vm2, %v1177_v14, %v1184_v27 }
 0x794   : > { %v1189_v38 = vsel %vm1187_vm6, %v1188_v35, %v1186_v33 }
 0x795   : > { %v1190_v42 = vmin.f32 %v1189_v38, 1.0 }
 0x797   : > { %v1191_v46 = vmul.f32 %v1190_v42, %v2815_v47  ;;  %v1714_v47 = vsel %vm1583_vm5, %v3091_v1, -inf }
 0x7d2   : > { %v1317_v17 = vpop.f32.mrf.mxu0 }
 0x7d3   : > { %v1320_v18 = vmul.f32 1.442695, %v1317_v17 }
 0x7d5   : > { %2454 = vpow2.f32 %v1320_v18 }
 0x7db   : > { %v2455_v21 = vpop.eup %2454 }
 0x7dc   : > { %v1350_v22 = vmul.f32 %v2455_v21, %v2453_v20 }
 0x7de   : > { %2456 = vrsqrt.f32 %v1350_v22  ;;  %vm1358_vm7 = vcmp.eq.f32.partialorder %v1350_v22, inf  ;;  %v1361_v41 = vand.u32 2147483648, %v1350_v22  ;;  %vm1360_vm10 = vcmp.eq.f32.partialorder %v1350_v22, 0.0 }
 0x7df   : > { %2458 = vpow2.f32 %v1011_v7 }
 0x7e4   : > { %v2457_v24 = vpop.eup %2456 }
 0x7e5   : > { %v1352_v26 = vmul.f32 %v2457_v24, %v1350_v22  ;;  %v2459_v8 = vpop.eup %2458 }
 0x7e7   : > { %v1353_v28 = vmul.f32 %v2457_v24, %v1352_v26 }
 0x7e9   : > { %v1354_v29 = vmul.f32 0.5, %v1353_v28 }
 0x7eb   : > { %v1355_v34 = vsub.f32 1.5, %v1354_v29 }
 0x7ed   : > { %v1356_v37 = vmul.f32 %v2457_v24, %v1355_v34 }
 0x7ef   : > { %v1357_v39 = vmul.f32 %v1356_v37, %v1350_v22 }
 0x7f1   : > { %v1359_v43 = vsel %vm1358_vm7, %v1350_v22, %v1357_v39 }
 0x7f2   : > { %v1362_v44 = vsel %vm1360_vm10, %v1361_v41, %v1359_v43 }
 0x7f3   : > { %v1363_v45 = vmin.f32 %v1362_v44, 1.0 }
 0x7f5   : > { %v1364_v48 = vmul.f32 %v1363_v45, %v2916_v11  ;;  %v3095_v11 = vpop.f32.mrf.mxu1 }
 0x7f7   : > { %v1365_v50 = vmax.f32 %v1191_v46, %v1364_v48 }
 0x7f9   : > { %1367 = vrot.lane.b32.xlu0 %v1365_v50, %s2588_s26 }
 0x7fd   : > { %v1662_v2 = vpop.f32.mrf.mxu1 }
 0x7fe   : > { %v1580_v60 = vpop.f32.mrf.mxu3  ;;  %v1663_v5 = vadd.f32 %v2907_v3, %v1662_v2 }
 0x7ff   : > { %v1581_v61 = vadd.f32 %v2907_v3, %v1580_v60 }
 0x800   : > { %v1665_v6 = vsel %vm1583_vm5, %v1663_v5, -inf }
 0x801   : > { %v1584_v63 = vsel %vm1583_vm5, %v1581_v61, -inf }
 0x802   : > { %1585 = vmax.xlane.f32.xlu1 %v1584_v63 }
 0x80a   : > { %1715 = vmax.xlane.f32.xlu1 %v1714_v47 }
 0x823   : > { %1666 = vmax.xlane.f32.xlu0 %v1665_v6 }
 0x86b   : > { %v1368_v49 = vpop.permute.xlu0 %1367 }
 0x86c   : > { %v1370_v9 = vsel %vm791_vm4, %v2459_v8, %v1368_v49 }
 0x86d   : > { %v1371_v10 = vadd.f32 1e-06, %v1370_v9 }
 0x86f   : > { %2460 = vlog2.f32 %v1371_v10 }
 0x875   : > { %v2461_v12 = vpop.eup %2460  ;;  %v1586_v14 = vpop.xlane.xlu1 %1585 }
 0x876   : > { %v1373_v15 = vmul.f32 0.6931472, %v2461_v12  ;;  %v1587_v16 = vsub.f32 %v1581_v61, %v1586_v14 }
 0x878   : > { %v1588_v17 = vmul.f32 1.442695, %v1587_v16  ;;  %2312 = vmatmul.msk.f32.vlgmr.msra.gmra.mxu0 %vm1374_vm9, %v1373_v15 }
 0x879   : > { %2326 = vmatpush.msk.msra.mxu0 %vm987_vm8, %v2930_v25 }
 0x87a   : > { %2462 = vpow2.f32 %v1588_v17 }
 0x87d   : > { %v1716_v6 = vpop.xlane.xlu1 %1715 }
 0x87e   : > { %v1717_v8 = vsub.f32 %v3091_v1, %v1716_v6 }
 0x880   : > { %v2463_v18 = vpop.eup %2462  ;;  %2320 = vmatmul.msk.f32.vlgmr.msrb.gmra.mxu0 %vm1374_vm9, %v3014_v40  ;;  %v1718_v49 = vmul.f32 1.442695, %v1717_v8 }
 0x881   : > { %v1590_v30 = vsel %vm1583_vm5, %v2463_v18, 0.0  ;;  %2330 = vmatpush.msk.msrb.mxu0 %vm987_vm8, %v2959_v62 }
 0x882   : > { %1591 = vadd.xlane.f32.xlu2 %v1590_v30 }
 0x896   : > { %v1667_v13 = vpop.xlane.xlu0 %1666 }
 0x897   : > { %v1668_v19 = vsub.f32 %v1663_v5, %v1667_v13 }
 0x899   : > { %v1669_v20 = vmul.f32 1.442695, %v1668_v19 }
 0x89b   : > { %2464 = vpow2.f32 %v1669_v20 }
 0x8a1   : > { %v2465_v21 = vpop.eup %2464 }
 0x8a2   : > { %v1671_v36 = vsel %vm1583_vm5, %v2465_v21, 0.0 }
 0x8a3   : > { %1672 = vadd.xlane.f32.xlu2 %v1671_v36 }
 0x8f5   : > { %v1592_v25 = vpop.xlane.xlu2 %1591  ;;  %v3110_v22 = vpop.f32.mrf.mxu0 }
 0x8f6   : > { %2466 = vrcp.f32 %v1592_v25  ;;  %v1604_v26 = vand.u32 2147483648, %v1592_v25  ;;  %v1602_v28 = vand.u32 2147483647, %v1592_v25  ;;  %vm1598_vm11 = vweird.f32 %v1592_v25 }
 0x8f7   : > { %v1401_v15 = vmul.f32 1.442695, %v3110_v22 }
 0x8f8   : > { %v1605_v33 = vor.u32 1.1754944e-38, %v1604_v26  ;;  %vm1603_vm14 = vcmp.eq.f32.partialorder %v1602_v28, 8.507059e+37 }
 0x8fc   : > { %v2467_v32 = vpop.eup %2466 }
 0x8fd   : > { %v1594_v40 = vmul.f32 %v2467_v32, %v1592_v25  ;;  %v1505_v23 = vpop.f32.mrf.mxu0  ;;  %vm1599_vm8 = vweird.f32 %v2467_v32 }
 0x8fe   : > { %v1867_v24 = vsel %vm686_vm0, %v1505_v23, %v3057_v31  ;;  %1815 = vrot.lane.b32.xlu2 %v1505_v23, %s2586_s25  ;;  %vm1600_vm12 = vmor %vm1598_vm11, %vm1599_vm8  ;;  %s2589_s25 = smov 116  }
 0x8ff   : > { %v1595_v62 = vsub.f32 1.0, %v1594_v40  ;;  %2468 = vtanh.f32 %v1867_v24 }
 0x901   : > { %v1596_v27 = vmul.f32 %v2467_v32, %v1595_v62 }
 0x903   : > { %v1597_v29 = vadd.f32 %v2467_v32, %v1596_v27 }
 0x905   : > { %v2469_v34 = vpop.eup %2468  ;;  %v1601_v35 = vsel %vm1600_vm12, %v2467_v32, %v1597_v29 }
 0x906   : > { %v1606_v37 = vsel %vm1603_vm14, %v1605_v33, %v1601_v35  ;;  %2335 = vmatmul.msk.f32.vlgmr.msrb.gmra.mxu1 %vm931_vm15, %v2469_v34 }
 0x907   : > { %v1607_v38 = vmul.f32 %v2463_v18, %v1606_v37 }
 0x909   : > { %v1608_v31 = vadd.f32 1e-06, %v1607_v38 }
 0x90b   : > { %2470 = vlog2.f32 %v1608_v31 }
 0x911   : > { %v2471_v39 = vpop.eup %2470 }
 0x912   : > { %v1610_v41 = vmul.f32 0.6931472, %v2471_v39 }
 0x914   : > { %2327 = vmatmul.msk.f32.vlgmr.msra.gmra.mxu0 %vm983_vm13, %v1610_v41 }
 0x915   : > { %1831 = vmatpush.msra.mxu0 %v2825_v51 }
 0x916   : > { %v1673_v42 = vpop.xlane.xlu2 %1672 }
 0x917   : > { %2472 = vrcp.f32 %v1673_v42  ;;  %1832 = vmatpush.msra.mxu0 %v2830_v52  ;;  %v1685_v46 = vand.u32 2147483648, %v1673_v42  ;;  %v1683_v51 = vand.u32 2147483647, %v1673_v42  ;;  %vm1679_vm6 = vweird.f32 %v1673_v42 }
 0x919   : > { %1833 = vmatpush.msra.mxu0 %v2837_v53  ;;  %v1686_v53 = vor.u32 1.1754944e-38, %v1685_v46  ;;  %vm1684_vm10 = vcmp.eq.f32.partialorder %v1683_v51, 8.507059e+37 }
 0x91b   : > { %1834 = vmatpush.msra.mxu0 %v2845_v54 }
 0x91d   : > { %v2473_v43 = vpop.eup %2472  ;;  %1835 = vmatpush.msra.mxu0 %v2857_v55 }
 0x91e   : > { %v1675_v44 = vmul.f32 %v2473_v43, %v1673_v42  ;;  %vm1680_vm2 = vweird.f32 %v2473_v43 }
 0x91f   : > { %1836 = vmatpush.msra.mxu0 %v2863_v56  ;;  %vm1681_vm7 = vmor %vm1679_vm6, %vm1680_vm2 }
 0x920   : > { %v1676_v45 = vsub.f32 1.0, %v1675_v44 }
 0x921   : > { %1837 = vmatpush.msra.mxu0 %v2869_v57 }
 0x922   : > { %v1677_v48 = vmul.f32 %v2473_v43, %v1676_v45 }
 0x923   : > { %1838 = vmatpush.msra.mxu0 %v2877_v58 }
 0x924   : > { %v1678_v52 = vadd.f32 %v2473_v43, %v1677_v48 }
 0x926   : > { %v1682_v54 = vsel %vm1681_vm7, %v2473_v43, %v1678_v52 }
 0x927   : > { %v1687_v50 = vsel %vm1684_vm10, %v1686_v53, %v1682_v54  ;;  %vm2094_vm10 = vcmask 48128  }
 0x928   : > { %v1688_v55 = vmul.f32 %v2465_v21, %v1687_v50  ;;  %v3154_v21 = vld [vmem:[%s667_s27] sm:$0xf] }
 0x92a   : > { %v1738_v60 = vadd.f32 1e-06, %v1688_v55 }
 0x92c   : > { %2474 = vlog2.f32 %v1738_v60 }
 0x932   : > { %v2475_v56 = vpop.eup %2474 }
 0x933   : > { %v1740_v61 = vmul.f32 0.6931472, %v2475_v56 }
 0x935   : > { %2331 = vmatmul.msk.f32.vlgmr.msrb.gmra.mxu0 %vm983_vm13, %v1740_v61 }
 0x958   : > { %v1816_v57 = vpop.permute.xlu2 %1815 }
 0x959   : > { %v1818_v63 = vsel %vm686_vm0, %v3071_v4, %v1816_v57  ;;  %vm2040_vm0 = vcmask 44032  }
 0x95a   : > { %2476 = vtanh.f32 %v1818_v63  ;;  %v2041_v25 = vsel %vm2040_vm0, %v3154_v21, 0.0 }
 0x95b   : > { %2478 = vpow2.f32 %v1718_v49 }
 0x95c   : > { %2480 = vpow2.f32 %v1401_v15 }
 0x960   : > { %v2477_v58 = vpop.eup %2476 }
 0x961   : > { %2334 = vmatmul.msk.f32.vlgmr.msra.gmra.mxu0 %vm931_vm15, %v2477_v58  ;;  %v2479_v12 = vpop.eup %2478 }
 0x962   : > { %v1720_v14 = vsel %vm1583_vm5, %v2479_v12, 0.0  ;;  %v3141_v1 = vpop.eup %2480 }
 0x983   : > { %v1889_v0 = vpop.f32.mrf.mxu1 }
 0x984   : > { %v1890_v47 = vadd.f32 %v2907_v3, %v1889_v0 }
 0x986   : > { %v1892_v2 = vsel %vm1583_vm5, %v1890_v47, -inf }
 0x987   : > { %1893 = vmax.xlane.f32.xlu1 %v1892_v2 }
 0x991   : > { %v3131_v5 = vpop.f32.mrf.mxu0 }
 0x9b2   : > { %v3133_v7 = vpop.f32.mrf.mxu0 }
 0x9de   : > { %v1840_v9 = vpop.f32.mrf.mxu0 }
 0x9df   : > { %v1841_v4 = vadd.f32 %v2907_v3, %v1840_v9 }
 0x9e1   : > { %v1843_v10 = vsel %vm1583_vm5, %v1841_v4, -inf }
 0x9e2   : > { %1844 = vmax.xlane.f32.xlu0 %v1843_v10 }
 0x9ea   : > { %1721 = vadd.xlane.f32.xlu0 %v1720_v14 }
 0x9fa   : > { %v1894_v16 = vpop.xlane.xlu1 %1893 }
 0x9fb   : > { %v1895_v17 = vsub.f32 %v1890_v47, %v1894_v16 }
 0x9fd   : > { %v1896_v18 = vmul.f32 1.442695, %v1895_v17 }
 0x9fe   : > { %1810 = vperm.xlu0 %2393, %v3095_v11  }
 0x9ff   : > { %2482 = vpow2.f32 %v1896_v18 }
 0xa05   : > { %v2483_v3 = vpop.eup %2482 }
 0xa06   : > { %1408 = vrot.lane.b32.xlu0 %v3141_v1, %s2589_s25  ;;  %v1898_v30 = vsel %vm1583_vm5, %v2483_v3, 0.0 }
 0xa07   : > { %1899 = vadd.xlane.f32.xlu1 %v1898_v30 }
 0xa0e   : > { %1412 = vrot.lane.b32.xlu0 %v3141_v1, %s2590_s29 }
 0xa20   : > { %1988 = vperm.xlu1 %2394, %v3085_v59  }
 0xa38   : > { %2042 = vadd.xlane.f32.xlu0 %v2041_v25 }
 0xa55   : > { %v1845_v13 = vpop.xlane.xlu0 %1844 }
 0xa56   : > { %v1846_v19 = vsub.f32 %v1841_v4, %v1845_v13 }
 0xa58   : > { %v1847_v11 = vmul.f32 1.442695, %v1846_v19 }
 0xa5a   : > { %2484 = vpow2.f32 %v1847_v11  ;;  %v1764_v11 = vmul.f32 1.442695, %v3133_v7 }
 0xa5d   : > { %v1722_v20 = vpop.xlane.xlu0 %1721 }
 0xa5e   : > { %2486 = vrcp.f32 %v1722_v20  ;;  %v1734_v23 = vand.u32 2147483648, %v1722_v20  ;;  %v1732_v62 = vand.u32 2147483647, %v1722_v20  ;;  %vm1728_vm8 = vweird.f32 %v1722_v20 }
 0xa60   : > { %v3156_v36 = vpop.eup %2484  ;;  %v1735_v27 = vor.u32 1.1754944e-38, %v1734_v23  ;;  %vm1733_vm12 = vcmp.eq.f32.partialorder %v1732_v62, 8.507059e+37 }
 0xa61   : > { %v1849_v59 = vsel %vm1583_vm5, %v3156_v36, 0.0 }
 0xa62   : > { %1850 = vadd.xlane.f32.xlu2 %v1849_v59 }
 0xa64   : > { %v2487_v22 = vpop.eup %2486 }
 0xa65   : > { %v1724_v32 = vmul.f32 %v2487_v22, %v1722_v20  ;;  %vm1729_vm15 = vweird.f32 %v2487_v22 }
 0xa66   : > { %vm1730_vm11 = vmor %vm1728_vm8, %vm1729_vm15  ;;  %vm2044_vm15 = vcmp.gt.f32.partialorder %v3154_v21, 0.5 }
 0xa67   : > { %v1725_v40 = vsub.f32 1.0, %v1724_v32 }
 0xa69   : > { %v1726_v24 = vmul.f32 %v2487_v22, %v1725_v40 }
 0xa6b   : > { %v1727_v26 = vadd.f32 %v2487_v22, %v1726_v24 }
 0xa6d   : > { %v1731_v28 = vsel %vm1730_vm11, %v2487_v22, %v1727_v26 }
 0xa6e   : > { %v1736_v29 = vsel %vm1733_vm12, %v1735_v27, %v1731_v28 }
 0xa6f   : > { %v1737_v33 = vmul.f32 %v2479_v12, %v1736_v29 }
 0xa70   : > { %v3166_v55 = vpop.permute.xlu0 %1810 }
 0xa71   : > { %v1766_v34 = vadd.f32 1e-06, %v1737_v33 }
 0xa73   : > { %2488 = vlog2.f32 %v1766_v34 }
 0xa78   : > { %v1409_v56 = vpop.permute.xlu0 %1408 }
 0xa79   : > { %v2489_v35 = vpop.eup %2488 }
 0xa7a   : > { %v1900_v37 = vpop.xlane.xlu1 %1899  ;;  %1404 = vrot.lane.b32.xlu2 %v3141_v1, %s2591_s20  ;;  %v1768_v38 = vmul.f32 0.6931472, %v2489_v35 }
 0xa7b   : > { %2490 = vrcp.f32 %v1900_v37  ;;  %v1912_v42 = vand.u32 2147483648, %v1900_v37  ;;  %v1910_v44 = vand.u32 2147483647, %v1900_v37  ;;  %vm1906_vm14 = vweird.f32 %v1900_v37 }
 0xa7c   : > { %2333 = vmatmul.msk.f32.vlgmr.msra.gmra.mxu3 %vm983_vm13, %v1768_v38 }
 0xa7d   : > { %v1913_v46 = vor.u32 1.1754944e-38, %v1912_v42  ;;  %vm1911_vm6 = vcmp.eq.f32.partialorder %v1910_v44, 8.507059e+37 }
 0xa80   : > { %v1413_v6 = vpop.permute.xlu0 %1412 }
 0xa81   : > { %v2491_v31 = vpop.eup %2490 }
 0xa82   : > { %v1902_v39 = vmul.f32 %v2491_v31, %v1900_v37  ;;  %vm1907_vm5 = vweird.f32 %v2491_v31 }
 0xa83   : > { %vm1908_vm2 = vmor %vm1906_vm14, %vm1907_vm5 }
 0xa84   : > { %v1903_v41 = vsub.f32 1.0, %v1902_v39 }
 0xa86   : > { %v1904_v43 = vmul.f32 %v2491_v31, %v1903_v41 }
 0xa88   : > { %v1905_v45 = vadd.f32 %v2491_v31, %v1904_v43 }
 0xa8a   : > { %v1909_v48 = vsel %vm1908_vm2, %v2491_v31, %v1905_v45 }
 0xa8b   : > { %v1914_v51 = vsel %vm1911_vm6, %v1913_v46, %v1909_v48  ;;  %vm2067_vm6 = vcmask 46080  }
 0xa8c   : > { %v1915_v52 = vmul.f32 %v2483_v3, %v1914_v51 }
 0xa8e   : > { %v1944_v53 = vadd.f32 1e-06, %v1915_v52 }
 0xa90   : > { %2492 = vlog2.f32 %v1944_v53 }
 0xa92   : > { %v1989_v53 = vpop.permute.xlu1 %1988 }
 0xa96   : > { %v2493_v54 = vpop.eup %2492 }
 0xa97   : > { %v1946_v50 = vmul.f32 0.6931472, %v2493_v54 }
 0xa99   : > { %2339 = vmatmul.msk.f32.vlgmr.msrb.gmra.mxu3 %vm983_vm13, %v1946_v50 }
 0xad5   : > { %v1851_v60 = vpop.xlane.xlu2 %1850 }
 0xad6   : > { %2494 = vrcp.f32 %v1851_v60  ;;  %v1863_v47 = vand.u32 2147483648, %v1851_v60  ;;  %v1861_v49 = vand.u32 2147483647, %v1851_v60  ;;  %vm1857_vm8 = vweird.f32 %v1851_v60 }
 0xad8   : > { %v1864_v10 = vor.u32 1.1754944e-38, %v1863_v47  ;;  %vm1862_vm12 = vcmp.eq.f32.partialorder %v1861_v49, 8.507059e+37 }
 0xadc   : > { %v2495_v61 = vpop.eup %2494 }
 0xadd   : > { %v1853_v57 = vmul.f32 %v2495_v61, %v1851_v60  ;;  %v1405_v63 = vpop.permute.xlu2 %1404  ;;  %vm1858_vm7 = vweird.f32 %v2495_v61 }
 0xade   : > { %v1407_v58 = vmax.f32 %v3141_v1, %v1405_v63  ;;  %vm1859_vm11 = vmor %vm1857_vm8, %vm1858_vm7 }
 0xadf   : > { %v1854_v0 = vsub.f32 1.0, %v1853_v57 }
 0xae0   : > { %v1411_v2 = vmax.f32 %v1407_v58, %v1409_v56  ;;  %v1634_v56 = vmul.f32 1.442695, %v3131_v5 }
 0xae1   : > { %v1855_v8 = vmul.f32 %v2495_v61, %v1854_v0 }
 0xae2   : > { %v1415_v9 = vmax.f32 %v1411_v2, %v1413_v6 }
 0xae3   : > { %v1856_v4 = vadd.f32 %v2495_v61, %v1855_v8 }
 0xae4   : > { %v2045_v12 = vsub.f32 1.0, %v1415_v9  ;;  %v2095_v14 = vsel %vm2094_vm10, %v1415_v9, 0.0 }
 0xae5   : > { %v1860_v15 = vsel %vm1859_vm11, %v2495_v61, %v1856_v4  ;;  %2096 = vst [vmem:[%s642_s5] sm:$0xf] %v2095_v14 }
 0xae6   : > { %v1865_v16 = vsel %vm1862_vm12, %v1864_v10, %v1860_v15  ;;  %v3179_v17 = vsel %vm2044_vm15, %v1415_v9, %v2045_v12  ;;  %v2043_v10 = vpop.xlane.xlu0 %2042 }
 0xae7   : > { %v1866_v18 = vmul.f32 %v3156_v36, %v1865_v16  ;;  %vm2052_vm7 = vcmp.gt.f32.partialorder %v2043_v10, 0.5 }
 0xae9   : > { %v1916_v1 = vadd.f32 1e-06, %v1866_v18 }
 0xaeb   : > { %2496 = vlog2.f32 %v1916_v1 }
 0xaf1   : > { %v2497_v3 = vpop.eup %2496 }
 0xaf2   : > { %v1918_v30 = vmul.f32 0.6931472, %v2497_v3 }
 0xaf4   : > { %2337 = vmatmul.msk.f32.vlgmr.msrb.gmra.mxu2 %vm983_vm13, %v1918_v30 }
 0xaff   : > { %v1789_v13 = vpop.f32.mrf.mxu3 }
 0xb00   : > { %v1792_v19 = vmul.f32 1.442695, %v1789_v13 }
 0xb02   : > { %2498 = vpow2.f32 %v1792_v19 }
 0xb03   : > { %2500 = vpow2.f32 %v1764_v11 }
 0xb08   : > { %v2499_v20 = vpop.eup %2498 }
 0xb09   : > { %v2501_v21 = vpop.eup %2500 }
 0xb0a   : > { %v1794_v25 = vmul.f32 %v2501_v21, %v2499_v20 }
 0xb0c   : > { %2502 = vrsqrt.f32 %v1794_v25  ;;  %vm1802_vm13 = vcmp.eq.f32.partialorder %v1794_v25, inf  ;;  %v1805_v41 = vand.u32 2147483648, %v1794_v25  ;;  %vm1804_vm5 = vcmp.eq.f32.partialorder %v1794_v25, 0.0 }
 0xb12   : > { %v2503_v22 = vpop.eup %2502 }
 0xb13   : > { %v1796_v23 = vmul.f32 %v2503_v22, %v1794_v25 }
 0xb15   : > { %v1797_v24 = vmul.f32 %v2503_v22, %v1796_v23 }
 0xb17   : > { %v1798_v27 = vmul.f32 0.5, %v1797_v24 }
 0xb19   : > { %v1799_v7 = vsub.f32 1.5, %v1798_v27 }
 0xb1b   : > { %v1800_v29 = vmul.f32 %v2503_v22, %v1799_v7 }
 0xb1c   : > { %v1967_v59 = vpop.f32.mrf.mxu3 }
 0xb1d   : > { %v1970_v32 = vmul.f32 1.442695, %v1967_v59  ;;  %v1801_v35 = vmul.f32 %v1800_v29, %v1794_v25 }
 0xb1f   : > { %2504 = vpow2.f32 %v1970_v32  ;;  %v1803_v31 = vsel %vm1802_vm13, %v1794_v25, %v1801_v35 }
 0xb20   : > { %v1806_v43 = vsel %vm1804_vm5, %v1805_v41, %v1803_v31 }
 0xb21   : > { %v1807_v46 = vmin.f32 %v1806_v43, 1.0 }
 0xb23   : > { %v1813_v54 = vmul.f32 %v3166_v55, %v1807_v46  ;;  %v2066_v55 = vld [vmem:[%s671_s23] sm:$0x3f]  ;;  %s2103_s23 = scalar_lea.sflag [#allocation3], %s640_s28 }
 0xb24   : > { %v2068_v5 = vsel %vm2067_vm6, %v2066_v55, 0.0  ;;  %vm2071_vm15 = vcmp.gt.f32.partialorder %v2066_v55, 0.5 }
 0xb25   : > { %v2505_v62 = vpop.eup %2504  ;;  %2069 = vadd.xlane.f32.xlu2 %v2068_v5 }
 0xb77   : > { %v1939_v36 = vpop.f32.mrf.mxu2 }
 0xb78   : > { %v1942_v40 = vmul.f32 1.442695, %v1939_v36 }
 0xb7a   : > { %2506 = vpow2.f32 %v1942_v40 }
 0xb80   : > { %v2507_v26 = vpop.eup %2506 }
 0xb81   : > { %v1972_v28 = vmul.f32 %v2507_v26, %v2505_v62 }
 0xb83   : > { %2508 = vrsqrt.f32 %v1972_v28  ;;  %vm1980_vm14 = vcmp.eq.f32.partialorder %v1972_v28, inf  ;;  %v1983_v45 = vand.u32 2147483648, %v1972_v28  ;;  %vm1982_vm2 = vcmp.eq.f32.partialorder %v1972_v28, 0.0 }
 0xb84   : > { %2510 = vpow2.f32 %v1634_v56 }
 0xb89   : > { %v2509_v33 = vpop.eup %2508 }
 0xb8a   : > { %v1974_v34 = vmul.f32 %v2509_v33, %v1972_v28  ;;  %v2511_v61 = vpop.eup %2510 }
 0xb8c   : > { %v1975_v37 = vmul.f32 %v2509_v33, %v1974_v34 }
 0xb8e   : > { %v1976_v38 = vmul.f32 0.5, %v1975_v37 }
 0xb90   : > { %v1977_v39 = vsub.f32 1.5, %v1976_v38 }
 0xb92   : > { %v1978_v42 = vmul.f32 %v2509_v33, %v1977_v39 }
 0xb94   : > { %v1979_v44 = vmul.f32 %v1978_v42, %v1972_v28 }
 0xb96   : > { %v1981_v48 = vsel %vm1980_vm14, %v1972_v28, %v1979_v44 }
 0xb97   : > { %v1984_v51 = vsel %vm1982_vm2, %v1983_v45, %v1981_v48 }
 0xb98   : > { %v1985_v52 = vmin.f32 %v1984_v51, 1.0  ;;  %v2070_v21 = vpop.xlane.xlu2 %2069 }
 0xb9a   : > { %v1991_v50 = vmul.f32 %v1989_v53, %v1985_v52 }
 0xb9c   : > { %v1992_v60 = vmax.f32 %v1813_v54, %v1991_v50 }
 0xb9e   : > { %1994 = vrot.lane.b32.xlu1 %v1992_v60, %s2588_s26 }
 0xc10   : > { %v1995_v57 = vpop.permute.xlu1 %1994 }
 0xc11   : > { %v1997_v63 = vsel %vm791_vm4, %v2511_v61, %v1995_v57 }
 0xc12   : > { %v1998_v58 = vadd.f32 1e-06, %v1997_v63 }
 0xc14   : > { %2512 = vlog2.f32 %v1998_v58 }
 0xc1a   : > { %v2513_v0 = vpop.eup %2512 }
 0xc1b   : > { %v2000_v47 = vmul.f32 0.6931472, %v2513_v0 }
 0xc1d   : > { %2341 = vmatmul.msk.f32.vlgmr.msra.gmra.mxu2 %vm1374_vm9, %v2000_v47 }
 0xca0   : > { %v2021_v2 = vpop.f32.mrf.mxu2 }
 0xca1   : > { %v2024_v6 = vmul.f32 1.442695, %v2021_v2 }
 0xca3   : > { %2514 = vpow2.f32 %v2024_v6 }
 0xca4   : > { %2516 = vlog2.f32 %v3179_v17 }
 0xca9   : > { %v2515_v8 = vpop.eup %2514 }
 0xcaa   : > { %2027 = vrot.lane.b32.xlu1 %v2515_v8, %s2591_s20  ;;  %v2517_v49 = vpop.eup %2516 }
 0xcab   : > { %v2048_v9 = vmul.f32 0.6931472, %v2517_v49 }
 0xcad   : > { %v2049_v4 = vsub.f32 0.0, %v2048_v9 }
 0xcaf   : > { %vm2050_vm9 = vcmp.ne.f32.partialorder %v2049_v4, %v2049_v4 }
 0xcb0   : > { %v2051_v12 = vsel %vm2050_vm9, 0.0, %v2049_v4 }
 0xcb1   : > { %v2055_v14 = vsel %vm2052_vm7, %v2051_v12, 0.0 }
 0xcb2   : > { %2031 = vrot.lane.b32.xlu1 %v2515_v8, %s2589_s25  ;;  %v2056_v15 = vsel %vm2040_vm0, %v2055_v14, 0.0  ;;  %vm2079_vm0 = vcmp.gt.f32.partialorder %v2070_v21, 0.5 }
 0xcba   : > { %2035 = vrot.lane.b32.xlu1 %v2515_v8, %s2590_s29  ;;  %s675_s29 = scalar_lea.vmem %s3268_s18, %s2282_s10  ;;  %s2120_s10 = scalar_lea.hbm %s3267_s17, %s2343_s24 }
 0xcbb   : > { %s2124_s22 = sshll.u32 %s2120_s10, 4  ;;  %s2125_s22 = int_to_ptr.hbm [resolvable:$true] %s2124_s22 }
 0xcbc   : > { %s2534_s26 = sshra.s32 %s2125_s22, 4  ;;  %s2535_s26 = int_to_ptr.hbm [resolvable:$true] %s2534_s26 }
 0xcbd   : > { %s2536_s25 = scalar_lea.hbm %s2535_s26, 4  ;;  %p2541_p0 = scmp.lt.s32.totalorder %s2535_s26, %s3267_s17 }
 0xcbe   : > { %p2537_p11 = scmp.ne.s32.totalorder %s2535_s26, %s2536_s25  ;;  %p2542_p1 = scmp.lt.s32.totalorder %s2540_s4, %s2536_s25 }
 0xcc0   : > { %p2538_p12 = pnand %p2537_p11, %p2730_p5  ;;  %p2543_p2 = por %p2542_p1, %p2541_p0 }
 0xcc2   : > { %p2539_p13 = pneg %p2538_p12 }
 0xcc4   : > { %p2544_p3 = pnand %p2543_p2, %p2539_p13 }
 0xce4   : > { %2057 = vadd.xlane.f32.xlu1 %v2056_v15 }
 0xd1c   : > { %v2028_v16 = vpop.permute.xlu1 %2027 }
 0xd1d   : > { %v2030_v1 = vmax.f32 %v2515_v8, %v2028_v16 }
 0xd24   : > { %v2032_v18 = vpop.permute.xlu1 %2031 }
 0xd25   : > { %v2034_v3 = vmax.f32 %v2030_v1, %v2032_v18 }
 0xd2c   : > { %v2036_v30 = vpop.permute.xlu1 %2035 }
 0xd2d   : > { %v2038_v17 = vmax.f32 %v2034_v3, %v2036_v30 }
 0xd2f   : > { %v2072_v13 = vsub.f32 1.0, %v2038_v17  ;;  %v2097_v19 = vsel %vm2094_vm10, %v2038_v17, 0.0 }
 0xd30   : > { %2098 = vst [vmem:[%s675_s29] sm:$0x3f] %v2097_v19 }
 0xd31   : > { %v2073_v11 = vsel %vm2071_vm15, %v2038_v17, %v2072_v13 }
 0xd32   : > { %2518 = vlog2.f32 %v2073_v11 }
 0xd38   : > { %v2519_v20 = vpop.eup %2518 }
 0xd39   : > { %v2075_v25 = vmul.f32 0.6931472, %v2519_v20 }
 0xd3b   : > { %v2076_v59 = vsub.f32 0.0, %v2075_v25 }
 0xd3d   : > { %vm2077_vm8 = vcmp.ne.f32.partialorder %v2076_v59, %v2076_v59 }
 0xd3e   : > { %v2078_v22 = vsel %vm2077_vm8, 0.0, %v2076_v59 }
 0xd3f   : > { %v2082_v32 = vsel %vm2079_vm0, %v2078_v22, 0.0 }
 0xd40   : > { %v2083_v36 = vsel %vm2067_vm6, %v2082_v32, 0.0 }
 0xd41   : > { %2084 = vadd.xlane.f32.xlu0 %v2083_v36 }
 0xd42   : > { %2547 = shalt.err (!%p2544_p3)
}
 0xd43   : > { %2346 = dma.vmem_to_hbm [thread:$0]  (%p2730_p5), %s2123_s21, 64, %s2125_s22, %s2103_s23   ;;  %vm2086_vm10 = vcmask 1045504  }
 0xd44   : > { %s678_s28 = scalar_lea.vmem %s3269_s19, %s2754_s2 }
 0xd57   : > { %v2058_v40 = vpop.xlane.xlu1 %2057 }
 0xd58   : > { %v2059_v23 = vsel %vm728_vm1, %v2058_v40, 0.0 }
 0xd59   : > { %v2060_v24 = vrot.slane %v2059_v23, 4 }
 0xd5b   : > { %v2061_v62 = vadd.f32 %v2060_v24, %v2059_v23 }
 0xd5d   : > { %v2062_v26 = vrot.slane %v2061_v62, 2 }
 0xd5f   : > { %v2063_v29 = vadd.f32 %v2062_v26, %v2061_v62 }
 0xd61   : > { %v2064_v35 = vrot.slane %v2063_v29, 1 }
 0xd63   : > { %v2065_v31 = vadd.f32 %v2064_v35, %v2063_v29 }
 0xdb4   : > { %v2085_v27 = vpop.xlane.xlu0 %2084 }
 0xdb5   : > { %v2087_v28 = vsel %vm2086_vm10, %v2085_v27, 0.0 }
 0xdb6   : > { %v2088_v7 = vrot.slane %v2087_v28, 4 }
 0xdb8   : > { %v2089_v33 = vadd.f32 %v2088_v7, %v2087_v28 }
 0xdba   : > { %v2090_v34 = vrot.slane %v2089_v33, 2 }
 0xdbc   : > { %v2091_v37 = vadd.f32 %v2090_v34, %v2089_v33 }
 0xdbe   : > { %v2092_v38 = vrot.slane %v2091_v37, 1 }
 0xdc0   : > { %v2093_v39 = vadd.f32 %v2092_v38, %v2091_v37 }
 0xdc2   : > { %v2099_v41 = vsel %vm784_vm3, %v2065_v31, %v2093_v39 }
 0xdc3   : > { %v2100_v42 = vsel %vm791_vm4, %v2099_v41, 0.0 }
 0xdc4   : > { %2101 = vst [vmem:[%s678_s28] sm:$0x1] %v2100_v42 }
 0xdc5 PF: > { %s3298_s0 = sld [smem:[#allocation7_spill]] }
 0xdc6   : > { %s3299_s5 = sld [smem:[#allocation5_spill]] }
 0xdcb   : > { %p2352_p4 = scmp.ge.s32.totalorder %s3298_s0, 2 }
 0xdcc   : > { %s2142_s10 = sand.u32 1, %s3299_s5  }
 0xdcd   : > { %p2349_p5 = pnand %p2352_p4, %p2734_p6  ;;  %s2143_s21 = scalar_lea.sflag [#allocation3], %s2142_s10 }
 0xdcf   : > { %p2350_p7 = pneg %p2349_p5 }
 0xdd1   : > { %2565 = dma.done.wait (%p2350_p7), %s2143_s21, 64  }
 0xdd2   : > { %2567 = vsyncadd (%p2350_p7), %s2143_s21, 4294967232  ;;  %s3301_s21 = sld [smem:[#allocation8_spill]]  ;;  %s3304_s0 = smov %s2574_s30 }
 0xdd3   : > { %s3302_s2 = sld [smem:[#allocation6_spill]] }
 0xdd4   : > { %s3303_s20 = sld [smem:[#allocation9_spill]] }
 0xdd8   : > { %p30_p8 = scmp.ge.s32.totalorder %s3301_s21, 4  }
 0xdd9   : > { %s3305_s30 = smov %s3302_s2 }
 0xdda   :  { %32 = sbr.rel (!%p30_p8) target bundleno = 11 (0xb), region = 159 }
 0xddf   :  { %2162 = vsyncpa [#allocation3], 1 }
 0xde0   :  { %2164 = vsyncpa [#allocation3 + $0x1], 1 }

</bundles_post_ra>
